<compile_context>
chip_gen: v7x
topology: tpu7x:2x2x1
jax: 0.10.0
libtpu: 0.0.40
codegen_flags: <defaults>
</compile_context>

<pallas_src>
import numpy as np
import jax
import jax.numpy as jnp
from jax.experimental import pallas as pl
from jax.experimental.pallas import tpu as pltpu

IN_DIM = 201          # LSTM input features per timestep
HID = 128             # LSTM hidden size
X_DIM = 384 + 67      # flat features concatenated with lstm_out (451)
MLP = 512
OUT_PAD = 128         # lane-dense padding of the final 512->1 layer


# ----------------------------- Pallas kernel ------------------------------ #
def _landlord_kernel(z_ref, x_ref,
                     wih_ref, whh_ref, blstm_ref,
                     w1h_ref, w1x_ref, b1_ref,
                     w2_ref, b2_ref, w3_ref, b3_ref,
                     w4_ref, b4_ref, w5_ref, b5_ref,
                     w6_ref, b6_ref,
                     out_ref, gx_ref, h_ref, c_ref):
    T, TB, _ = z_ref.shape
    cdt = whh_ref.dtype                     # compute (matmul operand) dtype, bf16 by default

    # ---- hoisted input->hidden matmul: ONE (T*TB, IN_DIM) @ (IN_DIM, 4H) MXU call ----
    # (T, TB, IN_DIM) -> (T*TB, IN_DIM) is a free sublane relabel since TB % 8 == 0.
    z_flat = z_ref[...].reshape(T * TB, IN_DIM)
    gx_ref[...] = (jnp.dot(z_flat, wih_ref[...],
                           preferred_element_type=jnp.float32)
                   + blstm_ref[...])                          # (T*TB, 4H), f32

    # ---- sequential recurrence: h/c persist in f32 VMEM scratch ----
    h_ref[...] = jnp.zeros_like(h_ref)
    c_ref[...] = jnp.zeros_like(c_ref)
    whh = whh_ref[...]                                        # (H, 4H), resident across steps
    for t in range(T):                                        # fully unrolled (T static)
        gates = (gx_ref[t * TB:(t + 1) * TB, :] +
                 jnp.dot(h_ref[...].astype(cdt), whh,
                         preferred_element_type=jnp.float32))  # (TB, 4H)
        # PyTorch gate order: i, f, g, o — slices at 128-lane boundaries.
        i = jax.nn.sigmoid(gates[:, 0 * HID:1 * HID])
        f = jax.nn.sigmoid(gates[:, 1 * HID:2 * HID])
        g = jnp.tanh(gates[:, 2 * HID:3 * HID])
        o = jax.nn.sigmoid(gates[:, 3 * HID:4 * HID])
        c = f * c_ref[...] + i * g
        c_ref[...] = c
        h_ref[...] = o * jnp.tanh(c)

    # ---- MLP head: dense1 on concat([h, x]) via row-split W1 (no in-kernel concat) ----
    def dense(a, w_ref, b_ref, relu=True):
        y = jnp.dot(a.astype(cdt), w_ref[...],
                    preferred_element_type=jnp.float32) + b_ref[...]
        return jnp.maximum(y, 0.0) if relu else y

    a = (jnp.dot(h_ref[...].astype(cdt), w1h_ref[...],
                 preferred_element_type=jnp.float32) +
         jnp.dot(x_ref[...], w1x_ref[...],
                 preferred_element_type=jnp.float32) +
         b1_ref[...])
    a = jnp.maximum(a, 0.0)
    a = dense(a, w2_ref, b2_ref)
    a = dense(a, w3_ref, b3_ref)
    a = dense(a, w4_ref, b4_ref)
    a = dense(a, w5_ref, b5_ref)
    out_ref[...] = dense(a, w6_ref, b6_ref, relu=False).astype(out_ref.dtype)


# ------------------------------- glue / host ------------------------------ #
def _weight_spec(shape):
    """Grid-invariant (weight/bias) block: single-buffered to halve its VMEM footprint."""
    idx = lambda b: (0, 0)
    buffered = getattr(pl, "Buffered", None)
    if buffered is not None:
        try:
            return pl.BlockSpec(shape, idx, pipeline_mode=buffered(1))
        except TypeError:                      # older jax without pipeline_mode kwarg
            pass
    return pl.BlockSpec(shape, idx)


def init_params(key):
    ks = jax.random.split(key, 16)

    def w(k, shape, scale=0.05):
        return scale * jax.random.normal(k, shape, jnp.float32)

    return {
        'w_ih': w(ks[0], (4 * HID, IN_DIM)),
        'w_hh': w(ks[1], (4 * HID, HID)),
        'b_ih': w(ks[2], (4 * HID,)),
        'b_hh': w(ks[3], (4 * HID,)),
        'w1':   w(ks[4], (MLP, HID + X_DIM)),
        'b1':   w(ks[5], (MLP,)),
        'w2':   w(ks[6], (MLP, MLP)),
        'b2':   w(ks[7], (MLP,)),
        'w3':   w(ks[8], (MLP, MLP)),
        'b3':   w(ks[9], (MLP,)),
        'w4':   w(ks[10], (MLP, MLP)),
        'b4':   w(ks[11], (MLP,)),
        'w5':   w(ks[12], (MLP, MLP)),
        'b5':   w(ks[13], (MLP,)),
        'w6':   w(ks[14], (1, MLP)),
        'b6':   w(ks[15], (1,)),
    }


def landlord_lstm_values(z, x, params, *, batch_tile=None, weight_dtype=jnp.bfloat16):
    """Fused LSTM + 6-layer MLP; returns values of shape (B, 1) in f32."""
    B, T, D = z.shape
    assert D == IN_DIM and x.shape == (B, X_DIM)

    # Pad the batch to a multiple of 8 so batch tiles are sublane-aligned and the
    # in-kernel (T, TB, D) -> (T*TB, D) reshape is a free relabel.
    B_pad = -(-B // 8) * 8
    if B_pad != B:
        z = jnp.concatenate([z, jnp.zeros((B_pad - B, T, D), z.dtype)], axis=0)
        x = jnp.concatenate([x, jnp.zeros((B_pad - B, X_DIM), x.dtype)], axis=0)

    if batch_tile is None:
        # >= 2 grid steps for large batches (v7x: work for both TensorCores) and a
        # bounded per-step z/x/gates VMEM working set.
        TB = 256 if (B_pad > 256 and B_pad % 256 == 0) else B_pad
    else:
        TB = batch_tile
    assert B_pad % TB == 0 and TB % 8 == 0, "batch tile must divide B_pad and be a multiple of 8"
    grid = (B_pad // TB,)

    cdt = weight_dtype
    # (T, B, D): contiguous per-timestep slabs for the hoisted gates scratch.
    # NOTE: this transpose is one extra HBM pass over z — negligible at DouZero sizes.
    z_t = jnp.transpose(z, (1, 0, 2)).astype(cdt)
    x_c = x.astype(cdt)

    wih = params['w_ih'].T.astype(cdt)                         # (IN_DIM, 4H)
    whh = params['w_hh'].T.astype(cdt)                         # (H, 4H)
    blstm = (params['b_ih'] + params['b_hh'])[None, :].astype(jnp.float32)   # (1, 4H)

    w1t = params['w1'].T                                       # (H + X_DIM, MLP)
    w1h, w1x = w1t[:HID].astype(cdt), w1t[HID:].astype(cdt)

    # Lane-dense final layer: pad 512->1 to 512->128 with zeros; slice column 0 after.
    w6p = jnp.zeros((MLP, OUT_PAD), jnp.float32).at[:, :1].set(params['w6'].T).astype(cdt)
    b6p = jnp.zeros((1, OUT_PAD), jnp.float32).at[:, :1].set(params['b6'][None, :])

    bias = lambda b: b[None, :].astype(jnp.float32)

    out = pl.pallas_call(
        _landlord_kernel,
        out_shape=jax.ShapeDtypeStruct((B_pad, OUT_PAD), jnp.float32),
        grid=grid,
        in_specs=[
            pl.BlockSpec((T, TB, IN_DIM), lambda b: (0, b, 0)),   # z   (batch-tiled)
            pl.BlockSpec((TB, X_DIM),     lambda b: (b, 0)),      # x   (batch-tiled)
            _weight_spec((IN_DIM, 4 * HID)),                      # W_ih^T
            _weight_spec((HID, 4 * HID)),                         # W_hh^T
            _weight_spec((1, 4 * HID)),                           # b_ih + b_hh
            _weight_spec((HID, MLP)),                             # W1^T rows for lstm_out
            _weight_spec((X_DIM, MLP)),                           # W1^T rows for x
            _weight_spec((1, MLP)),                               # b1
            _weight_spec((MLP, MLP)), _weight_spec((1, MLP)),     # W2^T, b2
            _weight_spec((MLP, MLP)), _weight_spec((1, MLP)),     # W3^T, b3
            _weight_spec((MLP, MLP)), _weight_spec((1, MLP)),     # W4^T, b4
            _weight_spec((MLP, MLP)), _weight_spec((1, MLP)),     # W5^T, b5
            _weight_spec((MLP, OUT_PAD)), _weight_spec((1, OUT_PAD)),  # W6^T (padded), b6
        ],
        out_specs=pl.BlockSpec((TB, OUT_PAD), lambda b: (b, 0)),
        scratch_shapes=[
            pltpu.VMEM((T * TB, 4 * HID), jnp.float32),   # hoisted gates_x
            pltpu.VMEM((TB, HID), jnp.float32),           # h
            pltpu.VMEM((TB, HID), jnp.float32),           # c
        ],
        compiler_params=pltpu.CompilerParams(
            dimension_semantics=("parallel",),
            vmem_limit_bytes=48 * 1024 * 1024),
    )(z_t, x_c, wih, whh, blstm,
      w1h, w1x, bias(params['b1']),
      params['w2'].T.astype(cdt), bias(params['b2']),
      params['w3'].T.astype(cdt), bias(params['b3']),
      params['w4'].T.astype(cdt), bias(params['b4']),
      params['w5'].T.astype(cdt), bias(params['b5']),
      w6p, b6p)

    return out[:B, :1]


def landlord_lstm_forward(z, x, params, return_value=False, exp_epsilon=0.0):
    """Mirrors LandlordLstmModel.forward."""
    values = landlord_lstm_values(z, x, params)                # (B, 1)
    if return_value:
        return dict(values=values)
    # TODO(synk): host-side numpy randomness — do not jax.jit this branch.
    if exp_epsilon > 0 and np.random.rand() < exp_epsilon:
        action = jnp.asarray(np.random.randint(values.shape[0]), jnp.int32)
    else:
        action = jnp.argmax(values[:, 0], axis=0)
    return dict(action=action)


# ------------------------- pure-JAX reference ------------------------------ #
def landlord_lstm_values_ref(z, x, params):
    B, T, _ = z.shape
    h = jnp.zeros((B, HID), jnp.float32)
    c = jnp.zeros((B, HID), jnp.float32)
    for t in range(T):
        gates = (z[:, t] @ params['w_ih'].T + params['b_ih'] +
                 h @ params['w_hh'].T + params['b_hh'])
        i, f, g, o = jnp.split(gates, 4, axis=-1)
        c = jax.nn.sigmoid(f) * c + jax.nn.sigmoid(i) * jnp.tanh(g)
        h = jax.nn.sigmoid(o) * jnp.tanh(c)
    a = jnp.concatenate([h, x], axis=-1)
    a = jnp.maximum(a @ params['w1'].T + params['b1'], 0.0)
    a = jnp.maximum(a @ params['w2'].T + params['b2'], 0.0)
    a = jnp.maximum(a @ params['w3'].T + params['b3'], 0.0)
    a = jnp.maximum(a @ params['w4'].T + params['b4'], 0.0)
    a = jnp.maximum(a @ params['w5'].T + params['b5'], 0.0)
    return a @ params['w6'].T + params['b6']


if __name__ == "__main__":
    key = jax.random.PRNGKey(0)
    kz, kx, kp = jax.random.split(key, 3)
    B, T = 8, 8
    z = jax.random.normal(kz, (B, T, IN_DIM), jnp.float32)
    x = jax.random.normal(kx, (B, X_DIM), jnp.float32)
    params = init_params(kp)

    out = jax.block_until_ready(landlord_lstm_values(z, x, params))
    ref = jax.block_until_ready(landlord_lstm_values_ref(z, x, params))
    # bf16 matmul operands with f32 accumulation -> modest tolerance; structural bugs
    # (gate order / slicing) would blow far past this.
    np.testing.assert_allclose(np.asarray(out), np.asarray(ref), rtol=3e-2, atol=3e-2)

    vals = landlord_lstm_forward(z, x, params, return_value=True)
    act = landlord_lstm_forward(z, x, params, return_value=False)
    jax.block_until_ready((vals['values'], act['action']))

    print("KERNEL_OK")
</pallas_src>

<mosaic_0001>
module attributes {stable_mosaic.version = 11 : i64} {
  func.func @_landlord_kernel(%arg0: i32, %arg1: memref<8x8x201xbf16, #tpu.memory_space<vmem>>, %arg2: memref<8x451xbf16, #tpu.memory_space<vmem>>, %arg3: memref<201x512xbf16, #tpu.memory_space<vmem>>, %arg4: memref<128x512xbf16, #tpu.memory_space<vmem>>, %arg5: memref<1x512xf32, #tpu.memory_space<vmem>>, %arg6: memref<128x512xbf16, #tpu.memory_space<vmem>>, %arg7: memref<451x512xbf16, #tpu.memory_space<vmem>>, %arg8: memref<1x512xf32, #tpu.memory_space<vmem>>, %arg9: memref<512x512xbf16, #tpu.memory_space<vmem>>, %arg10: memref<1x512xf32, #tpu.memory_space<vmem>>, %arg11: memref<512x512xbf16, #tpu.memory_space<vmem>>, %arg12: memref<1x512xf32, #tpu.memory_space<vmem>>, %arg13: memref<512x512xbf16, #tpu.memory_space<vmem>>, %arg14: memref<1x512xf32, #tpu.memory_space<vmem>>, %arg15: memref<512x512xbf16, #tpu.memory_space<vmem>>, %arg16: memref<1x512xf32, #tpu.memory_space<vmem>>, %arg17: memref<512x128xbf16, #tpu.memory_space<vmem>>, %arg18: memref<1x128xf32, #tpu.memory_space<vmem>>, %arg19: memref<8x128xf32, #tpu.memory_space<vmem>>, %arg20: memref<64x512xf32, #tpu.memory_space<vmem>>, %arg21: memref<8x128xf32, #tpu.memory_space<vmem>>, %arg22: memref<8x128xf32, #tpu.memory_space<vmem>>) attributes {dimension_semantics = [#tpu.dimension_semantics<parallel>], iteration_bounds = array<i64: 1>, scalar_prefetch = 0 : i64, scratch_operands = 3 : i64, tpu.core_type = #tpu.core_type<tc>, window_params = [{transform_indices = @transform_0, window_bounds = array<i64: 8, 8, 201>}, {transform_indices = @transform_1, window_bounds = array<i64: 8, 451>}, {pipeline_mode = #tpu.pipeline_mode<synchronous>, transform_indices = @transform_2, window_bounds = array<i64: 201, 512>}, {pipeline_mode = #tpu.pipeline_mode<synchronous>, transform_indices = @transform_3, window_bounds = array<i64: 128, 512>}, {pipeline_mode = #tpu.pipeline_mode<synchronous>, transform_indices = @transform_4, window_bounds = array<i64: 1, 512>}, {pipeline_mode = #tpu.pipeline_mode<synchronous>, transform_indices = @transform_5, window_bounds = array<i64: 128, 512>}, {pipeline_mode = #tpu.pipeline_mode<synchronous>, transform_indices = @transform_6, window_bounds = array<i64: 451, 512>}, {pipeline_mode = #tpu.pipeline_mode<synchronous>, transform_indices = @transform_7, window_bounds = array<i64: 1, 512>}, {pipeline_mode = #tpu.pipeline_mode<synchronous>, transform_indices = @transform_8, window_bounds = array<i64: 512, 512>}, {pipeline_mode = #tpu.pipeline_mode<synchronous>, transform_indices = @transform_9, window_bounds = array<i64: 1, 512>}, {pipeline_mode = #tpu.pipeline_mode<synchronous>, transform_indices = @transform_10, window_bounds = array<i64: 512, 512>}, {pipeline_mode = #tpu.pipeline_mode<synchronous>, transform_indices = @transform_11, window_bounds = array<i64: 1, 512>}, {pipeline_mode = #tpu.pipeline_mode<synchronous>, transform_indices = @transform_12, window_bounds = array<i64: 512, 512>}, {pipeline_mode = #tpu.pipeline_mode<synchronous>, transform_indices = @transform_13, window_bounds = array<i64: 1, 512>}, {pipeline_mode = #tpu.pipeline_mode<synchronous>, transform_indices = @transform_14, window_bounds = array<i64: 512, 512>}, {pipeline_mode = #tpu.pipeline_mode<synchronous>, transform_indices = @transform_15, window_bounds = array<i64: 1, 512>}, {pipeline_mode = #tpu.pipeline_mode<synchronous>, transform_indices = @transform_16, window_bounds = array<i64: 512, 128>}, {pipeline_mode = #tpu.pipeline_mode<synchronous>, transform_indices = @transform_17, window_bounds = array<i64: 1, 128>}, {transform_indices = @transform_18, window_bounds = array<i64: 8, 128>}]} {
    %c0 = arith.constant 0 : index
    %c0_0 = arith.constant 0 : index
    %c0_1 = arith.constant 0 : index
    %0 = vector.load %arg1[%c0, %c0_0, %c0_1] : memref<8x8x201xbf16, #tpu.memory_space<vmem>>, vector<8x8x201xbf16>
    %1 = vector.shape_cast %0 : vector<8x8x201xbf16> to vector<64x201xbf16>
    %c0_2 = arith.constant 0 : index
    %c0_3 = arith.constant 0 : index
    %2 = vector.load %arg3[%c0_2, %c0_3] : memref<201x512xbf16, #tpu.memory_space<vmem>>, vector<201x512xbf16>
    %cst = arith.constant dense<0.000000e+00> : vector<64x512xf32>
    %3 = tpu.matmul %1, %2, %cst {dimension_numbers = #tpu.dot_dimension_numbers<[1], [0], [0], [1], [0, 0, 1, 1], [], []>} : vector<64x201xbf16>, vector<201x512xbf16>, vector<64x512xf32> -> vector<64x512xf32>
    %c0_4 = arith.constant 0 : index
    %c0_5 = arith.constant 0 : index
    %4 = vector.load %arg5[%c0_4, %c0_5] : memref<1x512xf32, #tpu.memory_space<vmem>>, vector<1x512xf32>
    %5 = vector.broadcast %4 : vector<1x512xf32> to vector<64x512xf32>
    %6 = arith.addf %3, %5 : vector<64x512xf32>
    %c0_6 = arith.constant 0 : index
    %c0_7 = arith.constant 0 : index
    %7 = vector.load %arg20[%c0_6, %c0_7] : memref<64x512xf32, #tpu.memory_space<vmem>>, vector<64x512xf32>
    tpu.vector_store %arg20[%c0_6, %c0_7], %6 {strides = array<i32>} : memref<64x512xf32, #tpu.memory_space<vmem>>, vector<64x512xf32>,
    %cst_8 = arith.constant 0.000000e+00 : f32
    %8 = vector.broadcast %cst_8 : f32 to vector<8x128xf32>
    %c0_9 = arith.constant 0 : index
    %c0_10 = arith.constant 0 : index
    %9 = vector.load %arg21[%c0_9, %c0_10] : memref<8x128xf32, #tpu.memory_space<vmem>>, vector<8x128xf32>
    tpu.vector_store %arg21[%c0_9, %c0_10], %8 {strides = array<i32>} : memref<8x128xf32, #tpu.memory_space<vmem>>, vector<8x128xf32>,
    %cst_11 = arith.constant 0.000000e+00 : f32
    %10 = vector.broadcast %cst_11 : f32 to vector<8x128xf32>
    %c0_12 = arith.constant 0 : index
    %c0_13 = arith.constant 0 : index
    %11 = vector.load %arg22[%c0_12, %c0_13] : memref<8x128xf32, #tpu.memory_space<vmem>>, vector<8x128xf32>
    tpu.vector_store %arg22[%c0_12, %c0_13], %10 {strides = array<i32>} : memref<8x128xf32, #tpu.memory_space<vmem>>, vector<8x128xf32>,
    %c0_14 = arith.constant 0 : index
    %c0_15 = arith.constant 0 : index
    %12 = vector.load %arg4[%c0_14, %c0_15] : memref<128x512xbf16, #tpu.memory_space<vmem>>, vector<128x512xbf16>
    %c0_16 = arith.constant 0 : index
    %c0_17 = arith.constant 0 : index
    %13 = vector.load %arg20[%c0_16, %c0_17] : memref<64x512xf32, #tpu.memory_space<vmem>>, vector<8x512xf32>
    %c0_18 = arith.constant 0 : index
    %c0_19 = arith.constant 0 : index
    %14 = vector.load %arg21[%c0_18, %c0_19] : memref<8x128xf32, #tpu.memory_space<vmem>>, vector<8x128xf32>
    %15 = arith.truncf %14 : vector<8x128xf32> to vector<8x128xbf16>
    %cst_20 = arith.constant dense<0.000000e+00> : vector<8x512xf32>
    %16 = tpu.matmul %15, %12, %cst_20 {dimension_numbers = #tpu.dot_dimension_numbers<[1], [0], [0], [1], [0, 0, 1, 1], [], []>} : vector<8x128xbf16>, vector<128x512xbf16>, vector<8x512xf32> -> vector<8x512xf32>
    %17 = arith.addf %13, %16 : vector<8x512xf32>
    %18 = vector.extract_strided_slice %17 {offsets = [0, 0], sizes = [8, 128], strides = [1, 1]} : vector<8x512xf32> to vector<8x128xf32>
    %19 = arith.negf %18 : vector<8x128xf32>
    %20 = math.exp %19 : vector<8x128xf32>
    %cst_21 = arith.constant 1.000000e+00 : f32
    %21 = vector.broadcast %cst_21 : f32 to vector<8x128xf32>
    %22 = arith.addf %21, %20 : vector<8x128xf32>
    %23 = arith.divf %21, %22 : vector<8x128xf32>
    %24 = vector.extract_strided_slice %17 {offsets = [0, 128], sizes = [8, 128], strides = [1, 1]} : vector<8x512xf32> to vector<8x128xf32>
    %25 = arith.negf %24 : vector<8x128xf32>
    %26 = math.exp %25 : vector<8x128xf32>
    %cst_22 = arith.constant 1.000000e+00 : f32
    %27 = vector.broadcast %cst_22 : f32 to vector<8x128xf32>
    %28 = arith.addf %27, %26 : vector<8x128xf32>
    %29 = arith.divf %27, %28 : vector<8x128xf32>
    %30 = vector.extract_strided_slice %17 {offsets = [0, 256], sizes = [8, 128], strides = [1, 1]} : vector<8x512xf32> to vector<8x128xf32>
    %31 = math.tanh %30 : vector<8x128xf32>
    %32 = vector.extract_strided_slice %17 {offsets = [0, 384], sizes = [8, 128], strides = [1, 1]} : vector<8x512xf32> to vector<8x128xf32>
    %33 = arith.negf %32 : vector<8x128xf32>
    %34 = math.exp %33 : vector<8x128xf32>
    %cst_23 = arith.constant 1.000000e+00 : f32
    %35 = vector.broadcast %cst_23 : f32 to vector<8x128xf32>
    %36 = arith.addf %35, %34 : vector<8x128xf32>
    %37 = arith.divf %35, %36 : vector<8x128xf32>
    %c0_24 = arith.constant 0 : index
    %c0_25 = arith.constant 0 : index
    %38 = vector.load %arg22[%c0_24, %c0_25] : memref<8x128xf32, #tpu.memory_space<vmem>>, vector<8x128xf32>
    %39 = arith.mulf %29, %38 : vector<8x128xf32>
    %40 = arith.mulf %23, %31 : vector<8x128xf32>
    %41 = arith.addf %39, %40 : vector<8x128xf32>
    %c0_26 = arith.constant 0 : index
    %c0_27 = arith.constant 0 : index
    %42 = vector.load %arg22[%c0_26, %c0_27] : memref<8x128xf32, #tpu.memory_space<vmem>>, vector<8x128xf32>
    tpu.vector_store %arg22[%c0_26, %c0_27], %41 {strides = array<i32>} : memref<8x128xf32, #tpu.memory_space<vmem>>, vector<8x128xf32>,
    %43 = math.tanh %41 : vector<8x128xf32>
    %44 = arith.mulf %37, %43 : vector<8x128xf32>
    %c0_28 = arith.constant 0 : index
    %c0_29 = arith.constant 0 : index
    %45 = vector.load %arg21[%c0_28, %c0_29] : memref<8x128xf32, #tpu.memory_space<vmem>>, vector<8x128xf32>
    tpu.vector_store %arg21[%c0_28, %c0_29], %44 {strides = array<i32>} : memref<8x128xf32, #tpu.memory_space<vmem>>, vector<8x128xf32>,
    %c8 = arith.constant 8 : index
    %c0_30 = arith.constant 0 : index
    %46 = vector.load %arg20[%c8, %c0_30] : memref<64x512xf32, #tpu.memory_space<vmem>>, vector<8x512xf32>
    %c0_31 = arith.constant 0 : index
    %c0_32 = arith.constant 0 : index
    %47 = vector.load %arg21[%c0_31, %c0_32] : memref<8x128xf32, #tpu.memory_space<vmem>>, vector<8x128xf32>
    %48 = arith.truncf %47 : vector<8x128xf32> to vector<8x128xbf16>
    %cst_33 = arith.constant dense<0.000000e+00> : vector<8x512xf32>
    %49 = tpu.matmul %48, %12, %cst_33 {dimension_numbers = #tpu.dot_dimension_numbers<[1], [0], [0], [1], [0, 0, 1, 1], [], []>} : vector<8x128xbf16>, vector<128x512xbf16>, vector<8x512xf32> -> vector<8x512xf32>
    %50 = arith.addf %46, %49 : vector<8x512xf32>
    %51 = vector.extract_strided_slice %50 {offsets = [0, 0], sizes = [8, 128], strides = [1, 1]} : vector<8x512xf32> to vector<8x128xf32>
    %52 = arith.negf %51 : vector<8x128xf32>
    %53 = math.exp %52 : vector<8x128xf32>
    %cst_34 = arith.constant 1.000000e+00 : f32
    %54 = vector.broadcast %cst_34 : f32 to vector<8x128xf32>
    %55 = arith.addf %54, %53 : vector<8x128xf32>
    %56 = arith.divf %54, %55 : vector<8x128xf32>
    %57 = vector.extract_strided_slice %50 {offsets = [0, 128], sizes = [8, 128], strides = [1, 1]} : vector<8x512xf32> to vector<8x128xf32>
    %58 = arith.negf %57 : vector<8x128xf32>
    %59 = math.exp %58 : vector<8x128xf32>
    %cst_35 = arith.constant 1.000000e+00 : f32
    %60 = vector.broadcast %cst_35 : f32 to vector<8x128xf32>
    %61 = arith.addf %60, %59 : vector<8x128xf32>
    %62 = arith.divf %60, %61 : vector<8x128xf32>
    %63 = vector.extract_strided_slice %50 {offsets = [0, 256], sizes = [8, 128], strides = [1, 1]} : vector<8x512xf32> to vector<8x128xf32>
    %64 = math.tanh %63 : vector<8x128xf32>
    %65 = vector.extract_strided_slice %50 {offsets = [0, 384], sizes = [8, 128], strides = [1, 1]} : vector<8x512xf32> to vector<8x128xf32>
    %66 = arith.negf %65 : vector<8x128xf32>
    %67 = math.exp %66 : vector<8x128xf32>
    %cst_36 = arith.constant 1.000000e+00 : f32
    %68 = vector.broadcast %cst_36 : f32 to vector<8x128xf32>
    %69 = arith.addf %68, %67 : vector<8x128xf32>
    %70 = arith.divf %68, %69 : vector<8x128xf32>
    %c0_37 = arith.constant 0 : index
    %c0_38 = arith.constant 0 : index
    %71 = vector.load %arg22[%c0_37, %c0_38] : memref<8x128xf32, #tpu.memory_space<vmem>>, vector<8x128xf32>
    %72 = arith.mulf %62, %71 : vector<8x128xf32>
    %73 = arith.mulf %56, %64 : vector<8x128xf32>
    %74 = arith.addf %72, %73 : vector<8x128xf32>
    %c0_39 = arith.constant 0 : index
    %c0_40 = arith.constant 0 : index
    %75 = vector.load %arg22[%c0_39, %c0_40] : memref<8x128xf32, #tpu.memory_space<vmem>>, vector<8x128xf32>
    tpu.vector_store %arg22[%c0_39, %c0_40], %74 {strides = array<i32>} : memref<8x128xf32, #tpu.memory_space<vmem>>, vector<8x128xf32>,
    %76 = math.tanh %74 : vector<8x128xf32>
    %77 = arith.mulf %70, %76 : vector<8x128xf32>
    %c0_41 = arith.constant 0 : index
    %c0_42 = arith.constant 0 : index
    %78 = vector.load %arg21[%c0_41, %c0_42] : memref<8x128xf32, #tpu.memory_space<vmem>>, vector<8x128xf32>
    tpu.vector_store %arg21[%c0_41, %c0_42], %77 {strides = array<i32>} : memref<8x128xf32, #tpu.memory_space<vmem>>, vector<8x128xf32>,
    %c16 = arith.constant 16 : index
    %c0_43 = arith.constant 0 : index
    %79 = vector.load %arg20[%c16, %c0_43] : memref<64x512xf32, #tpu.memory_space<vmem>>, vector<8x512xf32>
    %c0_44 = arith.constant 0 : index
    %c0_45 = arith.constant 0 : index
    %80 = vector.load %arg21[%c0_44, %c0_45] : memref<8x128xf32, #tpu.memory_space<vmem>>, vector<8x128xf32>
    %81 = arith.truncf %80 : vector<8x128xf32> to vector<8x128xbf16>
    %cst_46 = arith.constant dense<0.000000e+00> : vector<8x512xf32>
    %82 = tpu.matmul %81, %12, %cst_46 {dimension_numbers = #tpu.dot_dimension_numbers<[1], [0], [0], [1], [0, 0, 1, 1], [], []>} : vector<8x128xbf16>, vector<128x512xbf16>, vector<8x512xf32> -> vector<8x512xf32>
    %83 = arith.addf %79, %82 : vector<8x512xf32>
    %84 = vector.extract_strided_slice %83 {offsets = [0, 0], sizes = [8, 128], strides = [1, 1]} : vector<8x512xf32> to vector<8x128xf32>
    %85 = arith.negf %84 : vector<8x128xf32>
    %86 = math.exp %85 : vector<8x128xf32>
    %cst_47 = arith.constant 1.000000e+00 : f32
    %87 = vector.broadcast %cst_47 : f32 to vector<8x128xf32>
    %88 = arith.addf %87, %86 : vector<8x128xf32>
    %89 = arith.divf %87, %88 : vector<8x128xf32>
    %90 = vector.extract_strided_slice %83 {offsets = [0, 128], sizes = [8, 128], strides = [1, 1]} : vector<8x512xf32> to vector<8x128xf32>
    %91 = arith.negf %90 : vector<8x128xf32>
    %92 = math.exp %91 : vector<8x128xf32>
    %cst_48 = arith.constant 1.000000e+00 : f32
    %93 = vector.broadcast %cst_48 : f32 to vector<8x128xf32>
    %94 = arith.addf %93, %92 : vector<8x128xf32>
    %95 = arith.divf %93, %94 : vector<8x128xf32>
    %96 = vector.extract_strided_slice %83 {offsets = [0, 256], sizes = [8, 128], strides = [1, 1]} : vector<8x512xf32> to vector<8x128xf32>
    %97 = math.tanh %96 : vector<8x128xf32>
    %98 = vector.extract_strided_slice %83 {offsets = [0, 384], sizes = [8, 128], strides = [1, 1]} : vector<8x512xf32> to vector<8x128xf32>
    %99 = arith.negf %98 : vector<8x128xf32>
    %100 = math.exp %99 : vector<8x128xf32>
    %cst_49 = arith.constant 1.000000e+00 : f32
    %101 = vector.broadcast %cst_49 : f32 to vector<8x128xf32>
    %102 = arith.addf %101, %100 : vector<8x128xf32>
    %103 = arith.divf %101, %102 : vector<8x128xf32>
    %c0_50 = arith.constant 0 : index
    %c0_51 = arith.constant 0 : index
    %104 = vector.load %arg22[%c0_50, %c0_51] : memref<8x128xf32, #tpu.memory_space<vmem>>, vector<8x128xf32>
    %105 = arith.mulf %95, %104 : vector<8x128xf32>
    %106 = arith.mulf %89, %97 : vector<8x128xf32>
    %107 = arith.addf %105, %106 : vector<8x128xf32>
    %c0_52 = arith.constant 0 : index
    %c0_53 = arith.constant 0 : index
    %108 = vector.load %arg22[%c0_52, %c0_53] : memref<8x128xf32, #tpu.memory_space<vmem>>, vector<8x128xf32>
    tpu.vector_store %arg22[%c0_52, %c0_53], %107 {strides = array<i32>} : memref<8x128xf32, #tpu.memory_space<vmem>>, vector<8x128xf32>,
    %109 = math.tanh %107 : vector<8x128xf32>
    %110 = arith.mulf %103, %109 : vector<8x128xf32>
    %c0_54 = arith.constant 0 : index
    %c0_55 = arith.constant 0 : index
    %111 = vector.load %arg21[%c0_54, %c0_55] : memref<8x128xf32, #tpu.memory_space<vmem>>, vector<8x128xf32>
    tpu.vector_store %arg21[%c0_54, %c0_55], %110 {strides = array<i32>} : memref<8x128xf32, #tpu.memory_space<vmem>>, vector<8x128xf32>,
    %c24 = arith.constant 24 : index
    %c0_56 = arith.constant 0 : index
    %112 = vector.load %arg20[%c24, %c0_56] : memref<64x512xf32, #tpu.memory_space<vmem>>, vector<8x512xf32>
    %c0_57 = arith.constant 0 : index
    %c0_58 = arith.constant 0 : index
    %113 = vector.load %arg21[%c0_57, %c0_58] : memref<8x128xf32, #tpu.memory_space<vmem>>, vector<8x128xf32>
    %114 = arith.truncf %113 : vector<8x128xf32> to vector<8x128xbf16>
    %cst_59 = arith.constant dense<0.000000e+00> : vector<8x512xf32>
    %115 = tpu.matmul %114, %12, %cst_59 {dimension_numbers = #tpu.dot_dimension_numbers<[1], [0], [0], [1], [0, 0, 1, 1], [], []>} : vector<8x128xbf16>, vector<128x512xbf16>, vector<8x512xf32> -> vector<8x512xf32>
    %116 = arith.addf %112, %115 : vector<8x512xf32>
    %117 = vector.extract_strided_slice %116 {offsets = [0, 0], sizes = [8, 128], strides = [1, 1]} : vector<8x512xf32> to vector<8x128xf32>
    %118 = arith.negf %117 : vector<8x128xf32>
    %119 = math.exp %118 : vector<8x128xf32>
    %cst_60 = arith.constant 1.000000e+00 : f32
    %120 = vector.broadcast %cst_60 : f32 to vector<8x128xf32>
    %121 = arith.addf %120, %119 : vector<8x128xf32>
    %122 = arith.divf %120, %121 : vector<8x128xf32>
    %123 = vector.extract_strided_slice %116 {offsets = [0, 128], sizes = [8, 128], strides = [1, 1]} : vector<8x512xf32> to vector<8x128xf32>
    %124 = arith.negf %123 : vector<8x128xf32>
    %125 = math.exp %124 : vector<8x128xf32>
    %cst_61 = arith.constant 1.000000e+00 : f32
    %126 = vector.broadcast %cst_61 : f32 to vector<8x128xf32>
    %127 = arith.addf %126, %125 : vector<8x128xf32>
    %128 = arith.divf %126, %127 : vector<8x128xf32>
    %129 = vector.extract_strided_slice %116 {offsets = [0, 256], sizes = [8, 128], strides = [1, 1]} : vector<8x512xf32> to vector<8x128xf32>
    %130 = math.tanh %129 : vector<8x128xf32>
    %131 = vector.extract_strided_slice %116 {offsets = [0, 384], sizes = [8, 128], strides = [1, 1]} : vector<8x512xf32> to vector<8x128xf32>
    %132 = arith.negf %131 : vector<8x128xf32>
    %133 = math.exp %132 : vector<8x128xf32>
    %cst_62 = arith.constant 1.000000e+00 : f32
    %134 = vector.broadcast %cst_62 : f32 to vector<8x128xf32>
    %135 = arith.addf %134, %133 : vector<8x128xf32>
    %136 = arith.divf %134, %135 : vector<8x128xf32>
    %c0_63 = arith.constant 0 : index
    %c0_64 = arith.constant 0 : index
    %137 = vector.load %arg22[%c0_63, %c0_64] : memref<8x128xf32, #tpu.memory_space<vmem>>, vector<8x128xf32>
    %138 = arith.mulf %128, %137 : vector<8x128xf32>
    %139 = arith.mulf %122, %130 : vector<8x128xf32>
    %140 = arith.addf %138, %139 : vector<8x128xf32>
    %c0_65 = arith.constant 0 : index
    %c0_66 = arith.constant 0 : index
    %141 = vector.load %arg22[%c0_65, %c0_66] : memref<8x128xf32, #tpu.memory_space<vmem>>, vector<8x128xf32>
    tpu.vector_store %arg22[%c0_65, %c0_66], %140 {strides = array<i32>} : memref<8x128xf32, #tpu.memory_space<vmem>>, vector<8x128xf32>,
    %142 = math.tanh %140 : vector<8x128xf32>
    %143 = arith.mulf %136, %142 : vector<8x128xf32>
    %c0_67 = arith.constant 0 : index
    %c0_68 = arith.constant 0 : index
    %144 = vector.load %arg21[%c0_67, %c0_68] : memref<8x128xf32, #tpu.memory_space<vmem>>, vector<8x128xf32>
    tpu.vector_store %arg21[%c0_67, %c0_68], %143 {strides = array<i32>} : memref<8x128xf32, #tpu.memory_space<vmem>>, vector<8x128xf32>,
    %c32 = arith.constant 32 : index
    %c0_69 = arith.constant 0 : index
    %145 = vector.load %arg20[%c32, %c0_69] : memref<64x512xf32, #tpu.memory_space<vmem>>, vector<8x512xf32>
    %c0_70 = arith.constant 0 : index
    %c0_71 = arith.constant 0 : index
    %146 = vector.load %arg21[%c0_70, %c0_71] : memref<8x128xf32, #tpu.memory_space<vmem>>, vector<8x128xf32>
    %147 = arith.truncf %146 : vector<8x128xf32> to vector<8x128xbf16>
    %cst_72 = arith.constant dense<0.000000e+00> : vector<8x512xf32>
    %148 = tpu.matmul %147, %12, %cst_72 {dimension_numbers = #tpu.dot_dimension_numbers<[1], [0], [0], [1], [0, 0, 1, 1], [], []>} : vector<8x128xbf16>, vector<128x512xbf16>, vector<8x512xf32> -> vector<8x512xf32>
    %149 = arith.addf %145, %148 : vector<8x512xf32>
    %150 = vector.extract_strided_slice %149 {offsets = [0, 0], sizes = [8, 128], strides = [1, 1]} : vector<8x512xf32> to vector<8x128xf32>
    %151 = arith.negf %150 : vector<8x128xf32>
    %152 = math.exp %151 : vector<8x128xf32>
    %cst_73 = arith.constant 1.000000e+00 : f32
    %153 = vector.broadcast %cst_73 : f32 to vector<8x128xf32>
    %154 = arith.addf %153, %152 : vector<8x128xf32>
    %155 = arith.divf %153, %154 : vector<8x128xf32>
    %156 = vector.extract_strided_slice %149 {offsets = [0, 128], sizes = [8, 128], strides = [1, 1]} : vector<8x512xf32> to vector<8x128xf32>
    %157 = arith.negf %156 : vector<8x128xf32>
    %158 = math.exp %157 : vector<8x128xf32>
    %cst_74 = arith.constant 1.000000e+00 : f32
    %159 = vector.broadcast %cst_74 : f32 to vector<8x128xf32>
    %160 = arith.addf %159, %158 : vector<8x128xf32>
    %161 = arith.divf %159, %160 : vector<8x128xf32>
    %162 = vector.extract_strided_slice %149 {offsets = [0, 256], sizes = [8, 128], strides = [1, 1]} : vector<8x512xf32> to vector<8x128xf32>
    %163 = math.tanh %162 : vector<8x128xf32>
    %164 = vector.extract_strided_slice %149 {offsets = [0, 384], sizes = [8, 128], strides = [1, 1]} : vector<8x512xf32> to vector<8x128xf32>
    %165 = arith.negf %164 : vector<8x128xf32>
    %166 = math.exp %165 : vector<8x128xf32>
    %cst_75 = arith.constant 1.000000e+00 : f32
    %167 = vector.broadcast %cst_75 : f32 to vector<8x128xf32>
    %168 = arith.addf %167, %166 : vector<8x128xf32>
    %169 = arith.divf %167, %168 : vector<8x128xf32>
    %c0_76 = arith.constant 0 : index
    %c0_77 = arith.constant 0 : index
    %170 = vector.load %arg22[%c0_76, %c0_77] : memref<8x128xf32, #tpu.memory_space<vmem>>, vector<8x128xf32>
    %171 = arith.mulf %161, %170 : vector<8x128xf32>
    %172 = arith.mulf %155, %163 : vector<8x128xf32>
    %173 = arith.addf %171, %172 : vector<8x128xf32>
    %c0_78 = arith.constant 0 : index
    %c0_79 = arith.constant 0 : index
    %174 = vector.load %arg22[%c0_78, %c0_79] : memref<8x128xf32, #tpu.memory_space<vmem>>, vector<8x128xf32>
    tpu.vector_store %arg22[%c0_78, %c0_79], %173 {strides = array<i32>} : memref<8x128xf32, #tpu.memory_space<vmem>>, vector<8x128xf32>,
    %175 = math.tanh %173 : vector<8x128xf32>
    %176 = arith.mulf %169, %175 : vector<8x128xf32>
    %c0_80 = arith.constant 0 : index
    %c0_81 = arith.constant 0 : index
    %177 = vector.load %arg21[%c0_80, %c0_81] : memref<8x128xf32, #tpu.memory_space<vmem>>, vector<8x128xf32>
    tpu.vector_store %arg21[%c0_80, %c0_81], %176 {strides = array<i32>} : memref<8x128xf32, #tpu.memory_space<vmem>>, vector<8x128xf32>,
    %c40 = arith.constant 40 : index
    %c0_82 = arith.constant 0 : index
    %178 = vector.load %arg20[%c40, %c0_82] : memref<64x512xf32, #tpu.memory_space<vmem>>, vector<8x512xf32>
    %c0_83 = arith.constant 0 : index
    %c0_84 = arith.constant 0 : index
    %179 = vector.load %arg21[%c0_83, %c0_84] : memref<8x128xf32, #tpu.memory_space<vmem>>, vector<8x128xf32>
    %180 = arith.truncf %179 : vector<8x128xf32> to vector<8x128xbf16>
    %cst_85 = arith.constant dense<0.000000e+00> : vector<8x512xf32>
    %181 = tpu.matmul %180, %12, %cst_85 {dimension_numbers = #tpu.dot_dimension_numbers<[1], [0], [0], [1], [0, 0, 1, 1], [], []>} : vector<8x128xbf16>, vector<128x512xbf16>, vector<8x512xf32> -> vector<8x512xf32>
    %182 = arith.addf %178, %181 : vector<8x512xf32>
    %183 = vector.extract_strided_slice %182 {offsets = [0, 0], sizes = [8, 128], strides = [1, 1]} : vector<8x512xf32> to vector<8x128xf32>
    %184 = arith.negf %183 : vector<8x128xf32>
    %185 = math.exp %184 : vector<8x128xf32>
    %cst_86 = arith.constant 1.000000e+00 : f32
    %186 = vector.broadcast %cst_86 : f32 to vector<8x128xf32>
    %187 = arith.addf %186, %185 : vector<8x128xf32>
    %188 = arith.divf %186, %187 : vector<8x128xf32>
    %189 = vector.extract_strided_slice %182 {offsets = [0, 128], sizes = [8, 128], strides = [1, 1]} : vector<8x512xf32> to vector<8x128xf32>
    %190 = arith.negf %189 : vector<8x128xf32>
    %191 = math.exp %190 : vector<8x128xf32>
    %cst_87 = arith.constant 1.000000e+00 : f32
    %192 = vector.broadcast %cst_87 : f32 to vector<8x128xf32>
    %193 = arith.addf %192, %191 : vector<8x128xf32>
    %194 = arith.divf %192, %193 : vector<8x128xf32>
    %195 = vector.extract_strided_slice %182 {offsets = [0, 256], sizes = [8, 128], strides = [1, 1]} : vector<8x512xf32> to vector<8x128xf32>
    %196 = math.tanh %195 : vector<8x128xf32>
    %197 = vector.extract_strided_slice %182 {offsets = [0, 384], sizes = [8, 128], strides = [1, 1]} : vector<8x512xf32> to vector<8x128xf32>
    %198 = arith.negf %197 : vector<8x128xf32>
    %199 = math.exp %198 : vector<8x128xf32>
    %cst_88 = arith.constant 1.000000e+00 : f32
    %200 = vector.broadcast %cst_88 : f32 to vector<8x128xf32>
    %201 = arith.addf %200, %199 : vector<8x128xf32>
    %202 = arith.divf %200, %201 : vector<8x128xf32>
    %c0_89 = arith.constant 0 : index
    %c0_90 = arith.constant 0 : index
    %203 = vector.load %arg22[%c0_89, %c0_90] : memref<8x128xf32, #tpu.memory_space<vmem>>, vector<8x128xf32>
    %204 = arith.mulf %194, %203 : vector<8x128xf32>
    %205 = arith.mulf %188, %196 : vector<8x128xf32>
    %206 = arith.addf %204, %205 : vector<8x128xf32>
    %c0_91 = arith.constant 0 : index
    %c0_92 = arith.constant 0 : index
    %207 = vector.load %arg22[%c0_91, %c0_92] : memref<8x128xf32, #tpu.memory_space<vmem>>, vector<8x128xf32>
    tpu.vector_store %arg22[%c0_91, %c0_92], %206 {strides = array<i32>} : memref<8x128xf32, #tpu.memory_space<vmem>>, vector<8x128xf32>,
    %208 = math.tanh %206 : vector<8x128xf32>
    %209 = arith.mulf %202, %208 : vector<8x128xf32>
    %c0_93 = arith.constant 0 : index
    %c0_94 = arith.constant 0 : index
    %210 = vector.load %arg21[%c0_93, %c0_94] : memref<8x128xf32, #tpu.memory_space<vmem>>, vector<8x128xf32>
    tpu.vector_store %arg21[%c0_93, %c0_94], %209 {strides = array<i32>} : memref<8x128xf32, #tpu.memory_space<vmem>>, vector<8x128xf32>,
    %c48 = arith.constant 48 : index
    %c0_95 = arith.constant 0 : index
    %211 = vector.load %arg20[%c48, %c0_95] : memref<64x512xf32, #tpu.memory_space<vmem>>, vector<8x512xf32>
    %c0_96 = arith.constant 0 : index
    %c0_97 = arith.constant 0 : index
    %212 = vector.load %arg21[%c0_96, %c0_97] : memref<8x128xf32, #tpu.memory_space<vmem>>, vector<8x128xf32>
    %213 = arith.truncf %212 : vector<8x128xf32> to vector<8x128xbf16>
    %cst_98 = arith.constant dense<0.000000e+00> : vector<8x512xf32>
    %214 = tpu.matmul %213, %12, %cst_98 {dimension_numbers = #tpu.dot_dimension_numbers<[1], [0], [0], [1], [0, 0, 1, 1], [], []>} : vector<8x128xbf16>, vector<128x512xbf16>, vector<8x512xf32> -> vector<8x512xf32>
    %215 = arith.addf %211, %214 : vector<8x512xf32>
    %216 = vector.extract_strided_slice %215 {offsets = [0, 0], sizes = [8, 128], strides = [1, 1]} : vector<8x512xf32> to vector<8x128xf32>
    %217 = arith.negf %216 : vector<8x128xf32>
    %218 = math.exp %217 : vector<8x128xf32>
    %cst_99 = arith.constant 1.000000e+00 : f32
    %219 = vector.broadcast %cst_99 : f32 to vector<8x128xf32>
    %220 = arith.addf %219, %218 : vector<8x128xf32>
    %221 = arith.divf %219, %220 : vector<8x128xf32>
    %222 = vector.extract_strided_slice %215 {offsets = [0, 128], sizes = [8, 128], strides = [1, 1]} : vector<8x512xf32> to vector<8x128xf32>
    %223 = arith.negf %222 : vector<8x128xf32>
    %224 = math.exp %223 : vector<8x128xf32>
    %cst_100 = arith.constant 1.000000e+00 : f32
    %225 = vector.broadcast %cst_100 : f32 to vector<8x128xf32>
    %226 = arith.addf %225, %224 : vector<8x128xf32>
    %227 = arith.divf %225, %226 : vector<8x128xf32>
    %228 = vector.extract_strided_slice %215 {offsets = [0, 256], sizes = [8, 128], strides = [1, 1]} : vector<8x512xf32> to vector<8x128xf32>
    %229 = math.tanh %228 : vector<8x128xf32>
    %230 = vector.extract_strided_slice %215 {offsets = [0, 384], sizes = [8, 128], strides = [1, 1]} : vector<8x512xf32> to vector<8x128xf32>
    %231 = arith.negf %230 : vector<8x128xf32>
    %232 = math.exp %231 : vector<8x128xf32>
    %cst_101 = arith.constant 1.000000e+00 : f32
    %233 = vector.broadcast %cst_101 : f32 to vector<8x128xf32>
    %234 = arith.addf %233, %232 : vector<8x128xf32>
    %235 = arith.divf %233, %234 : vector<8x128xf32>
    %c0_102 = arith.constant 0 : index
    %c0_103 = arith.constant 0 : index
    %236 = vector.load %arg22[%c0_102, %c0_103] : memref<8x128xf32, #tpu.memory_space<vmem>>, vector<8x128xf32>
    %237 = arith.mulf %227, %236 : vector<8x128xf32>
    %238 = arith.mulf %221, %229 : vector<8x128xf32>
    %239 = arith.addf %237, %238 : vector<8x128xf32>
    %c0_104 = arith.constant 0 : index
    %c0_105 = arith.constant 0 : index
    %240 = vector.load %arg22[%c0_104, %c0_105] : memref<8x128xf32, #tpu.memory_space<vmem>>, vector<8x128xf32>
    tpu.vector_store %arg22[%c0_104, %c0_105], %239 {strides = array<i32>} : memref<8x128xf32, #tpu.memory_space<vmem>>, vector<8x128xf32>,
    %241 = math.tanh %239 : vector<8x128xf32>
    %242 = arith.mulf %235, %241 : vector<8x128xf32>
    %c0_106 = arith.constant 0 : index
    %c0_107 = arith.constant 0 : index
    %243 = vector.load %arg21[%c0_106, %c0_107] : memref<8x128xf32, #tpu.memory_space<vmem>>, vector<8x128xf32>
    tpu.vector_store %arg21[%c0_106, %c0_107], %242 {strides = array<i32>} : memref<8x128xf32, #tpu.memory_space<vmem>>, vector<8x128xf32>,
    %c56 = arith.constant 56 : index
    %c0_108 = arith.constant 0 : index
    %244 = vector.load %arg20[%c56, %c0_108] : memref<64x512xf32, #tpu.memory_space<vmem>>, vector<8x512xf32>
    %c0_109 = arith.constant 0 : index
    %c0_110 = arith.constant 0 : index
    %245 = vector.load %arg21[%c0_109, %c0_110] : memref<8x128xf32, #tpu.memory_space<vmem>>, vector<8x128xf32>
    %246 = arith.truncf %245 : vector<8x128xf32> to vector<8x128xbf16>
    %cst_111 = arith.constant dense<0.000000e+00> : vector<8x512xf32>
    %247 = tpu.matmul %246, %12, %cst_111 {dimension_numbers = #tpu.dot_dimension_numbers<[1], [0], [0], [1], [0, 0, 1, 1], [], []>} : vector<8x128xbf16>, vector<128x512xbf16>, vector<8x512xf32> -> vector<8x512xf32>
    %248 = arith.addf %244, %247 : vector<8x512xf32>
    %249 = vector.extract_strided_slice %248 {offsets = [0, 0], sizes = [8, 128], strides = [1, 1]} : vector<8x512xf32> to vector<8x128xf32>
    %250 = arith.negf %249 : vector<8x128xf32>
    %251 = math.exp %250 : vector<8x128xf32>
    %cst_112 = arith.constant 1.000000e+00 : f32
    %252 = vector.broadcast %cst_112 : f32 to vector<8x128xf32>
    %253 = arith.addf %252, %251 : vector<8x128xf32>
    %254 = arith.divf %252, %253 : vector<8x128xf32>
    %255 = vector.extract_strided_slice %248 {offsets = [0, 128], sizes = [8, 128], strides = [1, 1]} : vector<8x512xf32> to vector<8x128xf32>
    %256 = arith.negf %255 : vector<8x128xf32>
    %257 = math.exp %256 : vector<8x128xf32>
    %cst_113 = arith.constant 1.000000e+00 : f32
    %258 = vector.broadcast %cst_113 : f32 to vector<8x128xf32>
    %259 = arith.addf %258, %257 : vector<8x128xf32>
    %260 = arith.divf %258, %259 : vector<8x128xf32>
    %261 = vector.extract_strided_slice %248 {offsets = [0, 256], sizes = [8, 128], strides = [1, 1]} : vector<8x512xf32> to vector<8x128xf32>
    %262 = math.tanh %261 : vector<8x128xf32>
    %263 = vector.extract_strided_slice %248 {offsets = [0, 384], sizes = [8, 128], strides = [1, 1]} : vector<8x512xf32> to vector<8x128xf32>
    %264 = arith.negf %263 : vector<8x128xf32>
    %265 = math.exp %264 : vector<8x128xf32>
    %cst_114 = arith.constant 1.000000e+00 : f32
    %266 = vector.broadcast %cst_114 : f32 to vector<8x128xf32>
    %267 = arith.addf %266, %265 : vector<8x128xf32>
    %268 = arith.divf %266, %267 : vector<8x128xf32>
    %c0_115 = arith.constant 0 : index
    %c0_116 = arith.constant 0 : index
    %269 = vector.load %arg22[%c0_115, %c0_116] : memref<8x128xf32, #tpu.memory_space<vmem>>, vector<8x128xf32>
    %270 = arith.mulf %260, %269 : vector<8x128xf32>
    %271 = arith.mulf %254, %262 : vector<8x128xf32>
    %272 = arith.addf %270, %271 : vector<8x128xf32>
    %c0_117 = arith.constant 0 : index
    %c0_118 = arith.constant 0 : index
    %273 = vector.load %arg22[%c0_117, %c0_118] : memref<8x128xf32, #tpu.memory_space<vmem>>, vector<8x128xf32>
    tpu.vector_store %arg22[%c0_117, %c0_118], %272 {strides = array<i32>} : memref<8x128xf32, #tpu.memory_space<vmem>>, vector<8x128xf32>,
    %274 = math.tanh %272 : vector<8x128xf32>
    %275 = arith.mulf %268, %274 : vector<8x128xf32>
    %c0_119 = arith.constant 0 : index
    %c0_120 = arith.constant 0 : index
    %276 = vector.load %arg21[%c0_119, %c0_120] : memref<8x128xf32, #tpu.memory_space<vmem>>, vector<8x128xf32>
    tpu.vector_store %arg21[%c0_119, %c0_120], %275 {strides = array<i32>} : memref<8x128xf32, #tpu.memory_space<vmem>>, vector<8x128xf32>,
    %c0_121 = arith.constant 0 : index
    %c0_122 = arith.constant 0 : index
    %277 = vector.load %arg21[%c0_121, %c0_122] : memref<8x128xf32, #tpu.memory_space<vmem>>, vector<8x128xf32>
    %278 = arith.truncf %277 : vector<8x128xf32> to vector<8x128xbf16>
    %c0_123 = arith.constant 0 : index
    %c0_124 = arith.constant 0 : index
    %279 = vector.load %arg6[%c0_123, %c0_124] : memref<128x512xbf16, #tpu.memory_space<vmem>>, vector<128x512xbf16>
    %cst_125 = arith.constant dense<0.000000e+00> : vector<8x512xf32>
    %280 = tpu.matmul %278, %279, %cst_125 {dimension_numbers = #tpu.dot_dimension_numbers<[1], [0], [0], [1], [0, 0, 1, 1], [], []>} : vector<8x128xbf16>, vector<128x512xbf16>, vector<8x512xf32> -> vector<8x512xf32>
    %c0_126 = arith.constant 0 : index
    %c0_127 = arith.constant 0 : index
    %281 = vector.load %arg2[%c0_126, %c0_127] : memref<8x451xbf16, #tpu.memory_space<vmem>>, vector<8x451xbf16>
    %c0_128 = arith.constant 0 : index
    %c0_129 = arith.constant 0 : index
    %282 = vector.load %arg7[%c0_128, %c0_129] : memref<451x512xbf16, #tpu.memory_space<vmem>>, vector<451x512xbf16>
    %cst_130 = arith.constant dense<0.000000e+00> : vector<8x512xf32>
    %283 = tpu.matmul %281, %282, %cst_130 {dimension_numbers = #tpu.dot_dimension_numbers<[1], [0], [0], [1], [0, 0, 1, 1], [], []>} : vector<8x451xbf16>, vector<451x512xbf16>, vector<8x512xf32> -> vector<8x512xf32>
    %284 = arith.addf %280, %283 : vector<8x512xf32>
    %c0_131 = arith.constant 0 : index
    %c0_132 = arith.constant 0 : index
    %285 = vector.load %arg8[%c0_131, %c0_132] : memref<1x512xf32, #tpu.memory_space<vmem>>, vector<1x512xf32>
    %286 = vector.broadcast %285 : vector<1x512xf32> to vector<8x512xf32>
    %287 = arith.addf %284, %286 : vector<8x512xf32>
    %cst_133 = arith.constant 0.000000e+00 : f32
    %288 = vector.broadcast %cst_133 : f32 to vector<8x512xf32>
    %289 = arith.maximumf %287, %288 : vector<8x512xf32>
    %290 = arith.truncf %289 : vector<8x512xf32> to vector<8x512xbf16>
    %c0_134 = arith.constant 0 : index
    %c0_135 = arith.constant 0 : index
    %291 = vector.load %arg9[%c0_134, %c0_135] : memref<512x512xbf16, #tpu.memory_space<vmem>>, vector<512x512xbf16>
    %cst_136 = arith.constant dense<0.000000e+00> : vector<8x512xf32>
    %292 = tpu.matmul %290, %291, %cst_136 {dimension_numbers = #tpu.dot_dimension_numbers<[1], [0], [0], [1], [0, 0, 1, 1], [], []>} : vector<8x512xbf16>, vector<512x512xbf16>, vector<8x512xf32> -> vector<8x512xf32>
    %c0_137 = arith.constant 0 : index
    %c0_138 = arith.constant 0 : index
    %293 = vector.load %arg10[%c0_137, %c0_138] : memref<1x512xf32, #tpu.memory_space<vmem>>, vector<1x512xf32>
    %294 = vector.broadcast %293 : vector<1x512xf32> to vector<8x512xf32>
    %295 = arith.addf %292, %294 : vector<8x512xf32>
    %cst_139 = arith.constant 0.000000e+00 : f32
    %296 = vector.broadcast %cst_139 : f32 to vector<8x512xf32>
    %297 = arith.maximumf %295, %296 : vector<8x512xf32>
    %298 = arith.truncf %297 : vector<8x512xf32> to vector<8x512xbf16>
    %c0_140 = arith.constant 0 : index
    %c0_141 = arith.constant 0 : index
    %299 = vector.load %arg11[%c0_140, %c0_141] : memref<512x512xbf16, #tpu.memory_space<vmem>>, vector<512x512xbf16>
    %cst_142 = arith.constant dense<0.000000e+00> : vector<8x512xf32>
    %300 = tpu.matmul %298, %299, %cst_142 {dimension_numbers = #tpu.dot_dimension_numbers<[1], [0], [0], [1], [0, 0, 1, 1], [], []>} : vector<8x512xbf16>, vector<512x512xbf16>, vector<8x512xf32> -> vector<8x512xf32>
    %c0_143 = arith.constant 0 : index
    %c0_144 = arith.constant 0 : index
    %301 = vector.load %arg12[%c0_143, %c0_144] : memref<1x512xf32, #tpu.memory_space<vmem>>, vector<1x512xf32>
    %302 = vector.broadcast %301 : vector<1x512xf32> to vector<8x512xf32>
    %303 = arith.addf %300, %302 : vector<8x512xf32>
    %cst_145 = arith.constant 0.000000e+00 : f32
    %304 = vector.broadcast %cst_145 : f32 to vector<8x512xf32>
    %305 = arith.maximumf %303, %304 : vector<8x512xf32>
    %306 = arith.truncf %305 : vector<8x512xf32> to vector<8x512xbf16>
    %c0_146 = arith.constant 0 : index
    %c0_147 = arith.constant 0 : index
    %307 = vector.load %arg13[%c0_146, %c0_147] : memref<512x512xbf16, #tpu.memory_space<vmem>>, vector<512x512xbf16>
    %cst_148 = arith.constant dense<0.000000e+00> : vector<8x512xf32>
    %308 = tpu.matmul %306, %307, %cst_148 {dimension_numbers = #tpu.dot_dimension_numbers<[1], [0], [0], [1], [0, 0, 1, 1], [], []>} : vector<8x512xbf16>, vector<512x512xbf16>, vector<8x512xf32> -> vector<8x512xf32>
    %c0_149 = arith.constant 0 : index
    %c0_150 = arith.constant 0 : index
    %309 = vector.load %arg14[%c0_149, %c0_150] : memref<1x512xf32, #tpu.memory_space<vmem>>, vector<1x512xf32>
    %310 = vector.broadcast %309 : vector<1x512xf32> to vector<8x512xf32>
    %311 = arith.addf %308, %310 : vector<8x512xf32>
    %cst_151 = arith.constant 0.000000e+00 : f32
    %312 = vector.broadcast %cst_151 : f32 to vector<8x512xf32>
    %313 = arith.maximumf %311, %312 : vector<8x512xf32>
    %314 = arith.truncf %313 : vector<8x512xf32> to vector<8x512xbf16>
    %c0_152 = arith.constant 0 : index
    %c0_153 = arith.constant 0 : index
    %315 = vector.load %arg15[%c0_152, %c0_153] : memref<512x512xbf16, #tpu.memory_space<vmem>>, vector<512x512xbf16>
    %cst_154 = arith.constant dense<0.000000e+00> : vector<8x512xf32>
    %316 = tpu.matmul %314, %315, %cst_154 {dimension_numbers = #tpu.dot_dimension_numbers<[1], [0], [0], [1], [0, 0, 1, 1], [], []>} : vector<8x512xbf16>, vector<512x512xbf16>, vector<8x512xf32> -> vector<8x512xf32>
    %c0_155 = arith.constant 0 : index
    %c0_156 = arith.constant 0 : index
    %317 = vector.load %arg16[%c0_155, %c0_156] : memref<1x512xf32, #tpu.memory_space<vmem>>, vector<1x512xf32>
    %318 = vector.broadcast %317 : vector<1x512xf32> to vector<8x512xf32>
    %319 = arith.addf %316, %318 : vector<8x512xf32>
    %cst_157 = arith.constant 0.000000e+00 : f32
    %320 = vector.broadcast %cst_157 : f32 to vector<8x512xf32>
    %321 = arith.maximumf %319, %320 : vector<8x512xf32>
    %322 = arith.truncf %321 : vector<8x512xf32> to vector<8x512xbf16>
    %c0_158 = arith.constant 0 : index
    %c0_159 = arith.constant 0 : index
    %323 = vector.load %arg17[%c0_158, %c0_159] : memref<512x128xbf16, #tpu.memory_space<vmem>>, vector<512x128xbf16>
    %cst_160 = arith.constant dense<0.000000e+00> : vector<8x128xf32>
    %324 = tpu.matmul %322, %323, %cst_160 {dimension_numbers = #tpu.dot_dimension_numbers<[1], [0], [0], [1], [0, 0, 1, 1], [], []>} : vector<8x512xbf16>, vector<512x128xbf16>, vector<8x128xf32> -> vector<8x128xf32>
    %c0_161 = arith.constant 0 : index
    %c0_162 = arith.constant 0 : index
    %325 = vector.load %arg18[%c0_161, %c0_162] : memref<1x128xf32, #tpu.memory_space<vmem>>, vector<1x128xf32>
    %326 = vector.broadcast %325 : vector<1x128xf32> to vector<8x128xf32>
    %327 = arith.addf %324, %326 : vector<8x128xf32>
    %c0_163 = arith.constant 0 : index
    %c0_164 = arith.constant 0 : index
    %328 = vector.load %arg19[%c0_163, %c0_164] : memref<8x128xf32, #tpu.memory_space<vmem>>, vector<8x128xf32>
    tpu.vector_store %arg19[%c0_163, %c0_164], %327 {strides = array<i32>} : memref<8x128xf32, #tpu.memory_space<vmem>>, vector<8x128xf32>,
    return
  }
  func.func @transform_0(%arg0: i32) -> (i32, i32, i32) {
    %c0_i32 = arith.constant 0 : i32
    %c0_i32_0 = arith.constant 0 : i32
    %c0_i32_1 = arith.constant 0 : i32
    return %c0_i32, %arg0, %c0_i32_0 : i32, i32, i32
  }
  func.func @transform_1(%arg0: i32) -> (i32, i32) {
    %c0_i32 = arith.constant 0 : i32
    %c0_i32_0 = arith.constant 0 : i32
    return %arg0, %c0_i32 : i32, i32
  }
  func.func @transform_2(%arg0: i32) -> (i32, i32) {
    %c0_i32 = arith.constant 0 : i32
    %c0_i32_0 = arith.constant 0 : i32
    %c0_i32_1 = arith.constant 0 : i32
    return %c0_i32, %c0_i32_0 : i32, i32
  }
  func.func @transform_3(%arg0: i32) -> (i32, i32) {
    %c0_i32 = arith.constant 0 : i32
    %c0_i32_0 = arith.constant 0 : i32
    %c0_i32_1 = arith.constant 0 : i32
    return %c0_i32, %c0_i32_0 : i32, i32
  }
  func.func @transform_4(%arg0: i32) -> (i32, i32) {
    %c0_i32 = arith.constant 0 : i32
    %c0_i32_0 = arith.constant 0 : i32
    %c0_i32_1 = arith.constant 0 : i32
    return %c0_i32, %c0_i32_0 : i32, i32
  }
  func.func @transform_5(%arg0: i32) -> (i32, i32) {
    %c0_i32 = arith.constant 0 : i32
    %c0_i32_0 = arith.constant 0 : i32
    %c0_i32_1 = arith.constant 0 : i32
    return %c0_i32, %c0_i32_0 : i32, i32
  }
  func.func @transform_6(%arg0: i32) -> (i32, i32) {
    %c0_i32 = arith.constant 0 : i32
    %c0_i32_0 = arith.constant 0 : i32
    %c0_i32_1 = arith.constant 0 : i32
    return %c0_i32, %c0_i32_0 : i32, i32
  }
  func.func @transform_7(%arg0: i32) -> (i32, i32) {
    %c0_i32 = arith.constant 0 : i32
    %c0_i32_0 = arith.constant 0 : i32
    %c0_i32_1 = arith.constant 0 : i32
    return %c0_i32, %c0_i32_0 : i32, i32
  }
  func.func @transform_8(%arg0: i32) -> (i32, i32) {
    %c0_i32 = arith.constant 0 : i32
    %c0_i32_0 = arith.constant 0 : i32
    %c0_i32_1 = arith.constant 0 : i32
    return %c0_i32, %c0_i32_0 : i32, i32
  }
  func.func @transform_9(%arg0: i32) -> (i32, i32) {
    %c0_i32 = arith.constant 0 : i32
    %c0_i32_0 = arith.constant 0 : i32
    %c0_i32_1 = arith.constant 0 : i32
    return %c0_i32, %c0_i32_0 : i32, i32
  }
  func.func @transform_10(%arg0: i32) -> (i32, i32) {
    %c0_i32 = arith.constant 0 : i32
    %c0_i32_0 = arith.constant 0 : i32
    %c0_i32_1 = arith.constant 0 : i32
    return %c0_i32, %c0_i32_0 : i32, i32
  }
  func.func @transform_11(%arg0: i32) -> (i32, i32) {
    %c0_i32 = arith.constant 0 : i32
    %c0_i32_0 = arith.constant 0 : i32
    %c0_i32_1 = arith.constant 0 : i32
    return %c0_i32, %c0_i32_0 : i32, i32
  }
  func.func @transform_12(%arg0: i32) -> (i32, i32) {
    %c0_i32 = arith.constant 0 : i32
    %c0_i32_0 = arith.constant 0 : i32
    %c0_i32_1 = arith.constant 0 : i32
    return %c0_i32, %c0_i32_0 : i32, i32
  }
  func.func @transform_13(%arg0: i32) -> (i32, i32) {
    %c0_i32 = arith.constant 0 : i32
    %c0_i32_0 = arith.constant 0 : i32
    %c0_i32_1 = arith.constant 0 : i32
    return %c0_i32, %c0_i32_0 : i32, i32
  }
  func.func @transform_14(%arg0: i32) -> (i32, i32) {
    %c0_i32 = arith.constant 0 : i32
    %c0_i32_0 = arith.constant 0 : i32
    %c0_i32_1 = arith.constant 0 : i32
    return %c0_i32, %c0_i32_0 : i32, i32
  }
  func.func @transform_15(%arg0: i32) -> (i32, i32) {
    %c0_i32 = arith.constant 0 : i32
    %c0_i32_0 = arith.constant 0 : i32
    %c0_i32_1 = arith.constant 0 : i32
    return %c0_i32, %c0_i32_0 : i32, i32
  }
  func.func @transform_16(%arg0: i32) -> (i32, i32) {
    %c0_i32 = arith.constant 0 : i32
    %c0_i32_0 = arith.constant 0 : i32
    %c0_i32_1 = arith.constant 0 : i32
    return %c0_i32, %c0_i32_0 : i32, i32
  }
  func.func @transform_17(%arg0: i32) -> (i32, i32) {
    %c0_i32 = arith.constant 0 : i32
    %c0_i32_0 = arith.constant 0 : i32
    %c0_i32_1 = arith.constant 0 : i32
    return %c0_i32, %c0_i32_0 : i32, i32
  }
  func.func @transform_18(%arg0: i32) -> (i32, i32) {
    %c0_i32 = arith.constant 0 : i32
    %c0_i32_0 = arith.constant 0 : i32
    return %arg0, %c0_i32 : i32, i32
  }
}

</mosaic_0001>

<bundles_post_ra>
// kernel: tpu_custom_call.1
= control target key start
LH: loop header
LB: loop body
LE: loop exit
PB: predicated region body
PF: predicated region fallthrough
CT: control target
= control target key end

     0   :  { %s10809_s0 = inlined_call_operand.hbm [shape: bf16[8,8,201], index: 0, kind: input, shape index: {}]   ;;  %s10810_s1 = inlined_call_operand.hbm [shape: bf16[8,451], index: 1, kind: input, shape index: {}]   ;;  %s10811_s2 = inlined_call_operand.hbm [shape: bf16[201,512], index: 2, kind: input, shape index: {}]   ;;  %s10812_s3 = inlined_call_operand.hbm [shape: bf16[128,512], index: 3, kind: input, shape index: {}]   ;;  %s10813_s4 = inlined_call_operand.vmem [shape: f32[1,512], index: 4, kind: input, shape index: {}]   ;;  %s10814_s5 = inlined_call_operand.hbm [shape: bf16[128,512], index: 5, kind: input, shape index: {}]   ;;  %s10815_s6 = inlined_call_operand.hbm [shape: bf16[451,512], index: 6, kind: input, shape index: {}]   ;;  %s10816_s7 = inlined_call_operand.vmem [shape: f32[1,512], index: 7, kind: input, shape index: {}]   ;;  %s10817_s8 = inlined_call_operand.hbm [shape: bf16[512,512], index: 8, kind: input, shape index: {}]   ;;  %s10818_s9 = inlined_call_operand.vmem [shape: f32[1,512], index: 9, kind: input, shape index: {}]   ;;  %s10819_s10 = inlined_call_operand.hbm [shape: bf16[512,512], index: 10, kind: input, shape index: {}]   ;;  %s10820_s11 = inlined_call_operand.vmem [shape: f32[1,512], index: 11, kind: input, shape index: {}]   ;;  %s10821_s12 = inlined_call_operand.hbm [shape: bf16[512,512], index: 12, kind: input, shape index: {}]   ;;  %s10822_s13 = inlined_call_operand.vmem [shape: f32[1,512], index: 13, kind: input, shape index: {}]   ;;  %s10823_s14 = inlined_call_operand.hbm [shape: bf16[512,512], index: 14, kind: input, shape index: {}]   ;;  %s10824_s15 = inlined_call_operand.vmem [shape: f32[1,512], index: 15, kind: input, shape index: {}]   ;;  %s10825_s16 = inlined_call_operand.hbm [shape: bf16[512,128], index: 16, kind: input, shape index: {}]   ;;  %s10826_s17 = inlined_call_operand.vmem [shape: f32[1,128], index: 17, kind: input, shape index: {}]   ;;  %s10827_s18 = inlined_call_operand.hbm [shape: f32[8,128], index: 18, kind: output, shape index: {}]  }
   0x1   :  { %10844 = sst [smem:[#allocation49_spill]] %s10809_s0 }
   0x2   :  { %10845 = sst [smem:[#allocation50_spill]] %s10810_s1 }
   0x3   :  { %10846 = sst [smem:[#allocation51_spill]] %s10811_s2 }
   0x4   :  { %23 = vsyncpa [#allocation6], 0 }
   0x5   :  { %24 = vsyncpa [#allocation9], 0 }
   0x6   :  { %25 = vsyncpa [#allocation12], 0 }
   0x7   :  { %26 = vsyncpa [#allocation15], 0 }
   0x8   :  { %27 = vsyncpa [#allocation18], 0 }
   0x9   :  { %28 = vsyncpa [#allocation21], 0 }
   0xa   :  { %29 = vsyncpa [#allocation7], 0  ;;  %s9876_s27 = smov [#allocation8]   ;;  %s10847_s0 = sld [smem:[#allocation50_spill]] }
   0xb   :  { %s48_s28 = sshll.u32 %s9876_s27, 4  ;;  %s49_s28 = int_to_ptr.vmem [resolvable:$true] %s48_s28 }
  0x10   :  { %s9598_s19 = scalar_lea.hbm %s10847_s0, 256 }
  0x11   :  { %p9599_p0 = scmp.ne.s32.totalorder %s10847_s0, %s9598_s19  ;;  %p9602_p1 = scmp.lt.u32.totalorder %s9598_s19, %s10847_s0 }
  0x13   :  { %p9604_p2 = pnand %p9602_p1, %p9599_p0 }
  0x15   :  { %9607 = shalt.err (!%p9604_p2)
}
  0x16   :  { %s9608_s2 = scalar_lea.vmem %s49_s28, 256  ;;  %p9613_p4 = scmp.lt.s32.totalorder %s49_s28, %s49_s28 }
  0x17   :  { %p9609_p3 = scmp.ne.s32.totalorder %s49_s28, %s9608_s2  ;;  %p9614_p5 = scmp.lt.s32.totalorder %s9608_s2, %s9608_s2 }
  0x19   :  { %p9615_p6 = por %p9614_p5, %p9613_p4 }
  0x1b   :  { %p9616_p7 = pnand %p9615_p6, %p9609_p3 }
  0x1d   :  { %9619 = shalt.err (!%p9616_p7)
}
  0x1e   :  { %51 = dma.hbm_to_vmem [thread:$0]  %s10847_s0, 256, %s49_s28, [#allocation9]  }
  0x1f   :  { %s9877_s25 = smov [#allocation11]   ;;  %s9878_s27 = smov [#allocation14]  }
  0x20   :  { %s69_s26 = sshll.u32 %s9877_s25, 4  ;;  %s95_s29 = sshll.u32 %s9878_s27, 4  ;;  %s70_s26 = int_to_ptr.vmem [resolvable:$true] %s69_s26  ;;  %s96_s29 = int_to_ptr.vmem [resolvable:$true] %s95_s29 }
  0x21   :  { %s9620_s1 = scalar_lea.hbm %s10812_s3, 4096 }
  0x22   :  { %p9621_p8 = scmp.ne.s32.totalorder %s10812_s3, %s9620_s1  ;;  %p9624_p9 = scmp.lt.u32.totalorder %s9620_s1, %s10812_s3 }
  0x24   :  { %p9626_p10 = pnand %p9624_p9, %p9621_p8 }
  0x26   :  { %9629 = shalt.err (!%p9626_p10)
}
  0x27   :  { %s9630_s28 = scalar_lea.vmem %s70_s26, 4096  ;;  %p9635_p12 = scmp.lt.s32.totalorder %s70_s26, %s70_s26 }
  0x28   :  { %p9631_p11 = scmp.ne.s32.totalorder %s70_s26, %s9630_s28  ;;  %p9636_p13 = scmp.lt.s32.totalorder %s9630_s28, %s9630_s28 }
  0x2a   :  { %p9637_p0 = por %p9636_p13, %p9635_p12 }
  0x2c   :  { %p9638_p1 = pnand %p9637_p0, %p9631_p11 }
  0x2e   :  { %9641 = shalt.err (!%p9638_p1)
}
  0x2f   :  { %s10831_s0 = smov 256   ;;  %s9880_s23 = smov 16  }
  0x30   :  { %75 = dma.hbm_to_vmem [thread:$0]  %s10812_s3, 4096, %s70_s26, [#allocation12], %s10831_s0, %s10831_s0, %s9880_s23  }
  0x31   :  { %s9642_s19 = scalar_lea.hbm %s10815_s6, 14592 }
  0x32   :  { %p9643_p2 = scmp.ne.s32.totalorder %s10815_s6, %s9642_s19  ;;  %p9646_p3 = scmp.lt.u32.totalorder %s9642_s19, %s10815_s6 }
  0x34   :  { %p9648_p4 = pnand %p9646_p3, %p9643_p2 }
  0x36   :  { %9651 = shalt.err (!%p9648_p4)
}
  0x37   :  { %s9652_s2 = scalar_lea.vmem %s96_s29, 14592  ;;  %p9657_p6 = scmp.lt.s32.totalorder %s96_s29, %s96_s29 }
  0x38   :  { %p9653_p5 = scmp.ne.s32.totalorder %s96_s29, %s9652_s2  ;;  %p9658_p7 = scmp.lt.s32.totalorder %s9652_s2, %s9652_s2 }
  0x3a   :  { %p9659_p8 = por %p9658_p7, %p9657_p6 }
  0x3c   :  { %p9660_p9 = pnand %p9659_p8, %p9653_p5 }
  0x3e   :  { %9663 = shalt.err (!%p9660_p9)
}
  0x3f   :  { %101 = dma.hbm_to_vmem [thread:$0]  %s10815_s6, 14592, %s96_s29, [#allocation15], %s10831_s0, %s10831_s0, %s9880_s23  }
  0x40   :  { %s9881_s28 = smov [#allocation17]   ;;  %s9882_s25 = smov [#allocation20]  }
  0x41   :  { %s123_s24 = sshll.u32 %s9881_s28, 4  ;;  %s151_s27 = sshll.u32 %s9882_s25, 4  ;;  %s124_s24 = int_to_ptr.vmem [resolvable:$true] %s123_s24  ;;  %s152_s27 = int_to_ptr.vmem [resolvable:$true] %s151_s27 }
  0x42   :  { %s9664_s1 = scalar_lea.hbm %s10819_s10, 16384 }
  0x43   :  { %p9665_p10 = scmp.ne.s32.totalorder %s10819_s10, %s9664_s1  ;;  %p9668_p11 = scmp.lt.u32.totalorder %s9664_s1, %s10819_s10 }
  0x45   :  { %p9670_p12 = pnand %p9668_p11, %p9665_p10 }
  0x47   :  { %9673 = shalt.err (!%p9670_p12)
}
  0x48   :  { %s9674_s6 = scalar_lea.vmem %s124_s24, 16384  ;;  %p9679_p0 = scmp.lt.s32.totalorder %s124_s24, %s124_s24 }
  0x49   :  { %p9675_p13 = scmp.ne.s32.totalorder %s124_s24, %s9674_s6  ;;  %p9680_p1 = scmp.lt.s32.totalorder %s9674_s6, %s9674_s6 }
  0x4b   :  { %p9681_p2 = por %p9680_p1, %p9679_p0 }
  0x4d   :  { %p9682_p3 = pnand %p9681_p2, %p9675_p13 }
  0x4f   :  { %9685 = shalt.err (!%p9682_p3)
}
  0x50   :  { %129 = dma.hbm_to_vmem [thread:$0]  %s10819_s10, 16384, %s124_s24, [#allocation18], %s10831_s0, %s10831_s0, %s9880_s23  }
  0x51   :  { %s9686_s25 = scalar_lea.hbm %s10823_s14, 16384 }
  0x52   :  { %p9687_p4 = scmp.ne.s32.totalorder %s10823_s14, %s9686_s25  ;;  %p9690_p5 = scmp.lt.u32.totalorder %s9686_s25, %s10823_s14 }
  0x54   :  { %p9692_p6 = pnand %p9690_p5, %p9687_p4 }
  0x56   :  { %9695 = shalt.err (!%p9692_p6)
}
  0x57   :  { %s9696_s21 = scalar_lea.vmem %s152_s27, 16384  ;;  %p9701_p8 = scmp.lt.s32.totalorder %s152_s27, %s152_s27 }
  0x58   :  { %p9697_p7 = scmp.ne.s32.totalorder %s152_s27, %s9696_s21  ;;  %p9702_p9 = scmp.lt.s32.totalorder %s9696_s21, %s9696_s21 }
  0x5a   :  { %p9703_p10 = por %p9702_p9, %p9701_p8 }
  0x5c   :  { %p9704_p11 = pnand %p9703_p10, %p9697_p7 }
  0x5e   :  { %9707 = shalt.err (!%p9704_p11)
}
  0x5f   :  { %157 = dma.hbm_to_vmem [thread:$0]  %s10823_s14, 16384, %s152_s27, [#allocation21], %s10831_s0, %s10831_s0, %s9880_s23  }
  0x60   :  { %s9883_s22 = smov [#allocation5]   ;;  %s10848_s3 = sld [smem:[#allocation49_spill]] }
  0x61   :  { %s35_s2 = sshll.u32 %s9883_s22, 4  ;;  %s36_s2 = int_to_ptr.vmem [resolvable:$true] %s35_s2 }
  0x66   :  { %s9708_s26 = scalar_lea.hbm %s10848_s3, 1024 }
  0x67   :  { %p9709_p12 = scmp.ne.s32.totalorder %s10848_s3, %s9708_s26  ;;  %p9712_p13 = scmp.lt.u32.totalorder %s9708_s26, %s10848_s3 }
  0x69   :  { %p9714_p0 = pnand %p9712_p13, %p9709_p12 }
  0x6b   :  { %9717 = shalt.err (!%p9714_p0)
}
  0x6c   :  { %s9718_s1 = scalar_lea.vmem %s36_s2, 1024  ;;  %p9723_p2 = scmp.lt.s32.totalorder %s36_s2, %s36_s2 }
  0x6d   :  { %p9719_p1 = scmp.ne.s32.totalorder %s36_s2, %s9718_s1  ;;  %p9724_p3 = scmp.lt.s32.totalorder %s9718_s1, %s9718_s1 }
  0x6f   :  { %p9725_p4 = por %p9724_p3, %p9723_p2 }
  0x71   :  { %p9726_p5 = pnand %p9725_p4, %p9719_p1 }
  0x73   :  { %9729 = shalt.err (!%p9726_p5)
}
  0x74   :  { %s9884_s14 = smov 128   ;;  %s9885_s27 = smov 8  }
  0x75   :  { %41 = dma.hbm_to_vmem [thread:$0]  %s10848_s3, 1024, %s36_s2, [#allocation6], %s9884_s14, %s9884_s14, %s9885_s27  }
  0x76   :  { %s9886_s10 = smov [#allocation10]   ;;  %s9887_s22 = smov [#allocation13]  }
  0x77   :  { %s57_s24 = sshll.u32 %s9886_s10, 4  ;;  %s83_s6 = sshll.u32 %s9887_s22, 4  ;;  %s58_s24 = int_to_ptr.vmem [resolvable:$true] %s57_s24  ;;  %s10076_s6 = int_to_ptr.vmem [resolvable:$true] %s83_s6 }
  0x78   :  { %s10849_s28 = sld [smem:[#allocation51_spill]] }
  0x7e   :  { %s9730_s25 = scalar_lea.hbm %s10849_s28, 6656 }
  0x7f   :  { %p9731_p6 = scmp.ne.s32.totalorder %s10849_s28, %s9730_s25  ;;  %p9734_p7 = scmp.lt.u32.totalorder %s9730_s25, %s10849_s28 }
  0x81   :  { %p9736_p8 = pnand %p9734_p7, %p9731_p6 }
  0x83   :  { %9739 = shalt.err (!%p9736_p8)
}
  0x84   :  { %s9740_s2 = scalar_lea.vmem %s58_s24, 6656  ;;  %p9745_p10 = scmp.lt.s32.totalorder %s58_s24, %s58_s24 }
  0x85   :  { %p9741_p9 = scmp.ne.s32.totalorder %s58_s24, %s9740_s2  ;;  %p9746_p11 = scmp.lt.s32.totalorder %s9740_s2, %s9740_s2 }
  0x87   :  { %p9747_p12 = por %p9746_p11, %p9745_p10 }
  0x89   :  { %p9748_p13 = pnand %p9747_p12, %p9741_p9 }
  0x8b   :  { %9751 = shalt.err (!%p9748_p13)
}
  0x8c   :  { %s10850_s3 = smov 256   ;;  %s9752_s0 = scalar_lea.hbm %s10814_s5, 4096 }
  0x8d   :  { %63 = dma.hbm_to_vmem [thread:$0]  %s10849_s28, 6656, %s58_s24, [#allocation9], %s10850_s3, %s10850_s3, %s9880_s23  }
  0x8e   :  { %p9753_p0 = scmp.ne.s32.totalorder %s10814_s5, %s9752_s0  ;;  %p9756_p1 = scmp.lt.u32.totalorder %s9752_s0, %s10814_s5 }
  0x90   :  { %p9758_p2 = pnand %p9756_p1, %p9753_p0 }
  0x92   :  { %9761 = shalt.err (!%p9758_p2)
}
  0x93   :  { %s9762_s25 = scalar_lea.vmem %s10076_s6, 4096  ;;  %p9767_p4 = scmp.lt.s32.totalorder %s10076_s6, %s10076_s6 }
  0x94   :  { %p9763_p3 = scmp.ne.s32.totalorder %s10076_s6, %s9762_s25  ;;  %p9768_p5 = scmp.lt.s32.totalorder %s9762_s25, %s9762_s25 }
  0x96   :  { %p9769_p6 = por %p9768_p5, %p9767_p4 }
  0x98   :  { %p9770_p7 = pnand %p9769_p6, %p9763_p3 }
  0x9a   :  { %9773 = shalt.err (!%p9770_p7)
}
  0x9b   :  { %89 = dma.hbm_to_vmem [thread:$0]  %s10814_s5, 4096, %s10076_s6, [#allocation12], %s10850_s3, %s10850_s3, %s9880_s23  }
  0x9c   :  { %s9888_s30 = smov [#allocation16]   ;;  %s9889_s1 = smov [#allocation19]  }
  0x9d   :  { %s109_s19 = sshll.u32 %s9888_s30, 4  ;;  %s137_s2 = sshll.u32 %s9889_s1, 4  ;;  %s110_s19 = int_to_ptr.vmem [resolvable:$true] %s109_s19  ;;  %s10113_s2 = int_to_ptr.vmem [resolvable:$true] %s137_s2 }
  0x9e   :  { %s9774_s20 = scalar_lea.hbm %s10817_s8, 16384 }
  0x9f   :  { %p9775_p8 = scmp.ne.s32.totalorder %s10817_s8, %s9774_s20  ;;  %p9778_p9 = scmp.lt.u32.totalorder %s9774_s20, %s10817_s8 }
  0xa1   :  { %p9780_p10 = pnand %p9778_p9, %p9775_p8 }
  0xa3   :  { %9783 = shalt.err (!%p9780_p10)
}
  0xa4   :  { %s9784_s5 = scalar_lea.vmem %s110_s19, 16384  ;;  %p9789_p12 = scmp.lt.s32.totalorder %s110_s19, %s110_s19 }
  0xa5   :  { %p9785_p11 = scmp.ne.s32.totalorder %s110_s19, %s9784_s5  ;;  %p9790_p13 = scmp.lt.s32.totalorder %s9784_s5, %s9784_s5 }
  0xa7   :  { %p9791_p0 = por %p9790_p13, %p9789_p12 }
  0xa9   :  { %p9792_p1 = pnand %p9791_p0, %p9785_p11 }
  0xab   :  { %9795 = shalt.err (!%p9792_p1)
}
  0xac   :  { %115 = dma.hbm_to_vmem [thread:$0]  %s10817_s8, 16384, %s110_s19, [#allocation15], %s10850_s3, %s10850_s3, %s9880_s23  }
  0xad   :  { %s9796_s24 = scalar_lea.hbm %s10821_s12, 16384 }
  0xae   :  { %p9797_p2 = scmp.ne.s32.totalorder %s10821_s12, %s9796_s24  ;;  %p9800_p3 = scmp.lt.u32.totalorder %s9796_s24, %s10821_s12 }
  0xb0   :  { %p9802_p4 = pnand %p9800_p3, %p9797_p2 }
  0xb2   :  { %9805 = shalt.err (!%p9802_p4)
}
  0xb3   :  { %s9806_s27 = scalar_lea.vmem %s10113_s2, 16384  ;;  %p9811_p6 = scmp.lt.s32.totalorder %s10113_s2, %s10113_s2 }
  0xb4   :  { %p9807_p5 = scmp.ne.s32.totalorder %s10113_s2, %s9806_s27  ;;  %p9812_p7 = scmp.lt.s32.totalorder %s9806_s27, %s9806_s27 }
  0xb6   :  { %p9813_p8 = por %p9812_p7, %p9811_p6 }
  0xb8   :  { %p9814_p9 = pnand %p9813_p8, %p9807_p5 }
  0xba   :  { %9817 = shalt.err (!%p9814_p9)
}
  0xbb   :  { %143 = dma.hbm_to_vmem [thread:$0]  %s10821_s12, 16384, %s10113_s2, [#allocation18], %s10850_s3, %s10850_s3, %s9880_s23  }
  0xbc   :  { %s9890_s20 = smov [#allocation22]   ;;  %s9818_s22 = scalar_lea.hbm %s10825_s16, 4096 }
  0xbd   :  { %s165_s21 = sshll.u32 %s9890_s20, 4  ;;  %p9819_p10 = scmp.ne.s32.totalorder %s10825_s16, %s9818_s22  ;;  %s166_s21 = int_to_ptr.vmem [resolvable:$true] %s165_s21 }
  0xbe   :  { %p9822_p11 = scmp.lt.u32.totalorder %s9818_s22, %s10825_s16 }
  0xc0   :  { %p9824_p12 = pnand %p9822_p11, %p9819_p10 }
  0xc2   :  { %9827 = shalt.err (!%p9824_p12)
}
  0xc3   :  { %s9828_s25 = scalar_lea.vmem %s166_s21, 4096  ;;  %p9833_p0 = scmp.lt.s32.totalorder %s166_s21, %s166_s21 }
  0xc4   :  { %p9829_p13 = scmp.ne.s32.totalorder %s166_s21, %s9828_s25  ;;  %p9834_p1 = scmp.lt.s32.totalorder %s9828_s25, %s9828_s25 }
  0xc6   :  { %p9835_p2 = por %p9834_p1, %p9833_p0 }
  0xc8   :  { %p9836_p3 = pnand %p9835_p2, %p9829_p13 }
  0xca   :  { %9839 = shalt.err (!%p9836_p3)
}
  0xcb   :  { %s9891_s12 = smov 64   ;;  %s9892_s23 = smov 4  }
  0xcc   :  { %171 = dma.hbm_to_vmem [thread:$0]  %s10825_s16, 4096, %s166_s21, [#allocation21], %s9891_s12, %s9891_s12, %s9892_s23  }
  0xcd   :  { %9862 = dma.done.wait [#allocation6], 1024  }
  0xce   :  { %9863 = vsyncadd [#allocation6], 4294966272 }
  0xcf   :  { %9864 = dma.done.wait [#allocation9], 6912  }
  0xd0   :  { %9865 = vsyncadd [#allocation9], 4294960384 }
  0xd1   :  { %9866 = dma.done.wait [#allocation12], 8192  }
  0xd2   :  { %9867 = vsyncadd [#allocation12], 4294959104 }
  0xd3   :  { %9868 = dma.done.wait [#allocation15], 30976  }
  0xd4   :  { %9869 = vsyncadd [#allocation15], 4294936320 }
  0xd5   :  { %9870 = dma.done.wait [#allocation18], 32768  }
  0xd6   :  { %9871 = vsyncadd [#allocation18], 4294934528 }
  0xd7   :  { %9872 = dma.done.wait [#allocation21], 20480  }
  0xd8   :  { %9873 = vsyncadd [#allocation21], 4294946816  ;;  %v8276_v0 = vld [vmem:[#allocation10 + $0x4] ss:$16 sps:$4 sm:$0xff]   ;;  %v8278_v1 = vld [vmem:[#allocation10 + $0xc] ss:$16 sps:$4 sm:$0xff]  }
  0xd9   :  { %611 = vmatprep.subr.bf16.mxu0 %v8276_v0  ;;  %v8280_v2 = vld [vmem:[#allocation10] ss:$16 sps:$4 sm:$0xff]   ;;  %v8281_v3 = vld [vmem:[#allocation10 + $0x8] ss:$16 sps:$4 sm:$0xff]   ;;  %684 = vmatprep.subr.bf16.mxu1 %v8278_v1  ;;  %v8282_v4 = vld [vmem:[#allocation10 + $0x24] ss:$16 sps:$4 sm:$0xff]  }
  0xda   :  { %612 = vmatpush1.bf16.msra.mxu0 %v8280_v2  ;;  %685 = vmatpush1.bf16.msra.mxu1 %v8281_v3  ;;  %v8284_v5 = vld [vmem:[#allocation10 + $0x2c] ss:$16 sps:$4 sm:$0xff]   ;;  %v8286_v6 = vld [vmem:[#allocation10 + $0x20] ss:$16 sps:$4 sm:$0xff]   ;;  %v8287_v7 = vld [vmem:[#allocation10 + $0x28] ss:$16 sps:$4 sm:$0xff]  }
  0xdb   :  { %613 = vmatprep.subr.bf16.mxu0 %v8282_v4  ;;  %686 = vmatprep.subr.bf16.mxu1 %v8284_v5  ;;  %v8288_v8 = vld [vmem:[#allocation10 + $0x44] ss:$16 sps:$4 sm:$0xff]   ;;  %v8290_v9 = vld [vmem:[#allocation10 + $0x4c] ss:$16 sps:$4 sm:$0xff]   ;;  %v8292_v10 = vld [vmem:[#allocation10 + $0x40] ss:$16 sps:$4 sm:$0xff]  }
  0xdc   :  { %v8293_v11 = vld [vmem:[#allocation10 + $0x48] ss:$16 sps:$4 sm:$0xff]   ;;  %v8294_v12 = vld [vmem:[#allocation10 + $0x64] ss:$16 sps:$4 sm:$0xff]   ;;  %v8296_v13 = vld [vmem:[#allocation10 + $0x6c] ss:$16 sps:$4 sm:$0xff]  }
  0xdd   :  { %v8298_v14 = vld [vmem:[#allocation10 + $0x60] ss:$16 sps:$4 sm:$0xff]   ;;  %v8299_v15 = vld [vmem:[#allocation10 + $0x68] ss:$16 sps:$4 sm:$0xff]   ;;  %v8300_v16 = vld [vmem:[#allocation10 + $0x84] ss:$16 sps:$4 sm:$0xff]  }
  0xde   :  { %614 = vmatpush1.bf16.msra.mxu0 %v8286_v6  ;;  %687 = vmatpush1.bf16.msra.mxu1 %v8287_v7  ;;  %v8302_v17 = vld [vmem:[#allocation10 + $0x8c] ss:$16 sps:$4 sm:$0xff]   ;;  %v8304_v18 = vld [vmem:[#allocation10 + $0x80] ss:$16 sps:$4 sm:$0xff]   ;;  %v8305_v19 = vld [vmem:[#allocation10 + $0x88] ss:$16 sps:$4 sm:$0xff]  }
  0xdf   :  { %615 = vmatprep.subr.bf16.mxu0 %v8288_v8  ;;  %688 = vmatprep.subr.bf16.mxu1 %v8290_v9  ;;  %v8306_v20 = vld [vmem:[#allocation10 + $0xa4] ss:$16 sps:$4 sm:$0xff]   ;;  %v8308_v21 = vld [vmem:[#allocation10 + $0xac] ss:$16 sps:$4 sm:$0xff]   ;;  %v8310_v22 = vld [vmem:[#allocation10 + $0xa0] ss:$16 sps:$4 sm:$0xff]  }
  0xe0   :  { %v8311_v23 = vld [vmem:[#allocation10 + $0xa8] ss:$16 sps:$4 sm:$0xff]   ;;  %v8312_v24 = vld [vmem:[#allocation10 + $0xc4] ss:$16 sps:$4 sm:$0xff]   ;;  %v8314_v25 = vld [vmem:[#allocation10 + $0xcc] ss:$16 sps:$4 sm:$0xff]  }
  0xe1   :  { %v8316_v26 = vld [vmem:[#allocation10 + $0xc0] ss:$16 sps:$4 sm:$0xff]   ;;  %v8317_v27 = vld [vmem:[#allocation10 + $0xc8] ss:$16 sps:$4 sm:$0xff]   ;;  %v8318_v28 = vld [vmem:[#allocation10 + $0xe4] ss:$16 sps:$4 sm:$0xff]  }
  0xe2   :  { %616 = vmatpush1.bf16.msra.mxu0 %v8292_v10  ;;  %689 = vmatpush1.bf16.msra.mxu1 %v8293_v11  ;;  %v8320_v29 = vld [vmem:[#allocation10 + $0xec] ss:$16 sps:$4 sm:$0xff]   ;;  %v8322_v30 = vld [vmem:[#allocation10 + $0xe0] ss:$16 sps:$4 sm:$0xff]   ;;  %v8323_v31 = vld [vmem:[#allocation10 + $0xe8] ss:$16 sps:$4 sm:$0xff]  }
  0xe3   :  { %617 = vmatprep.subr.bf16.mxu0 %v8294_v12  ;;  %690 = vmatprep.subr.bf16.mxu1 %v8296_v13  ;;  %v8324_v32 = vld [vmem:[#allocation10 + $0x104] ss:$16 sps:$4 sm:$0xff]   ;;  %v8326_v33 = vld [vmem:[#allocation10 + $0x10c] ss:$16 sps:$4 sm:$0xff]   ;;  %v8328_v34 = vld [vmem:[#allocation10 + $0x100] ss:$16 sps:$4 sm:$0xff]  }
  0xe4   :  { %v8329_v35 = vld [vmem:[#allocation10 + $0x108] ss:$16 sps:$4 sm:$0xff]   ;;  %v8330_v36 = vld [vmem:[#allocation10 + $0x124] ss:$16 sps:$4 sm:$0xff]   ;;  %v8332_v37 = vld [vmem:[#allocation10 + $0x12c] ss:$16 sps:$4 sm:$0xff]  }
  0xe5   :  { %v8334_v38 = vld [vmem:[#allocation10 + $0x120] ss:$16 sps:$4 sm:$0xff]   ;;  %v8335_v39 = vld [vmem:[#allocation10 + $0x128] ss:$16 sps:$4 sm:$0xff]   ;;  %v8336_v40 = vld [vmem:[#allocation10 + $0x144] ss:$16 sps:$4 sm:$0xff]  }
  0xe6   :  { %618 = vmatpush1.bf16.msra.mxu0 %v8298_v14  ;;  %691 = vmatpush1.bf16.msra.mxu1 %v8299_v15  ;;  %vm582_vm0 = vcmask 596992   ;;  %vm595_vm1 = vcmask 1043456   ;;  %v8356_v41 = vld [vmem:[#allocation5 + $0x4] ss:$8 sps:$4 sm:$0xff]   ;;  %v8340_v43 = vld [vmem:[#allocation10 + $0x140] ss:$16 sps:$4 sm:$0xff]  }
  0xe7   :  { %619 = vmatprep.subr.bf16.mxu0 %v8300_v16  ;;  %692 = vmatprep.subr.bf16.mxu1 %v8302_v17  ;;  %v8338_v42 = vld [vmem:[#allocation10 + $0x14c] ss:$16 sps:$4 sm:$0xff]   ;;  %v8341_v44 = vld [vmem:[#allocation10 + $0x148] ss:$16 sps:$4 sm:$0xff]   ;;  %v8342_v45 = vld [vmem:[#allocation10 + $0x164] ss:$16 sps:$4 sm:$0xff]  }
  0xe8   :  { %7400 = vmatprep.mubr.msk.bf16.mxu0 %vm582_vm0, %v8356_v41  ;;  %7404 = vmatprep.mubr.msk.bf16.mxu1 %vm582_vm0, %v8356_v41  ;;  %vm596_vm2 = vcmask 1044480   ;;  %v10833_v46 = vmov 65535   ;;  %v8348_v48 = vld [vmem:[#allocation10 + $0x184] ss:$16 sps:$4 sm:$0x1f]   ;;  %vm2668_vm3 = vcmask 547840  }
  0xe9   :  { %v597_v47 = vsel %vm595_vm1, 4294967295, %v10833_v46  ;;  %v8344_v49 = vld [vmem:[#allocation10 + $0x16c] ss:$16 sps:$4 sm:$0xff]   ;;  %v8346_v51 = vld [vmem:[#allocation10 + $0x160] ss:$16 sps:$4 sm:$0xff]   ;;  %vm2672_vm4 = vcmask 1040384  }
  0xea   :  { %620 = vmatpush1.bf16.msra.mxu0 %v8304_v18  ;;  %693 = vmatpush1.bf16.msra.mxu1 %v8305_v19  ;;  %v8350_v50 = vld [vmem:[#allocation10 + $0x18c] ss:$16 sps:$4 sm:$0x1f]   ;;  %v8347_v52 = vld [vmem:[#allocation10 + $0x168] ss:$16 sps:$4 sm:$0xff]   ;;  %v598_v53 = vsel %vm596_vm2, %v597_v47, 0 }
  0xeb   :  { %621 = vmatprep.subr.bf16.mxu0 %v8306_v20  ;;  %694 = vmatprep.subr.bf16.mxu1 %v8308_v21  ;;  %v8352_v54 = vld [vmem:[#allocation10 + $0x180] ss:$16 sps:$4 sm:$0x1f]   ;;  %v8353_v55 = vld [vmem:[#allocation10 + $0x188] ss:$16 sps:$4 sm:$0x1f]   ;;  %v603_v56 = vand.u32 %v8348_v48, %v598_v53  ;;  %v609_v57 = vand.u32 %v8350_v50, %v598_v53 }
  0xec   :  { %v600_v58 = vand.u32 %v8352_v54, %v598_v53  ;;  %v606_v59 = vand.u32 %v8353_v55, %v598_v53  ;;  %v10165_v60 = vld [vmem:[#allocation11 + $0x4] ss:$16 sps:$4 sm:$0xff]   ;;  %v10167_v61 = vld [vmem:[#allocation11 + $0xc] ss:$16 sps:$4 sm:$0xff]   ;;  %v8354_v62 = vld [vmem:[#allocation5] ss:$8 sps:$4 sm:$0xff]  }
  0xed   :  { %v10169_v63 = vld [vmem:[#allocation11] ss:$16 sps:$4 sm:$0xff]   ;;  %v10171_v0 = vld [vmem:[#allocation11 + $0x8] ss:$16 sps:$4 sm:$0xff]   ;;  %v10173_v1 = vld [vmem:[#allocation11 + $0x24] ss:$16 sps:$4 sm:$0xff]  }
  0xee   :  { %622 = vmatpush1.bf16.msra.mxu0 %v8310_v22  ;;  %695 = vmatpush1.bf16.msra.mxu1 %v8311_v23  ;;  %v10177_v2 = vld [vmem:[#allocation11 + $0x2c] ss:$16 sps:$4 sm:$0xff]   ;;  %v10179_v3 = vld [vmem:[#allocation11 + $0x20] ss:$16 sps:$4 sm:$0xff]   ;;  %v10181_v5 = vld [vmem:[#allocation11 + $0x28] ss:$16 sps:$4 sm:$0xff]  }
  0xef   :  { %623 = vmatprep.subr.bf16.mxu0 %v8312_v24  ;;  %696 = vmatprep.subr.bf16.mxu1 %v8314_v25  ;;  %v8369_v4 = vld [vmem:[#allocation5 + $0x14] ss:$8 sps:$4 sm:$0xff]   ;;  %v8371_v8 = vld [vmem:[#allocation5 + $0x10] ss:$8 sps:$4 sm:$0xff]   ;;  %v8384_v13 = vld [vmem:[#allocation5 + $0x24] ss:$8 sps:$4 sm:$0xff]  }
  0xf0   :  { %v10185_v6 = vld [vmem:[#allocation11 + $0x44] ss:$16 sps:$4 sm:$0xff]   ;;  %v10189_v7 = vld [vmem:[#allocation11 + $0x4c] ss:$16 sps:$4 sm:$0xff]   ;;  %v10193_v9 = vld [vmem:[#allocation11 + $0x40] ss:$16 sps:$4 sm:$0xff]  }
  0xf1   :  { %v10197_v10 = vld [vmem:[#allocation11 + $0x48] ss:$16 sps:$4 sm:$0xff]   ;;  %v10201_v11 = vld [vmem:[#allocation11 + $0x64] ss:$16 sps:$4 sm:$0xff]   ;;  %v10203_v12 = vld [vmem:[#allocation11 + $0x6c] ss:$16 sps:$4 sm:$0xff]  }
  0xf2   :  { %624 = vmatpush1.bf16.msra.mxu0 %v8316_v26  ;;  %697 = vmatpush1.bf16.msra.mxu1 %v8317_v27  ;;  %v10205_v14 = vld [vmem:[#allocation11 + $0x60] ss:$16 sps:$4 sm:$0xff]   ;;  %v10207_v15 = vld [vmem:[#allocation11 + $0x68] ss:$16 sps:$4 sm:$0xff]   ;;  %v10209_v16 = vld [vmem:[#allocation11 + $0x84] ss:$16 sps:$4 sm:$0xff]  }
  0xf3   :  { %625 = vmatprep.subr.bf16.mxu0 %v8318_v28  ;;  %698 = vmatprep.subr.bf16.mxu1 %v8320_v29  ;;  %v10211_v17 = vld [vmem:[#allocation11 + $0x8c] ss:$16 sps:$4 sm:$0xff]   ;;  %v8386_v18 = vld [vmem:[#allocation5 + $0x20] ss:$8 sps:$4 sm:$0xff]   ;;  %v10223_v21 = vld [vmem:[#allocation11 + $0xa4] ss:$16 sps:$4 sm:$0xff]  }
  0xf4   :  { %v10219_v19 = vld [vmem:[#allocation11 + $0x80] ss:$16 sps:$4 sm:$0xff]   ;;  %v10221_v20 = vld [vmem:[#allocation11 + $0x88] ss:$16 sps:$4 sm:$0xff]   ;;  %v10225_v22 = vld [vmem:[#allocation11 + $0xac] ss:$16 sps:$4 sm:$0xff]  }
  0xf5   :  { %v8399_v23 = vld [vmem:[#allocation5 + $0x34] ss:$8 sps:$4 sm:$0xff]   ;;  %v8397_v24 = vld [vmem:[#allocation11 + $0xa0] ss:$16 sps:$4 sm:$0xff]   ;;  %v8398_v25 = vld [vmem:[#allocation11 + $0xa8] ss:$16 sps:$4 sm:$0xff]  }
  0xf6   :  { %626 = vmatpush1.bf16.msra.mxu0 %v8322_v30  ;;  %699 = vmatpush1.bf16.msra.mxu1 %v8323_v31  ;;  %v8402_v26 = vld [vmem:[#allocation11 + $0xc4] ss:$16 sps:$4 sm:$0xff]   ;;  %v8404_v27 = vld [vmem:[#allocation11 + $0xcc] ss:$16 sps:$4 sm:$0xff]   ;;  %v8401_v28 = vld [vmem:[#allocation5 + $0x30] ss:$8 sps:$4 sm:$0xff]  }
  0xf7   :  { %627 = vmatprep.subr.bf16.mxu0 %v8324_v32  ;;  %700 = vmatprep.subr.bf16.mxu1 %v8326_v33  ;;  %v8406_v29 = vld [vmem:[#allocation11 + $0xc0] ss:$16 sps:$4 sm:$0xff]   ;;  %v8407_v30 = vld [vmem:[#allocation11 + $0xc8] ss:$16 sps:$4 sm:$0xff]   ;;  %v8408_v31 = vld [vmem:[#allocation11 + $0xe4] ss:$16 sps:$4 sm:$0xff]  }
  0xf8   :  { %v8410_v32 = vld [vmem:[#allocation11 + $0xec] ss:$16 sps:$4 sm:$0xff]   ;;  %v8412_v33 = vld [vmem:[#allocation11 + $0xe0] ss:$16 sps:$4 sm:$0xff]   ;;  %v10454_v46 = vld [vmem:[#allocation11 + $0xe8] ss:$16 sps:$4 sm:$0xff]  }
  0xf9   :  { %vm2673_vm5 = vcmask 1041408   ;;  %s9896_s19 = smov [#allocation23]  }
  0xfa   :  { %628 = vmatpush1.bf16.msra.mxu0 %v8328_v34  ;;  %701 = vmatpush1.bf16.msra.mxu1 %v8329_v35  ;;  %v8413_v34 = vld [vmem:[#allocation11 + $0xe8] ss:$16 sps:$4 sm:$0xff]   ;;  %v10834_v35 = vmov 0   ;;  %s7326_s20 = sshll.u32 %s9896_s19, 4  ;;  %s7327_s20 = int_to_ptr.vmem [resolvable:$true] %s7326_s20 }
  0xfb   :  { %629 = vmatprep.subr.bf16.mxu0 %v8330_v36  ;;  %702 = vmatprep.subr.bf16.mxu1 %v8332_v37  ;;  %v9895_v36 = vmov 0.0|0.0   ;;  %v270_v37 = vlaneseq  ;;  %s9840_s21 = scalar_lea.vmem %s7327_s20, 128  ;;  %p9845_p5 = scmp.lt.s32.totalorder %s7327_s20, %s7327_s20 }
  0xfc   :  { %p9841_p4 = scmp.ne.s32.totalorder %s7327_s20, %s9840_s21  ;;  %p9846_p6 = scmp.lt.s32.totalorder %s9840_s21, %s9840_s21 }
  0xfe   :  { %630 = vmatpush1.bf16.msra.mxu0 %v8334_v38  ;;  %703 = vmatpush1.bf16.msra.mxu1 %v8335_v39  ;;  %v271_v38 = vshrl.u32 %v270_v37, 7  ;;  %p9847_p7 = por %p9846_p6, %p9845_p5 }
  0xff   :  { %631 = vmatprep.subr.bf16.mxu0 %v8336_v40  ;;  %704 = vmatprep.subr.bf16.mxu1 %v8338_v42  ;;  %v268_v40 = vld [vmem:[%s10813_s4] sm:$0xf] }
 0x100   :  { %v10265_v39 = vsub.s32 2, %v271_v38  ;;  %v10270_v41 = vsub.s32 3, %v271_v38  ;;  %v10272_v42 = vsub.s32 0, %v271_v38  ;;  %p9848_p8 = pnand %p9847_p7, %p9841_p4 }
 0x102   :  { %632 = vmatpush1.bf16.msra.mxu0 %v8340_v43  ;;  %705 = vmatpush1.bf16.msra.mxu1 %v8341_v44  ;;  %10851 = vst [vmem:[#allocation31_spill] sm:$0xff] %v10265_v39  ;;  %10852 = vst [vmem:[#allocation32_spill] sm:$0xff] %v10270_v41  ;;  %v10274_v43 = vsub.s32 1, %v271_v38  ;;  %v10277_v44 = vrot.slane %v268_v40, %v10265_v39  ;;  %v10284_v48 = vrot.slane %v268_v40, %v10270_v41  ;;  %v10460_v41 = vld [vmem:[#allocation11 + $0xc] ss:$16 sps:$4 sm:$0xff]  }
 0x103   :  { %633 = vmatprep.subr.bf16.mxu0 %v8342_v45  ;;  %706 = vmatprep.subr.bf16.mxu1 %v8344_v49  ;;  %10853 = vst [vmem:[#allocation33_spill] sm:$0xff] %v10272_v42  ;;  %v273_v49 = vrot.slane %v268_v40, %v10272_v42 }
 0x104   :  { %10854 = vst [vmem:[#allocation34_spill] sm:$0xff] %v10274_v43 }
 0x106   :  { %634 = vmatpush1.bf16.msra.mxu0 %v8346_v51  ;;  %707 = vmatpush1.bf16.msra.mxu1 %v8347_v52  ;;  %v277_v52 = vrot.slane %v268_v40, %v10274_v43 }
 0x107   :  { %635 = vmatprep.subr.bf16.mxu0 %v603_v56  ;;  %708 = vmatprep.subr.bf16.mxu1 %v609_v57 }
 0x10a   :  { %636 = vmatpush1.bf16.msra.mxu0 %v600_v58  ;;  %709 = vmatpush1.bf16.msra.mxu1 %v606_v59 }
 0x10b   :  { %989 = vmatprep.subr.bf16.mxu0 %v10165_v60  ;;  %1030 = vmatprep.subr.bf16.mxu1 %v10167_v61 }
 0x10d   :  { %644 = vmatmul.mubr.bf16.vlgmr.msra.gmra.mrb[0].mxu0 %v8354_v62  ;;  %717 = vmatmul.mubr.bf16.vlgmr.msra.gmra.mrb[0].mxu1 %v8354_v62 }
 0x10e   :  { %990 = vmatpush1.bf16.msra.mxu0 %v10169_v63  ;;  %1031 = vmatpush1.bf16.msra.mxu1 %v10171_v0 }
 0x10f   :  { %991 = vmatprep.subr.bf16.mxu0 %v10173_v1  ;;  %1032 = vmatprep.subr.bf16.mxu1 %v10177_v2 }
 0x110   :  { %7401 = vmatprep.mubr.msk.bf16.mxu0 %vm582_vm0, %v8369_v4  ;;  %7405 = vmatprep.mubr.msk.bf16.mxu1 %vm582_vm0, %v8369_v4 }
 0x112   :  { %992 = vmatpush1.bf16.msra.mxu0 %v10179_v3  ;;  %1033 = vmatpush1.bf16.msra.mxu1 %v10181_v5 }
 0x113   :  { %993 = vmatprep.subr.bf16.mxu0 %v10185_v6  ;;  %1034 = vmatprep.subr.bf16.mxu1 %v10189_v7 }
 0x115   :  { %654 = vmatmul.mubr.bf16.gmra.mrb[4].mxu0 %v8371_v8  ;;  %727 = vmatmul.mubr.bf16.gmra.mrb[4].mxu1 %v8371_v8 }
 0x116   :  { %994 = vmatpush1.bf16.msra.mxu0 %v10193_v9  ;;  %1035 = vmatpush1.bf16.msra.mxu1 %v10197_v10 }
 0x117   :  { %995 = vmatprep.subr.bf16.mxu0 %v10201_v11  ;;  %1036 = vmatprep.subr.bf16.mxu1 %v10203_v12 }
 0x118   :  { %7402 = vmatprep.mubr.msk.bf16.mxu0 %vm582_vm0, %v8384_v13  ;;  %7406 = vmatprep.mubr.msk.bf16.mxu1 %vm582_vm0, %v8384_v13 }
 0x11a   :  { %996 = vmatpush1.bf16.msra.mxu0 %v10205_v14  ;;  %1037 = vmatpush1.bf16.msra.mxu1 %v10207_v15 }
 0x11b   :  { %997 = vmatprep.subr.bf16.mxu0 %v10209_v16  ;;  %1038 = vmatprep.subr.bf16.mxu1 %v10211_v17 }
 0x11d   :  { %664 = vmatmul.mubr.bf16.gmra.mrb[8].mxu0 %v8386_v18  ;;  %737 = vmatmul.mubr.bf16.gmra.mrb[8].mxu1 %v8386_v18 }
 0x11e   :  { %998 = vmatpush1.bf16.msra.mxu0 %v10219_v19  ;;  %1039 = vmatpush1.bf16.msra.mxu1 %v10221_v20 }
 0x11f   :  { %999 = vmatprep.subr.bf16.mxu0 %v10223_v21  ;;  %1040 = vmatprep.subr.bf16.mxu1 %v10225_v22 }
 0x120   :  { %7403 = vmatprep.mubr.msk.bf16.mxu0 %vm582_vm0, %v8399_v23  ;;  %7407 = vmatprep.mubr.msk.bf16.mxu1 %vm582_vm0, %v8399_v23 }
 0x122   :  { %1000 = vmatpush1.bf16.msra.mxu0 %v8397_v24  ;;  %1041 = vmatpush1.bf16.msra.mxu1 %v8398_v25 }
 0x123   :  { %1001 = vmatprep.subr.bf16.mxu0 %v8402_v26  ;;  %1042 = vmatprep.subr.bf16.mxu1 %v8404_v27 }
 0x125   :  { %674 = vmatmul.mubr.bf16.gmra.mrb[12].mxu0 %v8401_v28  ;;  %747 = vmatmul.mubr.bf16.gmra.mrb[12].mxu1 %v8401_v28 }
 0x126   :  { %1002 = vmatpush1.bf16.msra.mxu0 %v8406_v29  ;;  %1043 = vmatpush1.bf16.msra.mxu1 %v8407_v30 }
 0x127   :  { %1003 = vmatprep.subr.bf16.mxu0 %v8408_v31  ;;  %1044 = vmatprep.subr.bf16.mxu1 %v8410_v32 }
 0x128   :  { %1021 = vmatprep.mubr.bf16.mxu0 %v10834_v35  ;;  %1062 = vmatprep.mubr.bf16.mxu1 %v10834_v35 }
 0x12a   :  { %1004 = vmatpush1.bf16.msra.mxu0 %v8412_v33  ;;  %1045 = vmatpush1.bf16.msra.mxu1 %v8413_v34 }
 0x12b   :  { %1108 = vmatprep.subr.bf16.mxu0 %v10165_v60  ;;  %1149 = vmatprep.subr.bf16.mxu1 %v10167_v61 }
 0x12d   :  { %1022 = vmatmul.mubr.bf16.vlgmr.msra.gmra.mrb[16].mxu0 %v9895_v36  ;;  %1063 = vmatmul.mubr.bf16.vlgmr.msra.gmra.mrb[16].mxu1 %v9895_v36 }
 0x12e   :  { %1109 = vmatpush1.bf16.msra.mxu0 %v10169_v63  ;;  %1150 = vmatpush1.bf16.msra.mxu1 %v10171_v0 }
 0x12f   :  { %1110 = vmatprep.subr.bf16.mxu0 %v10173_v1  ;;  %1151 = vmatprep.subr.bf16.mxu1 %v10177_v2 }
 0x130   :  { %1140 = vmatprep.mubr.bf16.mxu0 %v10834_v35  ;;  %1181 = vmatprep.mubr.bf16.mxu1 %v10834_v35 }
 0x132   :  { %1111 = vmatpush1.bf16.msra.mxu0 %v10179_v3  ;;  %1152 = vmatpush1.bf16.msra.mxu1 %v10181_v5 }
 0x133   :  { %1112 = vmatprep.subr.bf16.mxu0 %v10185_v6  ;;  %1153 = vmatprep.subr.bf16.mxu1 %v10189_v7 }
 0x136   :  { %1113 = vmatpush1.bf16.msra.mxu0 %v10193_v9  ;;  %1154 = vmatpush1.bf16.msra.mxu1 %v10197_v10 }
 0x137   :  { %1114 = vmatprep.subr.bf16.mxu0 %v10201_v11  ;;  %1155 = vmatprep.subr.bf16.mxu1 %v10203_v12 }
 0x13a   :  { %1115 = vmatpush1.bf16.msra.mxu0 %v10205_v14  ;;  %1156 = vmatpush1.bf16.msra.mxu1 %v10207_v15 }
 0x13b   :  { %1116 = vmatprep.subr.bf16.mxu0 %v10209_v16  ;;  %1157 = vmatprep.subr.bf16.mxu1 %v10211_v17 }
 0x13e   :  { %1117 = vmatpush1.bf16.msra.mxu0 %v10219_v19  ;;  %1158 = vmatpush1.bf16.msra.mxu1 %v10221_v20 }
 0x13f   :  { %1118 = vmatprep.subr.bf16.mxu0 %v10223_v21  ;;  %1159 = vmatprep.subr.bf16.mxu1 %v10225_v22 }
 0x142   :  { %1119 = vmatpush1.bf16.msra.mxu0 %v8397_v24  ;;  %1160 = vmatpush1.bf16.msra.mxu1 %v8398_v25 }
 0x143   :  { %1120 = vmatprep.subr.bf16.mxu0 %v8402_v26  ;;  %1161 = vmatprep.subr.bf16.mxu1 %v8404_v27 }
 0x146   :  { %1121 = vmatpush1.bf16.msra.mxu0 %v8406_v29  ;;  %1162 = vmatpush1.bf16.msra.mxu1 %v8407_v30 }
 0x147   :  { %1122 = vmatprep.subr.bf16.mxu0 %v8408_v31  ;;  %1163 = vmatprep.subr.bf16.mxu1 %v8410_v32 }
 0x14a   :  { %1123 = vmatpush1.bf16.msra.mxu0 %v8412_v33  ;;  %1164 = vmatpush1.bf16.msra.mxu1 %v8413_v34 }
 0x14b   :  { %1227 = vmatprep.subr.bf16.mxu0 %v10165_v60  ;;  %1268 = vmatprep.subr.bf16.mxu1 %v10167_v61 }
 0x1e0   :  { %v10279_v45 = vpop.f32.mrb[0].mxu0  ;;  %v10281_v47 = vpop.f32.mrb[0].mxu1 }
 0x1e1   :  { %v647_v50 = vpop.f32.mrb[1].mxu0  ;;  %v720_v51 = vpop.f32.mrb[1].mxu1 }
 0x1e2   :  { %v649_v53 = vpop.f32.mrb[2].mxu0  ;;  %v722_v54 = vpop.f32.mrb[2].mxu1 }
 0x1e3   :  { %v10288_v55 = vadd.f32 %v649_v53, %v273_v49  ;;  %v651_v56 = vpop.f32.mrb[3].mxu0  ;;  %v10291_v57 = vadd.f32 %v722_v54, %v10277_v44  ;;  %v724_v58 = vpop.f32.mrb[3].mxu1 }
 0x1e4   :  { %v10293_v59 = vadd.f32 %v651_v56, %v277_v52  ;;  %v10296_v60 = vadd.f32 %v724_v58, %v10284_v48 }
 0x1e8   :  { %v655_v61 = vpop.f32.mrb[4].mxu0  ;;  %v728_v62 = vpop.f32.mrb[4].mxu1 }
 0x1e9   :  { %v10298_v63 = vadd.f32 %v655_v61, %v273_v49  ;;  %v657_v0 = vpop.f32.mrb[5].mxu0  ;;  %v10301_v1 = vadd.f32 %v728_v62, %v10277_v44  ;;  %v730_v2 = vpop.f32.mrb[5].mxu1 }
 0x1ea   :  { %v10303_v3 = vadd.f32 %v657_v0, %v277_v52  ;;  %v659_v4 = vpop.f32.mrb[6].mxu0  ;;  %v10306_v5 = vadd.f32 %v730_v2, %v10284_v48  ;;  %v732_v6 = vpop.f32.mrb[6].mxu1  ;;  %v646_v0 = vadd.f32 %v10279_v45, %v273_v49  ;;  %v719_v2 = vadd.f32 %v10281_v47, %v10277_v44 }
 0x1eb   :  { %v10308_v7 = vadd.f32 %v659_v4, %v273_v49  ;;  %v661_v8 = vpop.f32.mrb[7].mxu0  ;;  %v10311_v9 = vadd.f32 %v732_v6, %v10277_v44  ;;  %v734_v10 = vpop.f32.mrb[7].mxu1  ;;  %v648_v4 = vadd.f32 %v647_v50, %v277_v52  ;;  %v721_v6 = vadd.f32 %v720_v51, %v10284_v48 }
 0x1ec   :  { %v10313_v11 = vadd.f32 %v661_v8, %v277_v52  ;;  %v10316_v12 = vadd.f32 %v734_v10, %v10284_v48 }
 0x1f0   :  { %v665_v13 = vpop.f32.mrb[8].mxu0  ;;  %v738_v14 = vpop.f32.mrb[8].mxu1 }
 0x1f1   :  { %v10318_v15 = vadd.f32 %v665_v13, %v273_v49  ;;  %v667_v16 = vpop.f32.mrb[9].mxu0  ;;  %v10321_v17 = vadd.f32 %v738_v14, %v10277_v44  ;;  %v740_v18 = vpop.f32.mrb[9].mxu1 }
 0x1f2   :  { %v10323_v19 = vadd.f32 %v667_v16, %v277_v52  ;;  %v669_v20 = vpop.f32.mrb[10].mxu0  ;;  %v10326_v21 = vadd.f32 %v740_v18, %v10284_v48  ;;  %v742_v22 = vpop.f32.mrb[10].mxu1 }
 0x1f3   :  { %v10328_v23 = vadd.f32 %v669_v20, %v273_v49  ;;  %v671_v24 = vpop.f32.mrb[11].mxu0  ;;  %v10331_v25 = vadd.f32 %v742_v22, %v10277_v44  ;;  %v744_v26 = vpop.f32.mrb[11].mxu1 }
 0x1f4   :  { %10855 = vst [vmem:[#allocation35_spill] sm:$0xff] %v10323_v19  ;;  %10856 = vst [vmem:[#allocation36_spill] sm:$0xff] %v10326_v21  ;;  %v10333_v27 = vadd.f32 %v671_v24, %v277_v52  ;;  %v10336_v28 = vadd.f32 %v744_v26, %v10284_v48 }
 0x1f5   :  { %10857 = vst [vmem:[#allocation37_spill] sm:$0xff] %v10328_v23  ;;  %10858 = vst [vmem:[#allocation38_spill] sm:$0xff] %v10331_v25 }
 0x1f6   :  { %10859 = vst [vmem:[#allocation39_spill] sm:$0xff] %v10333_v27  ;;  %10860 = vst [vmem:[#allocation40_spill] sm:$0xff] %v10336_v28 }
 0x1f8   :  { %v675_v29 = vpop.f32.mrb[12].mxu0  ;;  %v748_v30 = vpop.f32.mrb[12].mxu1 }
 0x1f9   :  { %v10338_v31 = vadd.f32 %v675_v29, %v273_v49  ;;  %v677_v32 = vpop.f32.mrb[13].mxu0  ;;  %v10341_v33 = vadd.f32 %v748_v30, %v10277_v44  ;;  %v750_v34 = vpop.f32.mrb[13].mxu1 }
 0x1fa   :  { %v10343_v36 = vadd.f32 %v677_v32, %v277_v52  ;;  %v679_v37 = vpop.f32.mrb[14].mxu0  ;;  %v10346_v38 = vadd.f32 %v750_v34, %v10284_v48  ;;  %v752_v40 = vpop.f32.mrb[14].mxu1 }
 0x1fb   :  { %10861 = vst [vmem:[#allocation41_spill] sm:$0xff] %v10338_v31  ;;  %10862 = vst [vmem:[#allocation42_spill] sm:$0xff] %v10341_v33  ;;  %v10348_v53 = vadd.f32 %v679_v37, %v273_v49  ;;  %v681_v54 = vpop.f32.mrb[15].mxu0  ;;  %v10351_v56 = vadd.f32 %v752_v40, %v10277_v44  ;;  %v754_v58 = vpop.f32.mrb[15].mxu1 }
 0x1fc   :  { %10863 = vst [vmem:[#allocation43_spill] sm:$0xff] %v10343_v36  ;;  %10864 = vst [vmem:[#allocation44_spill] sm:$0xff] %v10346_v38  ;;  %v10353_v61 = vadd.f32 %v681_v54, %v277_v52  ;;  %v10356_v62 = vadd.f32 %v754_v58, %v10284_v48 }
 0x1fd   :  { %10865 = vst [vmem:[#allocation45_spill] sm:$0xff] %v10348_v53  ;;  %10866 = vst [vmem:[#allocation46_spill] sm:$0xff] %v10351_v56 }
 0x1fe   :  { %10867 = vst [vmem:[#allocation47_spill] sm:$0xff] %v10353_v61  ;;  %10868 = vst [vmem:[#allocation48_spill] sm:$0xff] %v10356_v62 }
 0x200   :  { %v1023_v8 = vpop.f32.mrb[16].mxu0  ;;  %v1064_v10 = vpop.f32.mrb[16].mxu1 }
 0x201   :  { %v1071_v13 = vadd.f32 %v1023_v8, %v646_v0  ;;  %v1073_v14 = vadd.f32 %v1064_v10, %v719_v2  ;;  %v1025_v16 = vpop.f32.mrb[17].mxu0  ;;  %v1066_v18 = vpop.f32.mrb[17].mxu1  ;;  %v10365_v10 = vld [vmem:[#allocation11] ss:$16 sps:$4 sm:$0xff]  }
 0x202   :  { %v1072_v20 = vadd.f32 %v1025_v16, %v648_v4  ;;  %v1074_v22 = vadd.f32 %v1066_v18, %v721_v6  ;;  %v1027_v24 = vpop.f32.mrb[18].mxu0  ;;  %v1068_v26 = vpop.f32.mrb[18].mxu1  ;;  %v10374_v16 = vld [vmem:[#allocation11 + $0x2c] ss:$16 sps:$4 sm:$0xff]   ;;  %v10379_v18 = vld [vmem:[#allocation11 + $0x20] ss:$16 sps:$4 sm:$0xff]  }
 0x203   :  { %v7440_v29 = vmul.f32 -1.442695, %v1071_v13  ;;  %v1028_v30 = vpop.f32.mrb[19].mxu0  ;;  %v1069_v32 = vpop.f32.mrb[19].mxu1  ;;  %v10368_v13 = vld [vmem:[#allocation11 + $0x8] ss:$16 sps:$4 sm:$0xff]  }
 0x204   :  { %v7441_v45 = vmul.f32 -1.442695, %v1072_v20  ;;  %v7442_v44 = vmul.f32 -1.442695, %v1074_v22  ;;  %v10382_v20 = vld [vmem:[#allocation11 + $0x28] ss:$16 sps:$4 sm:$0xff]  }
 0x205   :  { %9438 = vpow2.f32 %v7440_v29  ;;  %v10385_v22 = vld [vmem:[#allocation11 + $0x44] ss:$16 sps:$4 sm:$0xff]   ;;  %v10388_v24 = vld [vmem:[#allocation11 + $0x4c] ss:$16 sps:$4 sm:$0xff]   ;;  %v10391_v26 = vld [vmem:[#allocation11 + $0x40] ss:$16 sps:$4 sm:$0xff]  }
 0x206   :  { %9440 = vpow2.f32 %v7441_v45  ;;  %v10394_v29 = vld [vmem:[#allocation11 + $0x48] ss:$16 sps:$4 sm:$0xff]   ;;  %v10397_v30 = vld [vmem:[#allocation11 + $0x64] ss:$16 sps:$4 sm:$0xff]   ;;  %v10400_v32 = vld [vmem:[#allocation11 + $0x6c] ss:$16 sps:$4 sm:$0xff]  }
 0x207   :  { %9442 = vpow2.f32 %v7442_v44  ;;  %v10403_v45 = vld [vmem:[#allocation11 + $0x60] ss:$16 sps:$4 sm:$0xff]   ;;  %v10406_v44 = vld [vmem:[#allocation11 + $0x68] ss:$16 sps:$4 sm:$0xff]  }
 0x208   :  { %9444 = vtanh.f32 %v1073_v14  ;;  %v10371_v14 = vld [vmem:[#allocation11 + $0x24] ss:$16 sps:$4 sm:$0xff]  }
 0x20f   :  { %v9439_v47 = vpop.eup %9438 }
 0x210   :  { %v9441_v49 = vpop.eup %9440  ;;  %v1078_v48 = vadd.f32 1.0, %v9439_v47  ;;  %v10409_v47 = vld [vmem:[#allocation11 + $0x84] ss:$16 sps:$4 sm:$0xff]  }
 0x211   :  { %v1084_v50 = vadd.f32 1.0, %v9441_v49  ;;  %v9443_v51 = vpop.eup %9442  ;;  %v10412_v49 = vld [vmem:[#allocation11 + $0x8c] ss:$16 sps:$4 sm:$0xff]  }
 0x212   :  { %9446 = vrcp.f32 %v1078_v48  ;;  %v9445_v52 = vpop.eup %9444  ;;  %v1091_v54 = vadd.f32 1.0, %v9443_v51  ;;  %v10415_v48 = vld [vmem:[#allocation11 + $0x80] ss:$16 sps:$4 sm:$0xff]   ;;  %v10421_v51 = vld [vmem:[#allocation11 + $0xa4] ss:$16 sps:$4 sm:$0xff]  }
 0x213   :  { %9448 = vrcp.f32 %v1084_v50  ;;  %v10418_v50 = vld [vmem:[#allocation11 + $0x88] ss:$16 sps:$4 sm:$0xff]  }
 0x214   :  { %9450 = vrcp.f32 %v1091_v54  ;;  %v10436_v54 = vld [vmem:[#allocation11 + $0xcc] ss:$16 sps:$4 sm:$0xff]  }
 0x21c   :  { %v9447_v34 = vpop.eup %9446 }
 0x21d   :  { %v9449_v37 = vpop.eup %9448  ;;  %v1096_v40 = vmul.f32 %v9447_v34, %v9445_v52  ;;  %v10424_v52 = vld [vmem:[#allocation11 + $0xac] ss:$16 sps:$4 sm:$0xff]   ;;  %v10427_v34 = vld [vmem:[#allocation11 + $0xa0] ss:$16 sps:$4 sm:$0xff]  }
 0x21e   :  { %v1095_v58 = vmul.f32 0.0, %v9449_v37  ;;  %v9451_v2 = vpop.eup %9450  ;;  %v10430_v37 = vld [vmem:[#allocation11 + $0xa8] ss:$16 sps:$4 sm:$0xff]  }
 0x220   :  { %v10362_v0 = vadd.f32 %v1096_v40, %v1095_v58  ;;  %v10433_v40 = vld [vmem:[#allocation11 + $0xc4] ss:$16 sps:$4 sm:$0xff]   ;;  %v10439_v58 = vld [vmem:[#allocation11 + $0xc0] ss:$16 sps:$4 sm:$0xff]  }
 0x222   :  { %9452 = vtanh.f32 %v10362_v0 }
 0x22c   :  { %v9453_v4 = vpop.eup %9452 }
 0x22d   :  { %v1100_v6 = vmul.f32 %v9453_v4, %v9451_v2  ;;  %v10442_v2 = vld [vmem:[#allocation11 + $0xc8] ss:$16 sps:$4 sm:$0xff]   ;;  %v10445_v4 = vld [vmem:[#allocation11 + $0xe4] ss:$16 sps:$4 sm:$0xff]  }
 0x22f   :  { %v1107_v8 = vpack.c.bf16 %v1100_v6, %v1100_v6  ;;  %v10448_v6 = vld [vmem:[#allocation11 + $0xec] ss:$16 sps:$4 sm:$0xff]  }
 0x231   :  { %1141 = vmatmul.mubr.bf16.vlgmr.msra.gmra.mrb[20].mxu0 %v1107_v8  ;;  %1182 = vmatmul.mubr.bf16.vlgmr.msra.gmra.mrb[20].mxu1 %v1107_v8  ;;  %v10451_v8 = vld [vmem:[#allocation11 + $0xe0] ss:$16 sps:$4 sm:$0xff]  }
 0x232   :  { %1228 = vmatpush1.bf16.msra.mxu0 %v10365_v10  ;;  %1269 = vmatpush1.bf16.msra.mxu1 %v10368_v13 }
 0x233   :  { %1229 = vmatprep.subr.bf16.mxu0 %v10371_v14  ;;  %1270 = vmatprep.subr.bf16.mxu1 %v10374_v16 }
 0x234   :  { %1259 = vmatprep.mubr.bf16.mxu0 %v10834_v35  ;;  %1300 = vmatprep.mubr.bf16.mxu1 %v10834_v35  ;;  %v10457_v35 = vld [vmem:[#allocation11 + $0x4] ss:$16 sps:$4 sm:$0xff]  }
 0x236   :  { %1230 = vmatpush1.bf16.msra.mxu0 %v10379_v18  ;;  %1271 = vmatpush1.bf16.msra.mxu1 %v10382_v20 }
 0x237   :  { %1231 = vmatprep.subr.bf16.mxu0 %v10385_v22  ;;  %1272 = vmatprep.subr.bf16.mxu1 %v10388_v24 }
 0x23a   :  { %1232 = vmatpush1.bf16.msra.mxu0 %v10391_v26  ;;  %1273 = vmatpush1.bf16.msra.mxu1 %v10394_v29 }
 0x23b   :  { %1233 = vmatprep.subr.bf16.mxu0 %v10397_v30  ;;  %1274 = vmatprep.subr.bf16.mxu1 %v10400_v32 }
 0x23e   :  { %1234 = vmatpush1.bf16.msra.mxu0 %v10403_v45  ;;  %1275 = vmatpush1.bf16.msra.mxu1 %v10406_v44 }
 0x23f   :  { %1235 = vmatprep.subr.bf16.mxu0 %v10409_v47  ;;  %1276 = vmatprep.subr.bf16.mxu1 %v10412_v49 }
 0x242   :  { %1236 = vmatpush1.bf16.msra.mxu0 %v10415_v48  ;;  %1277 = vmatpush1.bf16.msra.mxu1 %v10418_v50 }
 0x243   :  { %1237 = vmatprep.subr.bf16.mxu0 %v10421_v51  ;;  %1278 = vmatprep.subr.bf16.mxu1 %v10424_v52 }
 0x246   :  { %1238 = vmatpush1.bf16.msra.mxu0 %v10427_v34  ;;  %1279 = vmatpush1.bf16.msra.mxu1 %v10430_v37 }
 0x247   :  { %1239 = vmatprep.subr.bf16.mxu0 %v10433_v40  ;;  %1280 = vmatprep.subr.bf16.mxu1 %v10436_v54 }
 0x24a   :  { %1240 = vmatpush1.bf16.msra.mxu0 %v10439_v58  ;;  %1281 = vmatpush1.bf16.msra.mxu1 %v10442_v2 }
 0x24b   :  { %1241 = vmatprep.subr.bf16.mxu0 %v10445_v4  ;;  %1282 = vmatprep.subr.bf16.mxu1 %v10448_v6 }
 0x24e   :  { %1242 = vmatpush1.bf16.msra.mxu0 %v10451_v8  ;;  %1283 = vmatpush1.bf16.msra.mxu1 %v10454_v46 }
 0x24f   :  { %1346 = vmatprep.subr.bf16.mxu0 %v10457_v35  ;;  %1387 = vmatprep.subr.bf16.mxu1 %v10460_v41 }
 0x304   :  { %v1142_v43 = vpop.f32.mrb[20].mxu0  ;;  %v1183_v39 = vpop.f32.mrb[20].mxu1 }
 0x305   :  { %v1190_v42 = vadd.f32 %v1142_v43, %v10288_v55  ;;  %v1192_v62 = vadd.f32 %v1183_v39, %v10291_v57  ;;  %v1144_v61 = vpop.f32.mrb[21].mxu0  ;;  %v1185_v56 = vpop.f32.mrb[21].mxu1 }
 0x306   :  { %v1191_v53 = vadd.f32 %v1144_v61, %v10293_v59  ;;  %v1193_v38 = vadd.f32 %v1185_v56, %v10296_v60  ;;  %v1146_v36 = vpop.f32.mrb[22].mxu0  ;;  %v1187_v33 = vpop.f32.mrb[22].mxu1 }
 0x307   :  { %v7443_v31 = vmul.f32 -1.442695, %v1190_v42  ;;  %v1147_v28 = vpop.f32.mrb[23].mxu0  ;;  %v1188_v27 = vpop.f32.mrb[23].mxu1 }
 0x308   :  { %v7444_v25 = vmul.f32 -1.442695, %v1191_v53  ;;  %v7445_v23 = vmul.f32 -1.442695, %v1193_v38 }
 0x309   :  { %9454 = vpow2.f32 %v7443_v31 }
 0x30a   :  { %9456 = vpow2.f32 %v7444_v25 }
 0x30b   :  { %9458 = vpow2.f32 %v7445_v23 }
 0x30c   :  { %9460 = vtanh.f32 %v1192_v62 }
 0x313   :  { %v9455_v21 = vpop.eup %9454 }
 0x314   :  { %v9457_v19 = vpop.eup %9456  ;;  %v1197_v43 = vadd.f32 1.0, %v9455_v21 }
 0x315   :  { %v1203_v39 = vadd.f32 1.0, %v9457_v19  ;;  %v9459_v55 = vpop.eup %9458  ;;  %v10869_v19 = vmov 0  }
 0x316   :  { %9462 = vrcp.f32 %v1197_v43  ;;  %v9461_v57 = vpop.eup %9460  ;;  %v1210_v42 = vadd.f32 1.0, %v9459_v55 }
 0x317   :  { %9464 = vrcp.f32 %v1203_v39 }
 0x318   :  { %9466 = vrcp.f32 %v1210_v42 }
 0x320   :  { %v9463_v59 = vpop.eup %9462 }
 0x321   :  { %v9465_v60 = vpop.eup %9464  ;;  %v1215_v33 = vmul.f32 %v9463_v59, %v9461_v57 }
 0x322   :  { %v1214_v27 = vmul.f32 %v9465_v60, %v10362_v0  ;;  %v9467_v25 = vpop.eup %9466 }
 0x324   :  { %v10468_v28 = vadd.f32 %v1215_v33, %v1214_v27 }
 0x326   :  { %9468 = vtanh.f32 %v10468_v28 }
 0x330   :  { %v9469_v21 = vpop.eup %9468 }
 0x331   :  { %v1219_v23 = vmul.f32 %v9469_v21, %v9467_v25 }
 0x333   :  { %v1226_v31 = vpack.c.bf16 %v1219_v23, %v1219_v23 }
 0x335   :  { %1260 = vmatmul.mubr.bf16.vlgmr.msra.gmra.mrb[24].mxu0 %v1226_v31  ;;  %1301 = vmatmul.mubr.bf16.vlgmr.msra.gmra.mrb[24].mxu1 %v1226_v31 }
 0x336   :  { %1347 = vmatpush1.bf16.msra.mxu0 %v10365_v10  ;;  %1388 = vmatpush1.bf16.msra.mxu1 %v10368_v13 }
 0x337   :  { %1348 = vmatprep.subr.bf16.mxu0 %v10371_v14  ;;  %1389 = vmatprep.subr.bf16.mxu1 %v10374_v16 }
 0x338   :  { %1378 = vmatprep.mubr.bf16.mxu0 %v10869_v19  ;;  %1419 = vmatprep.mubr.bf16.mxu1 %v10869_v19 }
 0x33a   :  { %1349 = vmatpush1.bf16.msra.mxu0 %v10379_v18  ;;  %1390 = vmatpush1.bf16.msra.mxu1 %v10382_v20 }
 0x33b   :  { %1350 = vmatprep.subr.bf16.mxu0 %v10385_v22  ;;  %1391 = vmatprep.subr.bf16.mxu1 %v10388_v24 }
 0x33e   :  { %1351 = vmatpush1.bf16.msra.mxu0 %v10391_v26  ;;  %1392 = vmatpush1.bf16.msra.mxu1 %v10394_v29 }
 0x33f   :  { %1352 = vmatprep.subr.bf16.mxu0 %v10397_v30  ;;  %1393 = vmatprep.subr.bf16.mxu1 %v10400_v32 }
 0x342   :  { %1353 = vmatpush1.bf16.msra.mxu0 %v10403_v45  ;;  %1394 = vmatpush1.bf16.msra.mxu1 %v10406_v44 }
 0x343   :  { %1354 = vmatprep.subr.bf16.mxu0 %v10409_v47  ;;  %1395 = vmatprep.subr.bf16.mxu1 %v10412_v49 }
 0x346   :  { %1355 = vmatpush1.bf16.msra.mxu0 %v10415_v48  ;;  %1396 = vmatpush1.bf16.msra.mxu1 %v10418_v50 }
 0x347   :  { %1356 = vmatprep.subr.bf16.mxu0 %v10421_v51  ;;  %1397 = vmatprep.subr.bf16.mxu1 %v10424_v52 }
 0x34a   :  { %1357 = vmatpush1.bf16.msra.mxu0 %v10427_v34  ;;  %1398 = vmatpush1.bf16.msra.mxu1 %v10430_v37 }
 0x34b   :  { %1358 = vmatprep.subr.bf16.mxu0 %v10433_v40  ;;  %1399 = vmatprep.subr.bf16.mxu1 %v10436_v54 }
 0x34e   :  { %1359 = vmatpush1.bf16.msra.mxu0 %v10439_v58  ;;  %1400 = vmatpush1.bf16.msra.mxu1 %v10442_v2 }
 0x34f   :  { %1360 = vmatprep.subr.bf16.mxu0 %v10445_v4  ;;  %1401 = vmatprep.subr.bf16.mxu1 %v10448_v6 }
 0x352   :  { %1361 = vmatpush1.bf16.msra.mxu0 %v10451_v8  ;;  %1402 = vmatpush1.bf16.msra.mxu1 %v10454_v46 }
 0x353   :  { %1465 = vmatprep.subr.bf16.mxu0 %v10457_v35  ;;  %1506 = vmatprep.subr.bf16.mxu1 %v10460_v41 }
 0x408   :  { %v1261_v36 = vpop.f32.mrb[24].mxu0  ;;  %v1302_v38 = vpop.f32.mrb[24].mxu1 }
 0x409   :  { %v1309_v53 = vadd.f32 %v1261_v36, %v10298_v63  ;;  %v1311_v56 = vadd.f32 %v1302_v38, %v10301_v1  ;;  %v1263_v61 = vpop.f32.mrb[25].mxu0  ;;  %v1304_v62 = vpop.f32.mrb[25].mxu1 }
 0x40a   :  { %v1310_v0 = vadd.f32 %v1263_v61, %v10303_v3  ;;  %v1312_v43 = vadd.f32 %v1304_v62, %v10306_v5  ;;  %v1265_v39 = vpop.f32.mrb[26].mxu0  ;;  %v1306_v55 = vpop.f32.mrb[26].mxu1 }
 0x40b   :  { %v7446_v57 = vmul.f32 -1.442695, %v1309_v53  ;;  %v1266_v59 = vpop.f32.mrb[27].mxu0  ;;  %v1307_v60 = vpop.f32.mrb[27].mxu1 }
 0x40c   :  { %v7447_v33 = vmul.f32 -1.442695, %v1310_v0  ;;  %v7448_v42 = vmul.f32 -1.442695, %v1312_v43 }
 0x40d   :  { %9470 = vpow2.f32 %v7446_v57 }
 0x40e   :  { %9472 = vpow2.f32 %v7447_v33 }
 0x40f   :  { %9474 = vpow2.f32 %v7448_v42 }
 0x410   :  { %9476 = vtanh.f32 %v1311_v56 }
 0x417   :  { %v9471_v27 = vpop.eup %9470 }
 0x418   :  { %v9473_v25 = vpop.eup %9472  ;;  %v1316_v63 = vadd.f32 1.0, %v9471_v27 }
 0x419   :  { %v1322_v1 = vadd.f32 1.0, %v9473_v25  ;;  %v9475_v3 = vpop.eup %9474 }
 0x41a   :  { %9478 = vrcp.f32 %v1316_v63  ;;  %v9477_v21 = vpop.eup %9476  ;;  %v1329_v36 = vadd.f32 1.0, %v9475_v3 }
 0x41b   :  { %9480 = vrcp.f32 %v1322_v1 }
 0x41c   :  { %9482 = vrcp.f32 %v1329_v36 }
 0x424   :  { %v9479_v5 = vpop.eup %9478 }
 0x425   :  { %v9481_v23 = vpop.eup %9480  ;;  %v1334_v31 = vmul.f32 %v9479_v5, %v9477_v21 }
 0x426   :  { %v1333_v38 = vmul.f32 %v9481_v23, %v10468_v28  ;;  %v9483_v61 = vpop.eup %9482 }
 0x428   :  { %v10510_v53 = vadd.f32 %v1334_v31, %v1333_v38 }
 0x42a   :  { %9484 = vtanh.f32 %v10510_v53 }
 0x434   :  { %v9485_v62 = vpop.eup %9484 }
 0x435   :  { %v1338_v0 = vmul.f32 %v9485_v62, %v9483_v61 }
 0x437   :  { %v1345_v56 = vpack.c.bf16 %v1338_v0, %v1338_v0 }
 0x439   :  { %1379 = vmatmul.mubr.bf16.vlgmr.msra.gmra.mrb[28].mxu0 %v1345_v56  ;;  %1420 = vmatmul.mubr.bf16.vlgmr.msra.gmra.mrb[28].mxu1 %v1345_v56 }
 0x43a   :  { %1466 = vmatpush1.bf16.msra.mxu0 %v10365_v10  ;;  %1507 = vmatpush1.bf16.msra.mxu1 %v10368_v13 }
 0x43b   :  { %1467 = vmatprep.subr.bf16.mxu0 %v10371_v14  ;;  %1508 = vmatprep.subr.bf16.mxu1 %v10374_v16 }
 0x43c   :  { %1497 = vmatprep.mubr.bf16.mxu0 %v10869_v19  ;;  %1538 = vmatprep.mubr.bf16.mxu1 %v10869_v19 }
 0x43e   :  { %1468 = vmatpush1.bf16.msra.mxu0 %v10379_v18  ;;  %1509 = vmatpush1.bf16.msra.mxu1 %v10382_v20 }
 0x43f   :  { %1469 = vmatprep.subr.bf16.mxu0 %v10385_v22  ;;  %1510 = vmatprep.subr.bf16.mxu1 %v10388_v24 }
 0x442   :  { %1470 = vmatpush1.bf16.msra.mxu0 %v10391_v26  ;;  %1511 = vmatpush1.bf16.msra.mxu1 %v10394_v29 }
 0x443   :  { %1471 = vmatprep.subr.bf16.mxu0 %v10397_v30  ;;  %1512 = vmatprep.subr.bf16.mxu1 %v10400_v32 }
 0x446   :  { %1472 = vmatpush1.bf16.msra.mxu0 %v10403_v45  ;;  %1513 = vmatpush1.bf16.msra.mxu1 %v10406_v44 }
 0x447   :  { %1473 = vmatprep.subr.bf16.mxu0 %v10409_v47  ;;  %1514 = vmatprep.subr.bf16.mxu1 %v10412_v49 }
 0x44a   :  { %1474 = vmatpush1.bf16.msra.mxu0 %v10415_v48  ;;  %1515 = vmatpush1.bf16.msra.mxu1 %v10418_v50 }
 0x44b   :  { %1475 = vmatprep.subr.bf16.mxu0 %v10421_v51  ;;  %1516 = vmatprep.subr.bf16.mxu1 %v10424_v52 }
 0x44e   :  { %1476 = vmatpush1.bf16.msra.mxu0 %v10427_v34  ;;  %1517 = vmatpush1.bf16.msra.mxu1 %v10430_v37 }
 0x44f   :  { %1477 = vmatprep.subr.bf16.mxu0 %v10433_v40  ;;  %1518 = vmatprep.subr.bf16.mxu1 %v10436_v54 }
 0x452   :  { %1478 = vmatpush1.bf16.msra.mxu0 %v10439_v58  ;;  %1519 = vmatpush1.bf16.msra.mxu1 %v10442_v2 }
 0x453   :  { %1479 = vmatprep.subr.bf16.mxu0 %v10445_v4  ;;  %1520 = vmatprep.subr.bf16.mxu1 %v10448_v6 }
 0x456   :  { %1480 = vmatpush1.bf16.msra.mxu0 %v10451_v8  ;;  %1521 = vmatpush1.bf16.msra.mxu1 %v10454_v46 }
 0x457   :  { %1584 = vmatprep.subr.bf16.mxu0 %v10457_v35  ;;  %1625 = vmatprep.subr.bf16.mxu1 %v10460_v41 }
 0x50c   :  { %v1380_v28 = vpop.f32.mrb[28].mxu0  ;;  %v1421_v43 = vpop.f32.mrb[28].mxu1 }
 0x50d   :  { %v1428_v39 = vadd.f32 %v1380_v28, %v10308_v7  ;;  %v1430_v55 = vadd.f32 %v1421_v43, %v10311_v9  ;;  %v1382_v57 = vpop.f32.mrb[29].mxu0  ;;  %v1423_v59 = vpop.f32.mrb[29].mxu1 }
 0x50e   :  { %v1429_v60 = vadd.f32 %v1382_v57, %v10313_v11  ;;  %v1431_v33 = vadd.f32 %v1423_v59, %v10316_v12  ;;  %v1384_v42 = vpop.f32.mrb[30].mxu0  ;;  %v1425_v27 = vpop.f32.mrb[30].mxu1 }
 0x50f   :  { %v7449_v25 = vmul.f32 -1.442695, %v1428_v39  ;;  %v1385_v63 = vpop.f32.mrb[31].mxu0  ;;  %v1426_v1 = vpop.f32.mrb[31].mxu1  ;;  %v10870_v42 = vld [vmem:[#allocation35_spill] sm:$0xff] }
 0x510   :  { %v7450_v3 = vmul.f32 -1.442695, %v1429_v60  ;;  %v7451_v21 = vmul.f32 -1.442695, %v1431_v33 }
 0x511   :  { %9486 = vpow2.f32 %v7449_v25  ;;  %v10871_v25 = vld [vmem:[#allocation36_spill] sm:$0xff] }
 0x512   :  { %9488 = vpow2.f32 %v7450_v3 }
 0x513   :  { %9490 = vpow2.f32 %v7451_v21 }
 0x514   :  { %9492 = vtanh.f32 %v1430_v55 }
 0x51b   :  { %v9487_v5 = vpop.eup %9486 }
 0x51c   :  { %v9489_v23 = vpop.eup %9488  ;;  %v1435_v7 = vadd.f32 1.0, %v9487_v5 }
 0x51d   :  { %v1441_v9 = vadd.f32 1.0, %v9489_v23  ;;  %v9491_v11 = vpop.eup %9490 }
 0x51e   :  { %9494 = vrcp.f32 %v1435_v7  ;;  %v9493_v31 = vpop.eup %9492  ;;  %v1448_v61 = vadd.f32 1.0, %v9491_v11 }
 0x51f   :  { %9496 = vrcp.f32 %v1441_v9 }
 0x520   :  { %9498 = vrcp.f32 %v1448_v61 }
 0x528   :  { %v9495_v12 = vpop.eup %9494 }
 0x529   :  { %v9497_v36 = vpop.eup %9496  ;;  %v1453_v38 = vmul.f32 %v9495_v12, %v9493_v31 }
 0x52a   :  { %v1452_v62 = vmul.f32 %v9497_v36, %v10510_v53  ;;  %v9499_v56 = vpop.eup %9498 }
 0x52c   :  { %v10552_v0 = vadd.f32 %v1453_v38, %v1452_v62 }
 0x52e   :  { %9500 = vtanh.f32 %v10552_v0 }
 0x538   :  { %v9501_v28 = vpop.eup %9500 }
 0x539   :  { %v1457_v43 = vmul.f32 %v9501_v28, %v9499_v56 }
 0x53b   :  { %v1464_v39 = vpack.c.bf16 %v1457_v43, %v1457_v43 }
 0x53d   :  { %1498 = vmatmul.mubr.bf16.vlgmr.msra.gmra.mrb[32].mxu0 %v1464_v39  ;;  %1539 = vmatmul.mubr.bf16.vlgmr.msra.gmra.mrb[32].mxu1 %v1464_v39 }
 0x53e   :  { %1585 = vmatpush1.bf16.msra.mxu0 %v10365_v10  ;;  %1626 = vmatpush1.bf16.msra.mxu1 %v10368_v13 }
 0x53f   :  { %1586 = vmatprep.subr.bf16.mxu0 %v10371_v14  ;;  %1627 = vmatprep.subr.bf16.mxu1 %v10374_v16 }
 0x540   :  { %1616 = vmatprep.mubr.bf16.mxu0 %v10869_v19  ;;  %1657 = vmatprep.mubr.bf16.mxu1 %v10869_v19 }
 0x542   :  { %1587 = vmatpush1.bf16.msra.mxu0 %v10379_v18  ;;  %1628 = vmatpush1.bf16.msra.mxu1 %v10382_v20 }
 0x543   :  { %1588 = vmatprep.subr.bf16.mxu0 %v10385_v22  ;;  %1629 = vmatprep.subr.bf16.mxu1 %v10388_v24 }
 0x546   :  { %1589 = vmatpush1.bf16.msra.mxu0 %v10391_v26  ;;  %1630 = vmatpush1.bf16.msra.mxu1 %v10394_v29 }
 0x547   :  { %1590 = vmatprep.subr.bf16.mxu0 %v10397_v30  ;;  %1631 = vmatprep.subr.bf16.mxu1 %v10400_v32 }
 0x54a   :  { %1591 = vmatpush1.bf16.msra.mxu0 %v10403_v45  ;;  %1632 = vmatpush1.bf16.msra.mxu1 %v10406_v44 }
 0x54b   :  { %1592 = vmatprep.subr.bf16.mxu0 %v10409_v47  ;;  %1633 = vmatprep.subr.bf16.mxu1 %v10412_v49 }
 0x54e   :  { %1593 = vmatpush1.bf16.msra.mxu0 %v10415_v48  ;;  %1634 = vmatpush1.bf16.msra.mxu1 %v10418_v50 }
 0x54f   :  { %1594 = vmatprep.subr.bf16.mxu0 %v10421_v51  ;;  %1635 = vmatprep.subr.bf16.mxu1 %v10424_v52 }
 0x552   :  { %1595 = vmatpush1.bf16.msra.mxu0 %v10427_v34  ;;  %1636 = vmatpush1.bf16.msra.mxu1 %v10430_v37 }
 0x553   :  { %1596 = vmatprep.subr.bf16.mxu0 %v10433_v40  ;;  %1637 = vmatprep.subr.bf16.mxu1 %v10436_v54 }
 0x556   :  { %1597 = vmatpush1.bf16.msra.mxu0 %v10439_v58  ;;  %1638 = vmatpush1.bf16.msra.mxu1 %v10442_v2 }
 0x557   :  { %1598 = vmatprep.subr.bf16.mxu0 %v10445_v4  ;;  %1639 = vmatprep.subr.bf16.mxu1 %v10448_v6 }
 0x55a   :  { %1599 = vmatpush1.bf16.msra.mxu0 %v10451_v8  ;;  %1640 = vmatpush1.bf16.msra.mxu1 %v10454_v46 }
 0x55b   :  { %1703 = vmatprep.subr.bf16.mxu0 %v10457_v35  ;;  %1744 = vmatprep.subr.bf16.mxu1 %v10460_v41 }
 0x610   :  { %v1499_v53 = vpop.f32.mrb[32].mxu0  ;;  %v1540_v55 = vpop.f32.mrb[32].mxu1 }
 0x611   :  { %v1547_v57 = vadd.f32 %v1499_v53, %v10318_v15  ;;  %v1549_v59 = vadd.f32 %v1540_v55, %v10321_v17  ;;  %v1501_v60 = vpop.f32.mrb[33].mxu0  ;;  %v1542_v33 = vpop.f32.mrb[33].mxu1 }
 0x612   :  { %v1548_v27 = vadd.f32 %v1501_v60, %v10870_v42  ;;  %v1550_v63 = vadd.f32 %v1542_v33, %v10871_v25  ;;  %v1503_v1 = vpop.f32.mrb[34].mxu0  ;;  %v1544_v3 = vpop.f32.mrb[34].mxu1  ;;  %v10872_v60 = vld [vmem:[#allocation37_spill] sm:$0xff]  ;;  %v10873_v42 = vld [vmem:[#allocation38_spill] sm:$0xff] }
 0x613   :  { %v7452_v21 = vmul.f32 -1.442695, %v1547_v57  ;;  %v1504_v5 = vpop.f32.mrb[35].mxu0  ;;  %v1545_v23 = vpop.f32.mrb[35].mxu1  ;;  %v10874_v1 = vld [vmem:[#allocation39_spill] sm:$0xff] }
 0x614   :  { %v7453_v7 = vmul.f32 -1.442695, %v1548_v27  ;;  %v7454_v9 = vmul.f32 -1.442695, %v1550_v63 }
 0x615   :  { %9502 = vpow2.f32 %v7452_v21  ;;  %v10875_v21 = vld [vmem:[#allocation40_spill] sm:$0xff] }
 0x616   :  { %9504 = vpow2.f32 %v7453_v7 }
 0x617   :  { %9506 = vpow2.f32 %v7454_v9 }
 0x618   :  { %9508 = vtanh.f32 %v1549_v59 }
 0x61f   :  { %v9503_v11 = vpop.eup %9502 }
 0x620   :  { %v9505_v31 = vpop.eup %9504  ;;  %v1554_v15 = vadd.f32 1.0, %v9503_v11 }
 0x621   :  { %v1560_v17 = vadd.f32 1.0, %v9505_v31  ;;  %v9507_v12 = vpop.eup %9506 }
 0x622   :  { %9510 = vrcp.f32 %v1554_v15  ;;  %v9509_v36 = vpop.eup %9508  ;;  %v1567_v56 = vadd.f32 1.0, %v9507_v12 }
 0x623   :  { %9512 = vrcp.f32 %v1560_v17 }
 0x624   :  { %9514 = vrcp.f32 %v1567_v56 }
 0x62c   :  { %v9511_v38 = vpop.eup %9510 }
 0x62d   :  { %v9513_v61 = vpop.eup %9512  ;;  %v1572_v62 = vmul.f32 %v9511_v38, %v9509_v36 }
 0x62e   :  { %v1571_v28 = vmul.f32 %v9513_v61, %v10552_v0  ;;  %v9515_v39 = vpop.eup %9514 }
 0x630   :  { %v10594_v43 = vadd.f32 %v1572_v62, %v1571_v28 }
 0x632   :  { %9516 = vtanh.f32 %v10594_v43 }
 0x63c   :  { %v9517_v53 = vpop.eup %9516 }
 0x63d   :  { %v1576_v55 = vmul.f32 %v9517_v53, %v9515_v39 }
 0x63f   :  { %v1583_v57 = vpack.c.bf16 %v1576_v55, %v1576_v55 }
 0x641   :  { %1617 = vmatmul.mubr.bf16.vlgmr.msra.gmra.mrb[36].mxu0 %v1583_v57  ;;  %1658 = vmatmul.mubr.bf16.vlgmr.msra.gmra.mrb[36].mxu1 %v1583_v57 }
 0x642   :  { %1704 = vmatpush1.bf16.msra.mxu0 %v10365_v10  ;;  %1745 = vmatpush1.bf16.msra.mxu1 %v10368_v13 }
 0x643   :  { %1705 = vmatprep.subr.bf16.mxu0 %v10371_v14  ;;  %1746 = vmatprep.subr.bf16.mxu1 %v10374_v16 }
 0x644   :  { %1735 = vmatprep.mubr.bf16.mxu0 %v10869_v19  ;;  %1776 = vmatprep.mubr.bf16.mxu1 %v10869_v19 }
 0x646   :  { %1706 = vmatpush1.bf16.msra.mxu0 %v10379_v18  ;;  %1747 = vmatpush1.bf16.msra.mxu1 %v10382_v20 }
 0x647   :  { %1707 = vmatprep.subr.bf16.mxu0 %v10385_v22  ;;  %1748 = vmatprep.subr.bf16.mxu1 %v10388_v24 }
 0x64a   :  { %1708 = vmatpush1.bf16.msra.mxu0 %v10391_v26  ;;  %1749 = vmatpush1.bf16.msra.mxu1 %v10394_v29 }
 0x64b   :  { %1709 = vmatprep.subr.bf16.mxu0 %v10397_v30  ;;  %1750 = vmatprep.subr.bf16.mxu1 %v10400_v32 }
 0x64e   :  { %1710 = vmatpush1.bf16.msra.mxu0 %v10403_v45  ;;  %1751 = vmatpush1.bf16.msra.mxu1 %v10406_v44 }
 0x64f   :  { %1711 = vmatprep.subr.bf16.mxu0 %v10409_v47  ;;  %1752 = vmatprep.subr.bf16.mxu1 %v10412_v49 }
 0x652   :  { %1712 = vmatpush1.bf16.msra.mxu0 %v10415_v48  ;;  %1753 = vmatpush1.bf16.msra.mxu1 %v10418_v50 }
 0x653   :  { %1713 = vmatprep.subr.bf16.mxu0 %v10421_v51  ;;  %1754 = vmatprep.subr.bf16.mxu1 %v10424_v52 }
 0x656   :  { %1714 = vmatpush1.bf16.msra.mxu0 %v10427_v34  ;;  %1755 = vmatpush1.bf16.msra.mxu1 %v10430_v37 }
 0x657   :  { %1715 = vmatprep.subr.bf16.mxu0 %v10433_v40  ;;  %1756 = vmatprep.subr.bf16.mxu1 %v10436_v54 }
 0x65a   :  { %1716 = vmatpush1.bf16.msra.mxu0 %v10439_v58  ;;  %1757 = vmatpush1.bf16.msra.mxu1 %v10442_v2 }
 0x65b   :  { %1717 = vmatprep.subr.bf16.mxu0 %v10445_v4  ;;  %1758 = vmatprep.subr.bf16.mxu1 %v10448_v6 }
 0x65e   :  { %1718 = vmatpush1.bf16.msra.mxu0 %v10451_v8  ;;  %1759 = vmatpush1.bf16.msra.mxu1 %v10454_v46 }
 0x65f   :  { %1822 = vmatprep.subr.bf16.mxu0 %v10457_v35  ;;  %1863 = vmatprep.subr.bf16.mxu1 %v10460_v41 }
 0x714   :  { %v1618_v0 = vpop.f32.mrb[36].mxu0  ;;  %v1659_v59 = vpop.f32.mrb[36].mxu1 }
 0x715   :  { %v1666_v33 = vadd.f32 %v1618_v0, %v10872_v60  ;;  %v1668_v27 = vadd.f32 %v1659_v59, %v10873_v42  ;;  %v1620_v25 = vpop.f32.mrb[37].mxu0  ;;  %v1661_v63 = vpop.f32.mrb[37].mxu1 }
 0x716   :  { %v1667_v3 = vadd.f32 %v1620_v25, %v10874_v1  ;;  %v1669_v5 = vadd.f32 %v1661_v63, %v10875_v21  ;;  %v1622_v23 = vpop.f32.mrb[38].mxu0  ;;  %v1663_v7 = vpop.f32.mrb[38].mxu1  ;;  %v10679_v1 = vld [vmem:[#allocation8 + $0x8] sm:$0xff]  ;;  %v8414_v21 = vld [vmem:[#allocation14] ss:$16 sps:$4 sm:$0xff]  }
 0x717   :  { %v7455_v9 = vmul.f32 -1.442695, %v1666_v33  ;;  %v1623_v11 = vpop.f32.mrb[39].mxu0  ;;  %v1664_v31 = vpop.f32.mrb[39].mxu1  ;;  %v8422_v7 = vld [vmem:[#allocation14 + $0x24] ss:$16 sps:$4 sm:$0xff]  }
 0x718   :  { %v7456_v35 = vmul.f32 -1.442695, %v1667_v3  ;;  %v7457_v41 = vmul.f32 -1.442695, %v1669_v5  ;;  %v10681_v3 = vld [vmem:[#allocation8] sm:$0xff]  ;;  %v10685_v11 = vcombine.high %v10679_v1, %v10679_v1 }
 0x719   :  { %9518 = vpow2.f32 %v7455_v9  ;;  %v8417_v5 = vld [vmem:[#allocation14 + $0x200] ss:$16 sps:$4 sm:$0xff]   ;;  %v8425_v9 = vld [vmem:[#allocation14 + $0x224] ss:$16 sps:$4 sm:$0xff]   ;;  %v10689_v31 = vcombine.high %v10681_v3, %v10681_v3 }
 0x71a   :  { %9520 = vpow2.f32 %v7456_v35  ;;  %v8420_v35 = vld [vmem:[#allocation14 + $0x20] ss:$16 sps:$4 sm:$0xff]  }
 0x71b   :  { %9522 = vpow2.f32 %v7457_v41  ;;  %v8423_v41 = vld [vmem:[#allocation14 + $0x220] ss:$16 sps:$4 sm:$0xff]  }
 0x71c   :  { %9524 = vtanh.f32 %v1668_v27 }
 0x723   :  { %v9519_v15 = vpop.eup %9518 }
 0x724   :  { %v9521_v17 = vpop.eup %9520  ;;  %v1673_v12 = vadd.f32 1.0, %v9519_v15  ;;  %v8428_v15 = vld [vmem:[#allocation14 + $0x44] ss:$16 sps:$4 sm:$0xff]  }
 0x725   :  { %v1679_v36 = vadd.f32 1.0, %v9521_v17  ;;  %v9523_v38 = vpop.eup %9522  ;;  %v8431_v17 = vld [vmem:[#allocation14 + $0x244] ss:$16 sps:$4 sm:$0xff]  }
 0x726   :  { %9526 = vrcp.f32 %v1673_v12  ;;  %v9525_v61 = vpop.eup %9524  ;;  %v1686_v39 = vadd.f32 1.0, %v9523_v38  ;;  %v8426_v12 = vld [vmem:[#allocation14 + $0x40] ss:$16 sps:$4 sm:$0xff]   ;;  %v8434_v38 = vld [vmem:[#allocation14 + $0x64] ss:$16 sps:$4 sm:$0xff]  }
 0x727   :  { %9528 = vrcp.f32 %v1679_v36  ;;  %v8429_v36 = vld [vmem:[#allocation14 + $0x240] ss:$16 sps:$4 sm:$0xff]  }
 0x728   :  { %9530 = vrcp.f32 %v1686_v39  ;;  %v8443_v39 = vld [vmem:[#allocation14 + $0x284] ss:$16 sps:$4 sm:$0xff]  }
 0x730   :  { %v9527_v62 = vpop.eup %9526 }
 0x731   :  { %v9529_v56 = vpop.eup %9528  ;;  %v1691_v28 = vmul.f32 %v9527_v62, %v9525_v61  ;;  %v8437_v61 = vld [vmem:[#allocation14 + $0x264] ss:$16 sps:$4 sm:$0xff]   ;;  %v8432_v62 = vld [vmem:[#allocation14 + $0x60] ss:$16 sps:$4 sm:$0xff]  }
 0x732   :  { %v1690_v53 = vmul.f32 %v9529_v56, %v10594_v43  ;;  %v9531_v57 = vpop.eup %9530  ;;  %v8435_v56 = vld [vmem:[#allocation14 + $0x260] ss:$16 sps:$4 sm:$0xff]  }
 0x734   :  { %v10636_v55 = vadd.f32 %v1691_v28, %v1690_v53  ;;  %v8440_v28 = vld [vmem:[#allocation14 + $0x84] ss:$16 sps:$4 sm:$0xff]   ;;  %v8438_v53 = vld [vmem:[#allocation14 + $0x80] ss:$16 sps:$4 sm:$0xff]  }
 0x736   :  { %9532 = vtanh.f32 %v10636_v55 }
 0x740   :  { %v9533_v0 = vpop.eup %9532 }
 0x741   :  { %v1695_v59 = vmul.f32 %v9533_v0, %v9531_v57  ;;  %v8446_v57 = vld [vmem:[#allocation14 + $0xa4] ss:$16 sps:$4 sm:$0xff]  }
 0x742   :  { %v8449_v0 = vld [vmem:[#allocation14 + $0x2a4] ss:$16 sps:$4 sm:$0xff]  }
 0x743   :  { %v1702_v60 = vpack.c.bf16 %v1695_v59, %v1695_v59  ;;  %v8444_v59 = vld [vmem:[#allocation14 + $0xa0] ss:$16 sps:$4 sm:$0xff]  }
 0x745   :  { %1736 = vmatmul.mubr.bf16.vlgmr.msra.gmra.mrb[40].mxu0 %v1702_v60  ;;  %1777 = vmatmul.mubr.bf16.vlgmr.msra.gmra.mrb[40].mxu1 %v1702_v60  ;;  %v8447_v60 = vld [vmem:[#allocation14 + $0x2a0] ss:$16 sps:$4 sm:$0xff]  }
 0x746   :  { %1823 = vmatpush1.bf16.msra.mxu0 %v10365_v10  ;;  %1864 = vmatpush1.bf16.msra.mxu1 %v10368_v13  ;;  %v8416_v10 = vld [vmem:[#allocation14 + $0x4] ss:$16 sps:$4 sm:$0xff]  }
 0x747   :  { %1824 = vmatprep.subr.bf16.mxu0 %v10371_v14  ;;  %1865 = vmatprep.subr.bf16.mxu1 %v10374_v16  ;;  %v8419_v13 = vld [vmem:[#allocation14 + $0x204] ss:$16 sps:$4 sm:$0xff]  }
 0x748   :  { %1854 = vmatprep.mubr.bf16.mxu0 %v10869_v19  ;;  %1895 = vmatprep.mubr.bf16.mxu1 %v10869_v19 }
 0x74a   :  { %1825 = vmatpush1.bf16.msra.mxu0 %v10379_v18  ;;  %1866 = vmatpush1.bf16.msra.mxu1 %v10382_v20  ;;  %v10876_v18 = vld [vmem:[#allocation41_spill] sm:$0xff] }
 0x74b   :  { %1826 = vmatprep.subr.bf16.mxu0 %v10385_v22  ;;  %1867 = vmatprep.subr.bf16.mxu1 %v10388_v24  ;;  %v10877_v22 = vld [vmem:[#allocation42_spill] sm:$0xff] }
 0x74e   :  { %1827 = vmatpush1.bf16.msra.mxu0 %v10391_v26  ;;  %1868 = vmatpush1.bf16.msra.mxu1 %v10394_v29 }
 0x74f   :  { %1828 = vmatprep.subr.bf16.mxu0 %v10397_v30  ;;  %1869 = vmatprep.subr.bf16.mxu1 %v10400_v32  ;;  %v10878_v30 = vld [vmem:[#allocation43_spill] sm:$0xff] }
 0x752   :  { %1829 = vmatpush1.bf16.msra.mxu0 %v10403_v45  ;;  %1870 = vmatpush1.bf16.msra.mxu1 %v10406_v44  ;;  %v10879_v45 = vld [vmem:[#allocation44_spill] sm:$0xff] }
 0x753   :  { %1830 = vmatprep.subr.bf16.mxu0 %v10409_v47  ;;  %1871 = vmatprep.subr.bf16.mxu1 %v10412_v49 }
 0x756   :  { %1831 = vmatpush1.bf16.msra.mxu0 %v10415_v48  ;;  %1872 = vmatpush1.bf16.msra.mxu1 %v10418_v50 }
 0x757   :  { %1832 = vmatprep.subr.bf16.mxu0 %v10421_v51  ;;  %1873 = vmatprep.subr.bf16.mxu1 %v10424_v52 }
 0x75a   :  { %1833 = vmatpush1.bf16.msra.mxu0 %v10427_v34  ;;  %1874 = vmatpush1.bf16.msra.mxu1 %v10430_v37 }
 0x75b   :  { %1834 = vmatprep.subr.bf16.mxu0 %v10433_v40  ;;  %1875 = vmatprep.subr.bf16.mxu1 %v10436_v54 }
 0x75e   :  { %1835 = vmatpush1.bf16.msra.mxu0 %v10439_v58  ;;  %1876 = vmatpush1.bf16.msra.mxu1 %v10442_v2 }
 0x75f   :  { %1836 = vmatprep.subr.bf16.mxu0 %v10445_v4  ;;  %1877 = vmatprep.subr.bf16.mxu1 %v10448_v6 }
 0x762   :  { %1837 = vmatpush1.bf16.msra.mxu0 %v10451_v8  ;;  %1878 = vmatpush1.bf16.msra.mxu1 %v10454_v46 }
 0x763   :  { %2688 = vmatprep.subr.bf16.mxu0 %v8416_v10  ;;  %2729 = vmatprep.subr.bf16.mxu1 %v8419_v13  ;;  %v8452_v10 = vld [vmem:[#allocation14 + $0xc4] ss:$16 sps:$4 sm:$0xff]  }
 0x764   :  { %v8455_v13 = vld [vmem:[#allocation14 + $0x2c4] ss:$16 sps:$4 sm:$0xff]  }
 0x818   :  { %v1737_v14 = vpop.f32.mrb[40].mxu0  ;;  %v1778_v16 = vpop.f32.mrb[40].mxu1 }
 0x819   :  { %v1785_v20 = vadd.f32 %v1737_v14, %v10876_v18  ;;  %v1787_v24 = vadd.f32 %v1778_v16, %v10877_v22  ;;  %v1739_v26 = vpop.f32.mrb[41].mxu0  ;;  %v1780_v29 = vpop.f32.mrb[41].mxu1  ;;  %v8450_v14 = vld [vmem:[#allocation14 + $0xc0] ss:$16 sps:$4 sm:$0xff]   ;;  %v8458_v18 = vld [vmem:[#allocation14 + $0xe4] ss:$16 sps:$4 sm:$0xff]  }
 0x81a   :  { %v1786_v32 = vadd.f32 %v1739_v26, %v10878_v30  ;;  %v1788_v44 = vadd.f32 %v1780_v29, %v10879_v45  ;;  %v1741_v47 = vpop.f32.mrb[42].mxu0  ;;  %v1782_v49 = vpop.f32.mrb[42].mxu1  ;;  %v8453_v16 = vld [vmem:[#allocation14 + $0x2c0] ss:$16 sps:$4 sm:$0xff]   ;;  %v8464_v26 = vld [vmem:[#allocation14 + $0x104] ss:$16 sps:$4 sm:$0xff]  }
 0x81b   :  { %v7458_v48 = vmul.f32 -1.442695, %v1785_v20  ;;  %v1742_v46 = vpop.f32.mrb[43].mxu0  ;;  %v1783_v50 = vpop.f32.mrb[43].mxu1  ;;  %v8461_v20 = vld [vmem:[#allocation14 + $0x2e4] ss:$16 sps:$4 sm:$0xff]  }
 0x81c   :  { %v7459_v51 = vmul.f32 -1.442695, %v1786_v32  ;;  %v7460_v52 = vmul.f32 -1.442695, %v1788_v44  ;;  %v8456_v22 = vld [vmem:[#allocation14 + $0xe0] ss:$16 sps:$4 sm:$0xff]  }
 0x81d   :  { %9534 = vpow2.f32 %v7458_v48  ;;  %v8467_v29 = vld [vmem:[#allocation14 + $0x304] ss:$16 sps:$4 sm:$0xff]   ;;  %v8462_v30 = vld [vmem:[#allocation14 + $0x100] ss:$16 sps:$4 sm:$0xff]  }
 0x81e   :  { %9536 = vpow2.f32 %v7459_v51  ;;  %v8465_v32 = vld [vmem:[#allocation14 + $0x300] ss:$16 sps:$4 sm:$0xff]   ;;  %v8470_v45 = vld [vmem:[#allocation14 + $0x124] ss:$16 sps:$4 sm:$0xff]   ;;  %v10880_v51 = vmov 65535  }
 0x81f   :  { %9538 = vpow2.f32 %v7460_v52  ;;  %v8473_v44 = vld [vmem:[#allocation14 + $0x324] ss:$16 sps:$4 sm:$0xff]   ;;  %v8468_v47 = vld [vmem:[#allocation14 + $0x120] ss:$16 sps:$4 sm:$0xff]   ;;  %v2674_v52 = vsel %vm2672_vm4, 4294967295, %v10880_v51 }
 0x820   :  { %9540 = vtanh.f32 %v1787_v24  ;;  %v8459_v24 = vld [vmem:[#allocation14 + $0x2e0] ss:$16 sps:$4 sm:$0xff]   ;;  %v8476_v48 = vld [vmem:[#allocation14 + $0x144] ss:$16 sps:$4 sm:$0xff]   ;;  %v8566_v51 = vld [vmem:[#allocation14 + $0x16c] ss:$16 sps:$4 sm:$0xff]  }
 0x821   :  { %v8471_v49 = vld [vmem:[#allocation14 + $0x320] ss:$16 sps:$4 sm:$0xff]   ;;  %v8479_v46 = vld [vmem:[#allocation14 + $0x344] ss:$16 sps:$4 sm:$0xff]  }
 0x822   :  { %v2083_v50 = vld [vmem:[#allocation14 + $0x380] sm:$0x33] }
 0x827   :  { %v9535_v34 = vpop.eup %9534 }
 0x828   :  { %v9537_v37 = vpop.eup %9536  ;;  %v1792_v40 = vadd.f32 1.0, %v9535_v34  ;;  %v8474_v34 = vld [vmem:[#allocation14 + $0x140] ss:$16 sps:$4 sm:$0xff]  }
 0x829   :  { %v1798_v54 = vadd.f32 1.0, %v9537_v37  ;;  %v9539_v58 = vpop.eup %9538  ;;  %v8477_v37 = vld [vmem:[#allocation14 + $0x340] ss:$16 sps:$4 sm:$0xff]  }
 0x82a   :  { %9542 = vrcp.f32 %v1792_v40  ;;  %v9541_v2 = vpop.eup %9540  ;;  %v1805_v43 = vadd.f32 1.0, %v9539_v58  ;;  %v8482_v40 = vld [vmem:[#allocation14 + $0x164] ss:$16 sps:$4 sm:$0xff]   ;;  %v7581_v58 = vcombine.high %v2083_v50, %v2083_v50 }
 0x82b   :  { %9544 = vrcp.f32 %v1798_v54  ;;  %v8485_v54 = vld [vmem:[#allocation14 + $0x364] ss:$16 sps:$4 sm:$0xff]  }
 0x82c   :  { %9546 = vrcp.f32 %v1805_v43  ;;  %v8488_v43 = vld [vmem:[#allocation14 + $0x184] ss:$16 sps:$4 sm:$0xff]  }
 0x834   :  { %v9543_v4 = vpop.eup %9542 }
 0x835   :  { %v9545_v6 = vpop.eup %9544  ;;  %v1810_v8 = vmul.f32 %v9543_v4, %v9541_v2  ;;  %v10695_v2 = vsel %vm2673_vm5, %v2674_v52, 0  ;;  %v8480_v4 = vld [vmem:[#allocation14 + $0x160] ss:$16 sps:$4 sm:$0xff]   ;;  %v8561_v52 = vld [vmem:[#allocation14 + $0x308] ss:$16 sps:$4 sm:$0xff]  }
 0x836   :  { %v1809_v33 = vmul.f32 %v9545_v6, %v10636_v55  ;;  %v9547_v27 = vpop.eup %9546  ;;  %v8441_v55 = vld [vmem:[#allocation14 + $0x280] ss:$16 sps:$4 sm:$0xff]  }
 0x837   :  { %v8483_v6 = vld [vmem:[#allocation14 + $0x360] ss:$16 sps:$4 sm:$0xff]  }
 0x838   :  { %v10676_v42 = vadd.f32 %v1810_v8, %v1809_v33  ;;  %v7580_v8 = vcombine.low %v2083_v50, %v2083_v50  ;;  %v2680_v33 = vand.u32 %v7581_v58, %v10695_v2  ;;  %v8563_v50 = vld [vmem:[#allocation14 + $0x30c] ss:$16 sps:$4 sm:$0xff]   ;;  %v8570_v58 = vld [vmem:[#allocation14 + $0x188] ss:$16 sps:$4 sm:$0xff]  }
 0x83a   :  { %9548 = vtanh.f32 %v10676_v42 }
 0x844   :  { %v9549_v25 = vpop.eup %9548 }
 0x845   :  { %v1814_v63 = vmul.f32 %v9549_v25, %v9547_v27  ;;  %v8486_v27 = vld [vmem:[#allocation14 + $0x180] ss:$16 sps:$4 sm:$0xff]   ;;  %v2677_v25 = vand.u32 %v7580_v8, %v10695_v2  ;;  %v2084_v8 = vld [vmem:[#allocation14 + $0x388] sm:$0x33] }
 0x847   :  { %v1821_v23 = vpack.c.bf16 %v1814_v63, %v1814_v63  ;;  %v8493_v63 = vld [vmem:[#allocation14 + $0x1a4] ss:$16 sps:$4 sm:$0xff]  }
 0x849   :  { %1855 = vmatmul.mubr.bf16.vlgmr.msra.gmra.mrb[44].mxu0 %v1821_v23  ;;  %1896 = vmatmul.mubr.bf16.vlgmr.msra.gmra.mrb[44].mxu1 %v1821_v23  ;;  %v8491_v23 = vld [vmem:[#allocation14 + $0x1a0] ss:$16 sps:$4 sm:$0xff]  }
 0x84a   :  { %2689 = vmatpush1.bf16.msra.mxu0 %v8414_v21  ;;  %2730 = vmatpush1.bf16.msra.mxu1 %v8417_v5  ;;  %v8497_v21 = vld [vmem:[#allocation14 + $0xc] ss:$16 sps:$4 sm:$0xff]   ;;  %v10701_v5 = vcombine.low %v10679_v1, %v10679_v1  ;;  %v8505_v1 = vld [vmem:[#allocation14 + $0x1e0] ss:$16 sps:$4 sm:$0xff]  }
 0x84b   :  { %2690 = vmatprep.subr.bf16.mxu0 %v8422_v7  ;;  %2731 = vmatprep.subr.bf16.mxu1 %v8425_v9  ;;  %v8495_v7 = vld [vmem:[#allocation14 + $0x8] ss:$16 sps:$4 sm:$0xff]   ;;  %v8501_v9 = vld [vmem:[#allocation14 + $0x1c4] ss:$16 sps:$4 sm:$0xff]  }
 0x84c   :  { %7584 = vmatprep.mubr.msk.bf16.mxu1 %vm2668_vm3, %v10685_v11  ;;  %2720 = vmatprep.mubr.bf16.mxu0 %v10689_v31 }
 0x84e   :  { %2691 = vmatpush1.bf16.msra.mxu0 %v8420_v35  ;;  %2732 = vmatpush1.bf16.msra.mxu1 %v8423_v41  ;;  %v8504_v35 = vld [vmem:[#allocation14 + $0x2c] ss:$16 sps:$4 sm:$0xff]   ;;  %v8499_v41 = vld [vmem:[#allocation14 + $0x1c0] ss:$16 sps:$4 sm:$0xff]  }
 0x84f   :  { %2692 = vmatprep.subr.bf16.mxu0 %v8428_v15  ;;  %2733 = vmatprep.subr.bf16.mxu1 %v8431_v17  ;;  %v8502_v15 = vld [vmem:[#allocation14 + $0x28] ss:$16 sps:$4 sm:$0xff]   ;;  %v8507_v17 = vld [vmem:[#allocation14 + $0x1e4] ss:$16 sps:$4 sm:$0xff]  }
 0x852   :  { %2693 = vmatpush1.bf16.msra.mxu0 %v8426_v12  ;;  %2734 = vmatpush1.bf16.msra.mxu1 %v8429_v36  ;;  %v8510_v12 = vld [vmem:[#allocation14 + $0x4c] ss:$16 sps:$4 sm:$0xff]   ;;  %v8508_v36 = vld [vmem:[#allocation14 + $0x48] ss:$16 sps:$4 sm:$0xff]  }
 0x853   :  { %2694 = vmatprep.subr.bf16.mxu0 %v8434_v38  ;;  %2735 = vmatprep.subr.bf16.mxu1 %v8437_v61  ;;  %v8515_v38 = vld [vmem:[#allocation14 + $0x20c] ss:$16 sps:$4 sm:$0xff]  }
 0x854   :  { %v8518_v61 = vld [vmem:[#allocation14 + $0x6c] ss:$16 sps:$4 sm:$0xff]  }
 0x856   :  { %2695 = vmatpush1.bf16.msra.mxu0 %v8432_v62  ;;  %2736 = vmatpush1.bf16.msra.mxu1 %v8435_v56  ;;  %v10707_v62 = vcombine.low %v10681_v3, %v10681_v3  ;;  %v8513_v56 = vld [vmem:[#allocation14 + $0x208] ss:$16 sps:$4 sm:$0xff]  }
 0x857   :  { %2696 = vmatprep.subr.bf16.mxu0 %v8440_v28  ;;  %2737 = vmatprep.subr.bf16.mxu1 %v8443_v39  ;;  %v8516_v28 = vld [vmem:[#allocation14 + $0x68] ss:$16 sps:$4 sm:$0xff]   ;;  %v8521_v39 = vld [vmem:[#allocation14 + $0x22c] ss:$16 sps:$4 sm:$0xff]  }
 0x858   :  { %v8525_v3 = vld [vmem:[#allocation14 + $0x248] ss:$16 sps:$4 sm:$0xff]  }
 0x85a   :  { %2697 = vmatpush1.bf16.msra.mxu0 %v8438_v53  ;;  %2738 = vmatpush1.bf16.msra.mxu1 %v8441_v55  ;;  %v8519_v53 = vld [vmem:[#allocation14 + $0x228] ss:$16 sps:$4 sm:$0xff]  }
 0x85b   :  { %2698 = vmatprep.subr.bf16.mxu0 %v8446_v57  ;;  %2739 = vmatprep.subr.bf16.mxu1 %v8449_v0  ;;  %v8522_v55 = vld [vmem:[#allocation14 + $0x88] ss:$16 sps:$4 sm:$0xff]   ;;  %v8527_v57 = vld [vmem:[#allocation14 + $0x24c] ss:$16 sps:$4 sm:$0xff]  }
 0x85c   :  { %v8530_v0 = vld [vmem:[#allocation14 + $0xac] ss:$16 sps:$4 sm:$0xff]  }
 0x85e   :  { %2699 = vmatpush1.bf16.msra.mxu0 %v8444_v59  ;;  %2740 = vmatpush1.bf16.msra.mxu1 %v8447_v60  ;;  %v8528_v59 = vld [vmem:[#allocation14 + $0xa8] ss:$16 sps:$4 sm:$0xff]   ;;  %v8533_v60 = vld [vmem:[#allocation14 + $0x26c] ss:$16 sps:$4 sm:$0xff]  }
 0x85f   :  { %2700 = vmatprep.subr.bf16.mxu0 %v8452_v10  ;;  %2741 = vmatprep.subr.bf16.mxu1 %v8455_v13  ;;  %v8536_v10 = vld [vmem:[#allocation14 + $0xcc] ss:$16 sps:$4 sm:$0xff]   ;;  %v8531_v13 = vld [vmem:[#allocation14 + $0x268] ss:$16 sps:$4 sm:$0xff]  }
 0x862   :  { %2701 = vmatpush1.bf16.msra.mxu0 %v8450_v14  ;;  %2742 = vmatpush1.bf16.msra.mxu1 %v8453_v16  ;;  %v8534_v14 = vld [vmem:[#allocation14 + $0xc8] ss:$16 sps:$4 sm:$0xff]   ;;  %v8539_v16 = vld [vmem:[#allocation14 + $0x28c] ss:$16 sps:$4 sm:$0xff]  }
 0x863   :  { %2702 = vmatprep.subr.bf16.mxu0 %v8458_v18  ;;  %2743 = vmatprep.subr.bf16.mxu1 %v8461_v20  ;;  %v8542_v18 = vld [vmem:[#allocation14 + $0xec] ss:$16 sps:$4 sm:$0xff]   ;;  %v8537_v20 = vld [vmem:[#allocation14 + $0x288] ss:$16 sps:$4 sm:$0xff]  }
 0x866   :  { %2703 = vmatpush1.bf16.msra.mxu0 %v8456_v22  ;;  %2744 = vmatpush1.bf16.msra.mxu1 %v8459_v24  ;;  %v8545_v22 = vld [vmem:[#allocation14 + $0x2ac] ss:$16 sps:$4 sm:$0xff]  }
 0x867   :  { %2704 = vmatprep.subr.bf16.mxu0 %v8464_v26  ;;  %2745 = vmatprep.subr.bf16.mxu1 %v8467_v29  ;;  %v8548_v24 = vld [vmem:[#allocation14 + $0x10c] ss:$16 sps:$4 sm:$0xff]   ;;  %v8543_v26 = vld [vmem:[#allocation14 + $0x2a8] ss:$16 sps:$4 sm:$0xff]  }
 0x868   :  { %v8546_v29 = vld [vmem:[#allocation14 + $0x108] ss:$16 sps:$4 sm:$0xff]  }
 0x86a   :  { %2705 = vmatpush1.bf16.msra.mxu0 %v8462_v30  ;;  %2746 = vmatpush1.bf16.msra.mxu1 %v8465_v32  ;;  %v8551_v30 = vld [vmem:[#allocation14 + $0x2cc] ss:$16 sps:$4 sm:$0xff]  }
 0x86b   :  { %2706 = vmatprep.subr.bf16.mxu0 %v8470_v45  ;;  %2747 = vmatprep.subr.bf16.mxu1 %v8473_v44  ;;  %v8554_v32 = vld [vmem:[#allocation14 + $0x12c] ss:$16 sps:$4 sm:$0xff]   ;;  %v8549_v45 = vld [vmem:[#allocation14 + $0x2c8] ss:$16 sps:$4 sm:$0xff]  }
 0x86c   :  { %v8552_v44 = vld [vmem:[#allocation14 + $0x128] ss:$16 sps:$4 sm:$0xff]  }
 0x86e   :  { %2707 = vmatpush1.bf16.msra.mxu0 %v8468_v47  ;;  %2748 = vmatpush1.bf16.msra.mxu1 %v8471_v49  ;;  %v8557_v47 = vld [vmem:[#allocation14 + $0x2ec] ss:$16 sps:$4 sm:$0xff]  }
 0x86f   :  { %2708 = vmatprep.subr.bf16.mxu0 %v8476_v48  ;;  %2749 = vmatprep.subr.bf16.mxu1 %v8479_v46  ;;  %v8560_v49 = vld [vmem:[#allocation14 + $0x14c] ss:$16 sps:$4 sm:$0xff]   ;;  %v8555_v48 = vld [vmem:[#allocation14 + $0x2e8] ss:$16 sps:$4 sm:$0xff]  }
 0x870   :  { %v8558_v46 = vld [vmem:[#allocation14 + $0x148] ss:$16 sps:$4 sm:$0xff]  }
 0x872   :  { %2709 = vmatpush1.bf16.msra.mxu0 %v8474_v34  ;;  %2750 = vmatpush1.bf16.msra.mxu1 %v8477_v37  ;;  %v8564_v34 = vld [vmem:[#allocation14 + $0x168] ss:$16 sps:$4 sm:$0xff]   ;;  %v8569_v37 = vld [vmem:[#allocation14 + $0x32c] ss:$16 sps:$4 sm:$0xff]  }
 0x873   :  { %2710 = vmatprep.subr.bf16.mxu0 %v8482_v40  ;;  %2751 = vmatprep.subr.bf16.mxu1 %v8485_v54  ;;  %v8572_v40 = vld [vmem:[#allocation14 + $0x18c] ss:$16 sps:$4 sm:$0xff]   ;;  %v8567_v54 = vld [vmem:[#allocation14 + $0x328] ss:$16 sps:$4 sm:$0xff]  }
 0x876   :  { %2711 = vmatpush1.bf16.msra.mxu0 %v8480_v4  ;;  %2752 = vmatpush1.bf16.msra.mxu1 %v8483_v6  ;;  %v8575_v4 = vld [vmem:[#allocation14 + $0x34c] ss:$16 sps:$4 sm:$0xff]  }
 0x877   :  { %2712 = vmatprep.subr.bf16.mxu0 %v8488_v43  ;;  %2753 = vmatprep.subr.bf16.mxu1 %v2680_v33  ;;  %v8578_v6 = vld [vmem:[#allocation14 + $0x1ac] ss:$16 sps:$4 sm:$0xff]   ;;  %v8573_v43 = vld [vmem:[#allocation14 + $0x348] ss:$16 sps:$4 sm:$0xff]  }
 0x878   :  { %v8576_v33 = vld [vmem:[#allocation14 + $0x1a8] ss:$16 sps:$4 sm:$0xff]  }
 0x87a   :  { %2713 = vmatpush1.bf16.msra.mxu0 %v8486_v27  ;;  %2754 = vmatpush1.bf16.msra.mxu1 %v2677_v25  ;;  %v8581_v27 = vld [vmem:[#allocation14 + $0x36c] ss:$16 sps:$4 sm:$0xff]  }
 0x87b   :  { %2714 = vmatprep.subr.bf16.mxu0 %v8493_v63  ;;  %2770 = vmatprep.subr.bf16.mxu1 %v8497_v21  ;;  %v8584_v25 = vld [vmem:[#allocation14 + $0x1cc] ss:$16 sps:$4 sm:$0xff]   ;;  %v7583_v63 = vcombine.high %v2084_v8, %v2084_v8  ;;  %v8579_v21 = vld [vmem:[#allocation14 + $0x368] ss:$16 sps:$4 sm:$0xff]  }
 0x87d   :  { %2762 = vmatmul.mubr.bf16.vlgmr.msra.gmra.mrb[48].mxu1 %v10701_v5 }
 0x87e   :  { %2715 = vmatpush1.bf16.msra.mxu0 %v8491_v23  ;;  %2771 = vmatpush1.bf16.msra.mxu1 %v8495_v7  ;;  %v8582_v23 = vld [vmem:[#allocation14 + $0x1c8] ss:$16 sps:$4 sm:$0xff]   ;;  %v7582_v7 = vcombine.low %v2084_v8, %v2084_v8 }
 0x87f   :  { %2716 = vmatprep.subr.bf16.mxu0 %v8501_v9  ;;  %2772 = vmatprep.subr.bf16.mxu1 %v8504_v35  ;;  %v2686_v9 = vand.u32 %v7583_v63, %v10695_v2  ;;  %v8589_v35 = vld [vmem:[#allocation14 + $0x1ec] ss:$16 sps:$4 sm:$0xff]  }
 0x880   :  { %2802 = vmatprep.mubr.bf16.mxu1 %v10689_v31  ;;  %v8524_v31 = vld [vmem:[#allocation14 + $0x8c] ss:$16 sps:$4 sm:$0xff]  }
 0x882   :  { %2717 = vmatpush1.bf16.msra.mxu0 %v8499_v41  ;;  %2773 = vmatpush1.bf16.msra.mxu1 %v8502_v15  ;;  %v8587_v41 = vld [vmem:[#allocation14 + $0x1e8] ss:$16 sps:$4 sm:$0xff]   ;;  %v2683_v15 = vand.u32 %v7582_v7, %v10695_v2 }
 0x883   :  { %2718 = vmatprep.subr.bf16.mxu0 %v8507_v17  ;;  %2774 = vmatprep.subr.bf16.mxu1 %v8510_v12  ;;  %v8592_v17 = vld [vmem:[#allocation13 + $0x4] ss:$16 sps:$4 sm:$0xff]   ;;  %v8595_v12 = vld [vmem:[#allocation13 + $0xc] ss:$16 sps:$4 sm:$0xff]   ;;  %v8599_v2 = vld [vmem:[#allocation13 + $0x28] ss:$16 sps:$4 sm:$0xff]  }
 0x886   :  { %2719 = vmatpush1.bf16.msra.mxu0 %v8505_v1  ;;  %2775 = vmatpush1.bf16.msra.mxu1 %v8508_v36  ;;  %v8590_v1 = vld [vmem:[#allocation13] ss:$16 sps:$4 sm:$0xff]   ;;  %v8593_v36 = vld [vmem:[#allocation13 + $0x8] ss:$16 sps:$4 sm:$0xff]  }
 0x887   :  { %2811 = vmatprep.subr.bf16.mxu0 %v8515_v38  ;;  %2776 = vmatprep.subr.bf16.mxu1 %v8518_v61  ;;  %v8598_v38 = vld [vmem:[#allocation13 + $0x24] ss:$16 sps:$4 sm:$0xff]   ;;  %v8601_v61 = vld [vmem:[#allocation13 + $0x2c] ss:$16 sps:$4 sm:$0xff]  }
 0x889   :  { %2721 = vmatmul.mubr.bf16.vlgmr.msra.gmra.mrb[48].mxu0 %v10707_v62 }
 0x88a   :  { %2812 = vmatpush1.bf16.msra.mxu0 %v8513_v56  ;;  %2777 = vmatpush1.bf16.msra.mxu1 %v8516_v28  ;;  %v8596_v56 = vld [vmem:[#allocation13 + $0x20] ss:$16 sps:$4 sm:$0xff]   ;;  %v8604_v28 = vld [vmem:[#allocation13 + $0x44] ss:$16 sps:$4 sm:$0xff]  }
 0x88b   :  { %2813 = vmatprep.subr.bf16.mxu0 %v8521_v39  ;;  %2778 = vmatprep.subr.bf16.mxu1 %v8524_v31  ;;  %v8607_v39 = vld [vmem:[#allocation13 + $0x4c] ss:$16 sps:$4 sm:$0xff]   ;;  %v8602_v31 = vld [vmem:[#allocation13 + $0x40] ss:$16 sps:$4 sm:$0xff]  }
 0x88c   :  { %7585 = vmatprep.mubr.msk.bf16.mxu0 %vm2668_vm3, %v10685_v11  ;;  %v8540_v11 = vld [vmem:[#allocation14 + $0xe8] ss:$16 sps:$4 sm:$0xff]  }
 0x88e   :  { %2814 = vmatpush1.bf16.msra.mxu0 %v8519_v53  ;;  %2779 = vmatpush1.bf16.msra.mxu1 %v8522_v55  ;;  %v8605_v53 = vld [vmem:[#allocation13 + $0x48] ss:$16 sps:$4 sm:$0xff]   ;;  %v8608_v55 = vld [vmem:[#allocation13 + $0x60] ss:$16 sps:$4 sm:$0xff]  }
 0x88f   :  { %2815 = vmatprep.subr.bf16.mxu0 %v8527_v57  ;;  %2780 = vmatprep.subr.bf16.mxu1 %v8530_v0  ;;  %v8611_v57 = vld [vmem:[#allocation13 + $0x68] ss:$16 sps:$4 sm:$0xff]   ;;  %v8616_v0 = vld [vmem:[#allocation13 + $0x84] ss:$16 sps:$4 sm:$0xff]  }
 0x892   :  { %2816 = vmatpush1.bf16.msra.mxu0 %v8525_v3  ;;  %2781 = vmatpush1.bf16.msra.mxu1 %v8528_v59  ;;  %v8619_v3 = vld [vmem:[#allocation13 + $0x8c] ss:$16 sps:$4 sm:$0xff]   ;;  %v8614_v59 = vld [vmem:[#allocation13 + $0x80] ss:$16 sps:$4 sm:$0xff]  }
 0x893   :  { %2817 = vmatprep.subr.bf16.mxu0 %v8533_v60  ;;  %2782 = vmatprep.subr.bf16.mxu1 %v8536_v10  ;;  %v8622_v60 = vld [vmem:[#allocation13 + $0xa4] ss:$16 sps:$4 sm:$0xff]   ;;  %v8625_v10 = vld [vmem:[#allocation13 + $0xac] ss:$16 sps:$4 sm:$0xff]  }
 0x896   :  { %2818 = vmatpush1.bf16.msra.mxu0 %v8531_v13  ;;  %2783 = vmatpush1.bf16.msra.mxu1 %v8534_v14  ;;  %v8620_v13 = vld [vmem:[#allocation13 + $0xa0] ss:$16 sps:$4 sm:$0xff]   ;;  %v8623_v14 = vld [vmem:[#allocation13 + $0xa8] ss:$16 sps:$4 sm:$0xff]  }
 0x897   :  { %2819 = vmatprep.subr.bf16.mxu0 %v8539_v16  ;;  %2784 = vmatprep.subr.bf16.mxu1 %v8542_v18  ;;  %v8628_v16 = vld [vmem:[#allocation13 + $0xc4] ss:$16 sps:$4 sm:$0xff]   ;;  %v8631_v18 = vld [vmem:[#allocation13 + $0xcc] ss:$16 sps:$4 sm:$0xff]  }
 0x89a   :  { %2820 = vmatpush1.bf16.msra.mxu0 %v8537_v20  ;;  %2785 = vmatpush1.bf16.msra.mxu1 %v8540_v11  ;;  %v8626_v20 = vld [vmem:[#allocation13 + $0xc0] ss:$16 sps:$4 sm:$0xff]   ;;  %v8629_v11 = vld [vmem:[#allocation13 + $0xc8] ss:$16 sps:$4 sm:$0xff]  }
 0x89b   :  { %2821 = vmatprep.subr.bf16.mxu0 %v8545_v22  ;;  %2786 = vmatprep.subr.bf16.mxu1 %v8548_v24  ;;  %v8634_v22 = vld [vmem:[#allocation13 + $0xe4] ss:$16 sps:$4 sm:$0xff]   ;;  %v8637_v24 = vld [vmem:[#allocation13 + $0xec] ss:$16 sps:$4 sm:$0xff]  }
 0x89e   :  { %2822 = vmatpush1.bf16.msra.mxu0 %v8543_v26  ;;  %2787 = vmatpush1.bf16.msra.mxu1 %v8546_v29  ;;  %v8632_v26 = vld [vmem:[#allocation13 + $0xe0] ss:$16 sps:$4 sm:$0xff]   ;;  %v8635_v29 = vld [vmem:[#allocation13 + $0xe8] ss:$16 sps:$4 sm:$0xff]  }
 0x89f   :  { %2823 = vmatprep.subr.bf16.mxu0 %v8551_v30  ;;  %2788 = vmatprep.subr.bf16.mxu1 %v8554_v32  ;;  %v8640_v30 = vld [vmem:[#allocation16 + $0x4] ss:$16 sps:$4 sm:$0xff]   ;;  %v8643_v32 = vld [vmem:[#allocation16 + $0xc] ss:$16 sps:$4 sm:$0xff]  }
 0x8a2   :  { %2824 = vmatpush1.bf16.msra.mxu0 %v8549_v45  ;;  %2789 = vmatpush1.bf16.msra.mxu1 %v8552_v44 }
 0x8a3   :  { %2825 = vmatprep.subr.bf16.mxu0 %v8557_v47  ;;  %2790 = vmatprep.subr.bf16.mxu1 %v8560_v49  ;;  %v10881_v47 = vld [vmem:[#allocation45_spill] sm:$0xff] }
 0x8a6   :  { %2826 = vmatpush1.bf16.msra.mxu0 %v8555_v48  ;;  %2791 = vmatpush1.bf16.msra.mxu1 %v8558_v46  ;;  %v10882_v48 = vld [vmem:[#allocation46_spill] sm:$0xff] }
 0x8a7   :  { %2827 = vmatprep.subr.bf16.mxu0 %v8563_v50  ;;  %2792 = vmatprep.subr.bf16.mxu1 %v8566_v51 }
 0x8aa   :  { %2828 = vmatpush1.bf16.msra.mxu0 %v8561_v52  ;;  %2793 = vmatpush1.bf16.msra.mxu1 %v8564_v34  ;;  %v10883_v52 = vld [vmem:[#allocation47_spill] sm:$0xff] }
 0x8ab   :  { %2829 = vmatprep.subr.bf16.mxu0 %v8569_v37  ;;  %2794 = vmatprep.subr.bf16.mxu1 %v8572_v40  ;;  %v10884_v37 = vld [vmem:[#allocation48_spill] sm:$0xff] }
 0x8ae   :  { %2830 = vmatpush1.bf16.msra.mxu0 %v8567_v54  ;;  %2795 = vmatpush1.bf16.msra.mxu1 %v8570_v58 }
 0x8af   :  { %2831 = vmatprep.subr.bf16.mxu0 %v8575_v4  ;;  %2796 = vmatprep.subr.bf16.mxu1 %v8578_v6 }
 0x8b2   :  { %2832 = vmatpush1.bf16.msra.mxu0 %v8573_v43  ;;  %2797 = vmatpush1.bf16.msra.mxu1 %v8576_v33 }
 0x8b3   :  { %2833 = vmatprep.subr.bf16.mxu0 %v8581_v27  ;;  %2798 = vmatprep.subr.bf16.mxu1 %v8584_v25 }
 0x8b6   :  { %2834 = vmatpush1.bf16.msra.mxu0 %v8579_v21  ;;  %2799 = vmatpush1.bf16.msra.mxu1 %v8582_v23 }
 0x8b7   :  { %2835 = vmatprep.subr.bf16.mxu0 %v2686_v9  ;;  %2800 = vmatprep.subr.bf16.mxu1 %v8589_v35 }
 0x8ba   :  { %2836 = vmatpush1.bf16.msra.mxu0 %v2683_v15  ;;  %2801 = vmatpush1.bf16.msra.mxu1 %v8587_v41 }
 0x8bb   :  { %3012 = vmatprep.subr.bf16.mxu0 %v8592_v17  ;;  %3053 = vmatprep.subr.bf16.mxu1 %v8595_v12 }
 0x8bd   :  { %2844 = vmatmul.mubr.bf16.vlgmr.msra.gmra.mrb[52].mxu0 %v10701_v5  ;;  %2803 = vmatmul.mubr.bf16.vlgmr.msra.gmra.mrb[52].mxu1 %v10707_v62  ;;  %v8610_v5 = vld [vmem:[#allocation13 + $0x64] ss:$16 sps:$4 sm:$0xff]   ;;  %v8613_v62 = vld [vmem:[#allocation13 + $0x6c] ss:$16 sps:$4 sm:$0xff]  }
 0x8be   :  { %3013 = vmatpush1.bf16.msra.mxu0 %v8590_v1  ;;  %3054 = vmatpush1.bf16.msra.mxu1 %v8593_v36 }
 0x8bf   :  { %3014 = vmatprep.subr.bf16.mxu0 %v8598_v38  ;;  %3055 = vmatprep.subr.bf16.mxu1 %v8601_v61  ;;  %v8638_v61 = vld [vmem:[#allocation16] ss:$16 sps:$4 sm:$0xff]  }
 0x8c0   :  { %3044 = vmatprep.mubr.bf16.mxu0 %v10869_v19  ;;  %3085 = vmatprep.mubr.bf16.mxu1 %v10869_v19  ;;  %v8617_v19 = vld [vmem:[#allocation13 + $0x88] ss:$16 sps:$4 sm:$0xff]  }
 0x8c2   :  { %3015 = vmatpush1.bf16.msra.mxu0 %v8596_v56  ;;  %3056 = vmatpush1.bf16.msra.mxu1 %v8599_v2  ;;  %v8641_v56 = vld [vmem:[#allocation16 + $0x8] ss:$16 sps:$4 sm:$0xff]  }
 0x8c3   :  { %3016 = vmatprep.subr.bf16.mxu0 %v8604_v28  ;;  %3057 = vmatprep.subr.bf16.mxu1 %v8607_v39  ;;  %v8646_v28 = vld [vmem:[#allocation16 + $0x24] ss:$16 sps:$4 sm:$0xff]   ;;  %v8649_v39 = vld [vmem:[#allocation16 + $0x2c] ss:$16 sps:$4 sm:$0xff]  }
 0x8c6   :  { %3017 = vmatpush1.bf16.msra.mxu0 %v8602_v31  ;;  %3058 = vmatpush1.bf16.msra.mxu1 %v8605_v53  ;;  %v8644_v31 = vld [vmem:[#allocation16 + $0x20] ss:$16 sps:$4 sm:$0xff]   ;;  %v8647_v53 = vld [vmem:[#allocation16 + $0x28] ss:$16 sps:$4 sm:$0xff]  }
 0x8c7   :  { %3018 = vmatprep.subr.bf16.mxu0 %v8610_v5  ;;  %3059 = vmatprep.subr.bf16.mxu1 %v8613_v62  ;;  %v8655_v5 = vld [vmem:[#allocation16 + $0x4c] ss:$16 sps:$4 sm:$0xff]  }
 0x8ca   :  { %3019 = vmatpush1.bf16.msra.mxu0 %v8608_v55  ;;  %3060 = vmatpush1.bf16.msra.mxu1 %v8611_v57  ;;  %v8650_v57 = vld [vmem:[#allocation16 + $0x40] ss:$16 sps:$4 sm:$0xff]  }
 0x8cb   :  { %3020 = vmatprep.subr.bf16.mxu0 %v8616_v0  ;;  %3061 = vmatprep.subr.bf16.mxu1 %v8619_v3  ;;  %v8653_v0 = vld [vmem:[#allocation16 + $0x48] ss:$16 sps:$4 sm:$0xff]  }
 0x8ce   :  { %3021 = vmatpush1.bf16.msra.mxu0 %v8614_v59  ;;  %3062 = vmatpush1.bf16.msra.mxu1 %v8617_v19  ;;  %v8658_v59 = vld [vmem:[#allocation16 + $0x64] ss:$16 sps:$4 sm:$0xff]   ;;  %v8661_v19 = vld [vmem:[#allocation16 + $0x6c] ss:$16 sps:$4 sm:$0xff]  }
 0x8cf   :  { %3022 = vmatprep.subr.bf16.mxu0 %v8622_v60  ;;  %3063 = vmatprep.subr.bf16.mxu1 %v8625_v10  ;;  %v8656_v10 = vld [vmem:[#allocation16 + $0x60] ss:$16 sps:$4 sm:$0xff]  }
 0x8d2   :  { %3023 = vmatpush1.bf16.msra.mxu0 %v8620_v13  ;;  %3064 = vmatpush1.bf16.msra.mxu1 %v8623_v14  ;;  %v8659_v13 = vld [vmem:[#allocation16 + $0x68] ss:$16 sps:$4 sm:$0xff]   ;;  %v8664_v14 = vld [vmem:[#allocation16 + $0x84] ss:$16 sps:$4 sm:$0xff]  }
 0x8d3   :  { %3024 = vmatprep.subr.bf16.mxu0 %v8628_v16  ;;  %3065 = vmatprep.subr.bf16.mxu1 %v8631_v18  ;;  %v8667_v16 = vld [vmem:[#allocation16 + $0x8c] ss:$16 sps:$4 sm:$0xff]   ;;  %v8662_v18 = vld [vmem:[#allocation16 + $0x80] ss:$16 sps:$4 sm:$0xff]  }
 0x8d6   :  { %3025 = vmatpush1.bf16.msra.mxu0 %v8626_v20  ;;  %3066 = vmatpush1.bf16.msra.mxu1 %v8629_v11  ;;  %v8665_v20 = vld [vmem:[#allocation16 + $0x88] ss:$16 sps:$4 sm:$0xff]   ;;  %v8670_v11 = vld [vmem:[#allocation16 + $0xa4] ss:$16 sps:$4 sm:$0xff]  }
 0x8d7   :  { %3026 = vmatprep.subr.bf16.mxu0 %v8634_v22  ;;  %3067 = vmatprep.subr.bf16.mxu1 %v8637_v24  ;;  %v8673_v22 = vld [vmem:[#allocation16 + $0xac] ss:$16 sps:$4 sm:$0xff]  }
 0x8da   :  { %3027 = vmatpush1.bf16.msra.mxu0 %v8632_v26  ;;  %3068 = vmatpush1.bf16.msra.mxu1 %v8635_v29 }
 0x8db   :  { %3918 = vmatprep.subr.bf16.mxu0 %v8640_v30  ;;  %4000 = vmatprep.subr.bf16.mxu1 %v8643_v32 }
 0x91c   :  { %v1856_v45 = vpop.f32.mrb[44].mxu0  ;;  %v1897_v44 = vpop.f32.mrb[44].mxu1 }
 0x91d   :  { %v1904_v49 = vadd.f32 %v1856_v45, %v10881_v47  ;;  %v1906_v46 = vadd.f32 %v1897_v44, %v10882_v48  ;;  %v1858_v50 = vpop.f32.mrb[45].mxu0  ;;  %v1899_v51 = vpop.f32.mrb[45].mxu1  ;;  %v8668_v45 = vld [vmem:[#allocation16 + $0xa0] ss:$16 sps:$4 sm:$0xff]   ;;  %v8671_v44 = vld [vmem:[#allocation16 + $0xa8] ss:$16 sps:$4 sm:$0xff]  }
 0x91e   :  { %v1905_v34 = vadd.f32 %v1858_v50, %v10883_v52  ;;  %v1907_v40 = vadd.f32 %v1899_v51, %v10884_v37  ;;  %v1860_v54 = vpop.f32.mrb[46].mxu0  ;;  %v1901_v58 = vpop.f32.mrb[46].mxu1  ;;  %v8679_v48 = vld [vmem:[#allocation16 + $0xcc] ss:$16 sps:$4 sm:$0xff]   ;;  %v8677_v50 = vld [vmem:[#allocation16 + $0xc8] ss:$16 sps:$4 sm:$0xff]  }
 0x91f   :  { %v7461_v4 = vmul.f32 -1.442695, %v1904_v49  ;;  %v1861_v6 = vpop.f32.mrb[47].mxu0  ;;  %v1902_v8 = vpop.f32.mrb[47].mxu1  ;;  %v8676_v49 = vld [vmem:[#allocation16 + $0xc4] ss:$16 sps:$4 sm:$0xff]  }
 0x920   :  { %v7462_v43 = vmul.f32 -1.442695, %v1905_v34  ;;  %v7463_v33 = vmul.f32 -1.442695, %v1907_v40  ;;  %v8682_v51 = vld [vmem:[#allocation16 + $0xe4] ss:$16 sps:$4 sm:$0xff]  }
 0x921   :  { %9550 = vpow2.f32 %v7461_v4  ;;  %v8685_v52 = vld [vmem:[#allocation16 + $0xec] ss:$16 sps:$4 sm:$0xff]   ;;  %v8680_v34 = vld [vmem:[#allocation16 + $0xe0] ss:$16 sps:$4 sm:$0xff]   ;;  %v8683_v37 = vld [vmem:[#allocation16 + $0xe8] ss:$16 sps:$4 sm:$0xff]  }
 0x922   :  { %9552 = vpow2.f32 %v7462_v43  ;;  %v8688_v40 = vld [vmem:[#allocation16 + $0x104] ss:$16 sps:$4 sm:$0xff]   ;;  %v8691_v54 = vld [vmem:[#allocation16 + $0x10c] ss:$16 sps:$4 sm:$0xff]   ;;  %v8686_v58 = vld [vmem:[#allocation16 + $0x100] ss:$16 sps:$4 sm:$0xff]  }
 0x923   :  { %9554 = vpow2.f32 %v7463_v33  ;;  %v8689_v4 = vld [vmem:[#allocation16 + $0x108] ss:$16 sps:$4 sm:$0xff]   ;;  %v8694_v6 = vld [vmem:[#allocation16 + $0x124] ss:$16 sps:$4 sm:$0xff]   ;;  %v8697_v8 = vld [vmem:[#allocation16 + $0x12c] ss:$16 sps:$4 sm:$0xff]  }
 0x924   :  { %9556 = vtanh.f32 %v1906_v46  ;;  %v8674_v46 = vld [vmem:[#allocation16 + $0xc0] ss:$16 sps:$4 sm:$0xff]   ;;  %v8695_v33 = vld [vmem:[#allocation16 + $0x128] ss:$16 sps:$4 sm:$0xff]  }
 0x925   :  { %v8692_v43 = vld [vmem:[#allocation16 + $0x120] ss:$16 sps:$4 sm:$0xff]  }
 0x92b   :  { %v9551_v27 = vpop.eup %9550 }
 0x92c   :  { %v9553_v25 = vpop.eup %9552  ;;  %v1911_v63 = vadd.f32 1.0, %v9551_v27  ;;  %v8700_v27 = vld [vmem:[#allocation16 + $0x144] ss:$16 sps:$4 sm:$0xff]  }
 0x92d   :  { %v1917_v21 = vadd.f32 1.0, %v9553_v25  ;;  %v9555_v23 = vpop.eup %9554  ;;  %v8703_v25 = vld [vmem:[#allocation16 + $0x14c] ss:$16 sps:$4 sm:$0xff]  }
 0x92e   :  { %9558 = vrcp.f32 %v1911_v63  ;;  %v9557_v7 = vpop.eup %9556  ;;  %v1924_v15 = vadd.f32 1.0, %v9555_v23  ;;  %v8698_v63 = vld [vmem:[#allocation16 + $0x140] ss:$16 sps:$4 sm:$0xff]   ;;  %v8706_v23 = vld [vmem:[#allocation16 + $0x164] ss:$16 sps:$4 sm:$0xff]  }
 0x92f   :  { %9560 = vrcp.f32 %v1917_v21  ;;  %v8701_v21 = vld [vmem:[#allocation16 + $0x148] ss:$16 sps:$4 sm:$0xff]  }
 0x930   :  { %9562 = vrcp.f32 %v1924_v15  ;;  %v8715_v15 = vld [vmem:[#allocation16 + $0x18c] ss:$16 sps:$4 sm:$0xff]  }
 0x938   :  { %v9559_v9 = vpop.eup %9558 }
 0x939   :  { %v9561_v35 = vpop.eup %9560  ;;  %v1929_v41 = vmul.f32 %v9559_v9, %v9557_v7  ;;  %v8709_v7 = vld [vmem:[#allocation16 + $0x16c] ss:$16 sps:$4 sm:$0xff]   ;;  %v8704_v9 = vld [vmem:[#allocation16 + $0x160] ss:$16 sps:$4 sm:$0xff]  }
 0x93a   :  { %v1928_v17 = vmul.f32 %v9561_v35, %v10676_v42  ;;  %v9563_v1 = vpop.eup %9562  ;;  %v8652_v42 = vld [vmem:[#allocation16 + $0x44] ss:$16 sps:$4 sm:$0xff]   ;;  %v8707_v35 = vld [vmem:[#allocation16 + $0x168] ss:$16 sps:$4 sm:$0xff]  }
 0x93c   :  { %v1930_v12 = vadd.f32 %v1929_v41, %v1928_v17  ;;  %v8712_v41 = vld [vmem:[#allocation16 + $0x184] ss:$16 sps:$4 sm:$0xff]   ;;  %v8710_v17 = vld [vmem:[#allocation16 + $0x180] ss:$16 sps:$4 sm:$0xff]  }
 0x93e   :  { %9564 = vtanh.f32 %v1930_v12  ;;  %v8713_v12 = vld [vmem:[#allocation16 + $0x188] ss:$16 sps:$4 sm:$0xff]  }
 0x948   :  { %v9565_v36 = vpop.eup %9564 }
 0x949   :  { %v1933_v38 = vmul.f32 %v9565_v36, %v9563_v1  ;;  %v8718_v1 = vld [vmem:[#allocation16 + $0x1a4] ss:$16 sps:$4 sm:$0xff]   ;;  %v8721_v36 = vld [vmem:[#allocation16 + $0x1ac] ss:$16 sps:$4 sm:$0xff]  }
 0x94b   :  { %v1936_v2 = vpack.c.bf16 %v1933_v38, %v1933_v38  ;;  %v8716_v38 = vld [vmem:[#allocation16 + $0x1a0] ss:$16 sps:$4 sm:$0xff]  }
 0x94d   :  { %3045 = vmatmul.mubr.bf16.vlgmr.msra.gmra.mrb[56].mxu0 %v1936_v2  ;;  %3086 = vmatmul.mubr.bf16.vlgmr.msra.gmra.mrb[56].mxu1 %v1936_v2 }
 0x94e   :  { %3919 = vmatpush1.bf16.msra.mxu0 %v8638_v61  ;;  %4001 = vmatpush1.bf16.msra.mxu1 %v8641_v56  ;;  %v8719_v61 = vld [vmem:[#allocation16 + $0x1a8] ss:$16 sps:$4 sm:$0xff]  }
 0x94f   :  { %3920 = vmatprep.subr.bf16.mxu0 %v8646_v28  ;;  %4002 = vmatprep.subr.bf16.mxu1 %v8649_v39 }
 0x950   :  { %v2763_v62 = vpop.f32.mrb[48].mxu1 }
 0x951   :  { %v2765_v55 = vpop.f32.mrb[49].mxu1 }
 0x952   :  { %3921 = vmatpush1.bf16.msra.mxu0 %v8644_v31  ;;  %4003 = vmatpush1.bf16.msra.mxu1 %v8647_v53  ;;  %v2767_v3 = vpop.f32.mrb[50].mxu1 }
 0x953   :  { %3922 = vmatprep.subr.bf16.mxu0 %v8652_v42  ;;  %4004 = vmatprep.subr.bf16.mxu1 %v8655_v5  ;;  %v2768_v60 = vpop.f32.mrb[51].mxu1  ;;  %v8722_v3 = vld [vmem:[#allocation16 + $0x1c0] ss:$16 sps:$4 sm:$0xff]  }
 0x954   :  { %v8733_v60 = vld [vmem:[#allocation16 + $0x1ec] ss:$16 sps:$4 sm:$0xff]  }
 0x956   :  { %3923 = vmatpush1.bf16.msra.mxu0 %v8650_v57  ;;  %4005 = vmatpush1.bf16.msra.mxu1 %v8653_v0  ;;  %v8724_v57 = vld [vmem:[#allocation16 + $0x1c4] ss:$16 sps:$4 sm:$0xff]   ;;  %v8727_v0 = vld [vmem:[#allocation16 + $0x1cc] ss:$16 sps:$4 sm:$0xff]  }
 0x957   :  { %3924 = vmatprep.subr.bf16.mxu0 %v8658_v59  ;;  %4006 = vmatprep.subr.bf16.mxu1 %v8661_v19  ;;  %v8725_v59 = vld [vmem:[#allocation16 + $0x1c8] ss:$16 sps:$4 sm:$0xff]   ;;  %v8730_v19 = vld [vmem:[#allocation16 + $0x1e4] ss:$16 sps:$4 sm:$0xff]  }
 0x95a   :  { %3925 = vmatpush1.bf16.msra.mxu0 %v8656_v10  ;;  %4007 = vmatpush1.bf16.msra.mxu1 %v8659_v13  ;;  %v8728_v10 = vld [vmem:[#allocation16 + $0x1e0] ss:$16 sps:$4 sm:$0xff]   ;;  %v8731_v13 = vld [vmem:[#allocation16 + $0x1e8] ss:$16 sps:$4 sm:$0xff]  }
 0x95b   :  { %3926 = vmatprep.subr.bf16.mxu0 %v8664_v14  ;;  %4008 = vmatprep.subr.bf16.mxu1 %v8667_v16  ;;  %v8736_v14 = vld [vmem:[#allocation16 + $0x204] ss:$16 sps:$4 sm:$0xff]   ;;  %v8739_v16 = vld [vmem:[#allocation16 + $0x20c] ss:$16 sps:$4 sm:$0xff]  }
 0x95c   :  { %v2722_v24 = vpop.f32.mrb[48].mxu0 }
 0x95d   :  { %v2724_v26 = vpop.f32.mrb[49].mxu0  ;;  %v10723_v29 = vadd.f32 %v2763_v62, %v2722_v24 }
 0x95e   :  { %v2726_v30 = vpop.f32.mrb[50].mxu0  ;;  %v10725_v32 = vadd.f32 %v2765_v55, %v2724_v26  ;;  %3927 = vmatpush1.bf16.msra.mxu0 %v8662_v18  ;;  %4009 = vmatpush1.bf16.msra.mxu1 %v8665_v20  ;;  %v3094_v18 = vld [vmem:[%s10816_s7] sm:$0xf]  ;;  %v10885_v20 = vld [vmem:[#allocation33_spill] sm:$0xff] }
 0x95f   :  { %v2727_v47 = vpop.f32.mrb[51].mxu0  ;;  %3928 = vmatprep.subr.bf16.mxu0 %v8670_v11  ;;  %4010 = vmatprep.subr.bf16.mxu1 %v8673_v22  ;;  %v3099_v11 = vrot.slane %v3094_v18, %v10885_v20  ;;  %v10886_v22 = vld [vmem:[#allocation31_spill] sm:$0xff] }
 0x960   :  { %v3107_v24 = vrot.slane %v3094_v18, %v10886_v22  ;;  %v10888_v47 = vld [vmem:[#allocation32_spill] sm:$0xff] }
 0x962   :  { %3929 = vmatpush1.bf16.msra.mxu0 %v8668_v45  ;;  %4011 = vmatpush1.bf16.msra.mxu1 %v8671_v44  ;;  %v10887_v45 = vld [vmem:[#allocation34_spill] sm:$0xff] }
 0x963   :  { %3930 = vmatprep.subr.bf16.mxu0 %v8676_v49  ;;  %4012 = vmatprep.subr.bf16.mxu1 %v8679_v48  ;;  %v3103_v44 = vrot.slane %v3094_v18, %v10887_v45  ;;  %v3111_v49 = vrot.slane %v3094_v18, %v10888_v47  ;;  %v8785_v18 = vld [vmem:[#allocation16 + $0x308] ss:$16 sps:$4 sm:$0xff]  }
 0x966   :  { %3931 = vmatpush1.bf16.msra.mxu0 %v8674_v46  ;;  %4013 = vmatpush1.bf16.msra.mxu1 %v8677_v50 }
 0x967   :  { %3932 = vmatprep.subr.bf16.mxu0 %v8682_v51  ;;  %4014 = vmatprep.subr.bf16.mxu1 %v8685_v52 }
 0x96a   :  { %3933 = vmatpush1.bf16.msra.mxu0 %v8680_v34  ;;  %4015 = vmatpush1.bf16.msra.mxu1 %v8683_v37 }
 0x96b   :  { %3934 = vmatprep.subr.bf16.mxu0 %v8688_v40  ;;  %4016 = vmatprep.subr.bf16.mxu1 %v8691_v54 }
 0x96e   :  { %3935 = vmatpush1.bf16.msra.mxu0 %v8686_v58  ;;  %4017 = vmatpush1.bf16.msra.mxu1 %v8689_v4 }
 0x96f   :  { %3936 = vmatprep.subr.bf16.mxu0 %v8694_v6  ;;  %4018 = vmatprep.subr.bf16.mxu1 %v8697_v8 }
 0x972   :  { %3937 = vmatpush1.bf16.msra.mxu0 %v8692_v43  ;;  %4019 = vmatpush1.bf16.msra.mxu1 %v8695_v33 }
 0x973   :  { %3938 = vmatprep.subr.bf16.mxu0 %v8700_v27  ;;  %4020 = vmatprep.subr.bf16.mxu1 %v8703_v25 }
 0x976   :  { %3939 = vmatpush1.bf16.msra.mxu0 %v8698_v63  ;;  %4021 = vmatpush1.bf16.msra.mxu1 %v8701_v21  ;;  %v8737_v21 = vld [vmem:[#allocation16 + $0x208] ss:$16 sps:$4 sm:$0xff]  }
 0x977   :  { %3940 = vmatprep.subr.bf16.mxu0 %v8706_v23  ;;  %4022 = vmatprep.subr.bf16.mxu1 %v8709_v7  ;;  %v8745_v7 = vld [vmem:[#allocation16 + $0x22c] ss:$16 sps:$4 sm:$0xff]  }
 0x97a   :  { %3941 = vmatpush1.bf16.msra.mxu0 %v8704_v9  ;;  %4023 = vmatpush1.bf16.msra.mxu1 %v8707_v35  ;;  %v8740_v35 = vld [vmem:[#allocation16 + $0x220] ss:$16 sps:$4 sm:$0xff]  }
 0x97b   :  { %3942 = vmatprep.subr.bf16.mxu0 %v8712_v41  ;;  %4024 = vmatprep.subr.bf16.mxu1 %v8715_v15  ;;  %v8743_v41 = vld [vmem:[#allocation16 + $0x228] ss:$16 sps:$4 sm:$0xff]   ;;  %v8748_v15 = vld [vmem:[#allocation16 + $0x244] ss:$16 sps:$4 sm:$0xff]  }
 0x97e   :  { %3943 = vmatpush1.bf16.msra.mxu0 %v8710_v17  ;;  %4025 = vmatpush1.bf16.msra.mxu1 %v8713_v12  ;;  %v8751_v17 = vld [vmem:[#allocation16 + $0x24c] ss:$16 sps:$4 sm:$0xff]   ;;  %v8746_v12 = vld [vmem:[#allocation16 + $0x240] ss:$16 sps:$4 sm:$0xff]  }
 0x97f   :  { %3944 = vmatprep.subr.bf16.mxu0 %v8718_v1  ;;  %4026 = vmatprep.subr.bf16.mxu1 %v8721_v36  ;;  %v8749_v1 = vld [vmem:[#allocation16 + $0x248] ss:$16 sps:$4 sm:$0xff]   ;;  %v8754_v36 = vld [vmem:[#allocation16 + $0x264] ss:$16 sps:$4 sm:$0xff]  }
 0x982   :  { %3945 = vmatpush1.bf16.msra.mxu0 %v8716_v38  ;;  %4027 = vmatpush1.bf16.msra.mxu1 %v8719_v61  ;;  %v8757_v38 = vld [vmem:[#allocation16 + $0x26c] ss:$16 sps:$4 sm:$0xff]   ;;  %v8752_v61 = vld [vmem:[#allocation16 + $0x260] ss:$16 sps:$4 sm:$0xff]  }
 0x983   :  { %3946 = vmatprep.subr.bf16.mxu0 %v8724_v57  ;;  %4028 = vmatprep.subr.bf16.mxu1 %v8727_v0  ;;  %v8775_v57 = vld [vmem:[#allocation16 + $0x2cc] ss:$16 sps:$4 sm:$0xff]   ;;  %v8770_v0 = vld [vmem:[#allocation16 + $0x2c0] ss:$16 sps:$4 sm:$0xff]  }
 0x986   :  { %3947 = vmatpush1.bf16.msra.mxu0 %v8722_v3  ;;  %4029 = vmatpush1.bf16.msra.mxu1 %v8725_v59  ;;  %v8773_v3 = vld [vmem:[#allocation16 + $0x2c8] ss:$16 sps:$4 sm:$0xff]   ;;  %v8778_v59 = vld [vmem:[#allocation16 + $0x2e4] ss:$16 sps:$4 sm:$0xff]  }
 0x987   :  { %3948 = vmatprep.subr.bf16.mxu0 %v8730_v19  ;;  %4030 = vmatprep.subr.bf16.mxu1 %v8733_v60  ;;  %v8781_v19 = vld [vmem:[#allocation16 + $0x2ec] ss:$16 sps:$4 sm:$0xff]   ;;  %v8776_v60 = vld [vmem:[#allocation16 + $0x2e0] ss:$16 sps:$4 sm:$0xff]  }
 0x98a   :  { %3949 = vmatpush1.bf16.msra.mxu0 %v8728_v10  ;;  %4031 = vmatpush1.bf16.msra.mxu1 %v8731_v13  ;;  %v8779_v10 = vld [vmem:[#allocation16 + $0x2e8] ss:$16 sps:$4 sm:$0xff]   ;;  %v8784_v13 = vld [vmem:[#allocation16 + $0x304] ss:$16 sps:$4 sm:$0xff]  }
 0x98b   :  { %3959 = vmatprep.subr.bf16.mxu0 %v8736_v14  ;;  %4041 = vmatprep.subr.bf16.mxu1 %v8739_v16  ;;  %v8787_v14 = vld [vmem:[#allocation16 + $0x30c] ss:$16 sps:$4 sm:$0xff]   ;;  %v8782_v16 = vld [vmem:[#allocation16 + $0x300] ss:$16 sps:$4 sm:$0xff]  }
 0x990   :  { %v2845_v56 = vpop.f32.mrb[52].mxu0  ;;  %v2804_v2 = vpop.f32.mrb[52].mxu1 }
 0x991   :  { %v2847_v28 = vpop.f32.mrb[53].mxu0  ;;  %v2846_v39 = vadd.f32 %v2845_v56, %v2804_v2  ;;  %v2806_v31 = vpop.f32.mrb[53].mxu1  ;;  %v8755_v56 = vld [vmem:[#allocation16 + $0x268] ss:$16 sps:$4 sm:$0xff]   ;;  %v8760_v2 = vld [vmem:[#allocation16 + $0x284] ss:$16 sps:$4 sm:$0xff]  }
 0x992   :  { %v2849_v53 = vpop.f32.mrb[54].mxu0  ;;  %v2848_v42 = vadd.f32 %v2847_v28, %v2806_v31  ;;  %v2808_v5 = vpop.f32.mrb[54].mxu1  ;;  %v8763_v28 = vld [vmem:[#allocation16 + $0x28c] ss:$16 sps:$4 sm:$0xff]   ;;  %v8761_v31 = vld [vmem:[#allocation16 + $0x288] ss:$16 sps:$4 sm:$0xff]  }
 0x993   :  { %v2850_v62 = vpop.f32.mrb[55].mxu0  ;;  %v2809_v55 = vpop.f32.mrb[55].mxu1  ;;  %v8766_v53 = vld [vmem:[#allocation16 + $0x2a4] ss:$16 sps:$4 sm:$0xff]   ;;  %v8764_v5 = vld [vmem:[#allocation16 + $0x2a0] ss:$16 sps:$4 sm:$0xff]  }
 0x994   :  { %v8767_v62 = vld [vmem:[#allocation16 + $0x2a8] ss:$16 sps:$4 sm:$0xff]   ;;  %v8772_v55 = vld [vmem:[#allocation16 + $0x2c4] ss:$16 sps:$4 sm:$0xff]  }
 0xa20   :  { %v3046_v26 = vpop.f32.mrb[56].mxu0  ;;  %v3087_v30 = vpop.f32.mrb[56].mxu1 }
 0xa21   :  { %v3047_v48 = vadd.f32 %v3046_v26, %v10723_v29  ;;  %v3088_v46 = vadd.f32 %v3087_v30, %v2846_v39  ;;  %v3048_v50 = vpop.f32.mrb[57].mxu0  ;;  %v3089_v51 = vpop.f32.mrb[57].mxu1  ;;  %v8734_v29 = vld [vmem:[#allocation16 + $0x200] ss:$16 sps:$4 sm:$0xff]   ;;  %v8791_v30 = vld [vmem:[#allocation16 + $0x328] ss:$16 sps:$4 sm:$0xff]  }
 0xa22   :  { %v3049_v52 = vadd.f32 %v3048_v50, %v10725_v32  ;;  %v3090_v34 = vadd.f32 %v3089_v51, %v2848_v42  ;;  %v3050_v37 = vpop.f32.mrb[58].mxu0  ;;  %v3091_v40 = vpop.f32.mrb[58].mxu1  ;;  %v8742_v32 = vld [vmem:[#allocation16 + $0x224] ss:$16 sps:$4 sm:$0xff]   ;;  %v8758_v39 = vld [vmem:[#allocation16 + $0x280] ss:$16 sps:$4 sm:$0xff]  }
 0xa23   :  { %v3116_v54 = vadd.f32 %v3099_v11, %v3047_v48  ;;  %v10736_v58 = vadd.f32 %v3107_v24, %v3088_v46  ;;  %v3051_v4 = vpop.f32.mrb[59].mxu0  ;;  %v3092_v6 = vpop.f32.mrb[59].mxu1  ;;  %v8769_v42 = vld [vmem:[#allocation16 + $0x2ac] ss:$16 sps:$4 sm:$0xff]   ;;  %v8790_v11 = vld [vmem:[#allocation16 + $0x324] ss:$16 sps:$4 sm:$0xff]  }
 0xa24   :  { %v3117_v8 = vadd.f32 %v3103_v44, %v3049_v52  ;;  %v3119_v43 = vadd.f32 %v3111_v49, %v3090_v34  ;;  %v8793_v24 = vld [vmem:[#allocation16 + $0x32c] ss:$16 sps:$4 sm:$0xff]   ;;  %v8788_v26 = vld [vmem:[#allocation16 + $0x320] ss:$16 sps:$4 sm:$0xff]   ;;  %v8796_v44 = vld [vmem:[#allocation16 + $0x344] ss:$16 sps:$4 sm:$0xff]  }
 0xa25   :  { %v3120_v33 = vmax.f32 %v3116_v54, 0.0  ;;  %v8799_v49 = vld [vmem:[#allocation16 + $0x34c] ss:$16 sps:$4 sm:$0xff]   ;;  %v8794_v48 = vld [vmem:[#allocation16 + $0x340] ss:$16 sps:$4 sm:$0xff]  }
 0xa26   :  { %v3121_v27 = vmax.f32 %v3117_v8, 0.0  ;;  %v3123_v25 = vmax.f32 %v3119_v43, 0.0  ;;  %v8797_v46 = vld [vmem:[#allocation16 + $0x348] ss:$16 sps:$4 sm:$0xff]   ;;  %v8802_v50 = vld [vmem:[#allocation16 + $0x364] ss:$16 sps:$4 sm:$0xff]  }
 0xa27   :  { %v3124_v23 = vpack.c.bf16 %v3120_v33, %v3120_v33  ;;  %v8805_v51 = vld [vmem:[#allocation16 + $0x36c] ss:$16 sps:$4 sm:$0xff]   ;;  %v8800_v52 = vld [vmem:[#allocation16 + $0x360] ss:$16 sps:$4 sm:$0xff]   ;;  %v8803_v34 = vld [vmem:[#allocation16 + $0x368] ss:$16 sps:$4 sm:$0xff]  }
 0xa28   :  { %v3125_v63 = vpack.c.bf16 %v3121_v27, %v3121_v27  ;;  %v3127_v9 = vpack.c.bf16 %v3123_v25, %v3123_v25  ;;  %v8808_v37 = vld [vmem:[#allocation16 + $0x384] ss:$16 sps:$4 sm:$0xff]   ;;  %v8811_v40 = vld [vmem:[#allocation16 + $0x38c] ss:$16 sps:$4 sm:$0xff]   ;;  %v8806_v54 = vld [vmem:[#allocation16 + $0x380] ss:$16 sps:$4 sm:$0xff]  }
 0xa29   :  { %v8809_v4 = vld [vmem:[#allocation16 + $0x388] ss:$16 sps:$4 sm:$0xff]   ;;  %v8814_v6 = vld [vmem:[#allocation16 + $0x3a4] ss:$16 sps:$4 sm:$0xff]   ;;  %v8817_v8 = vld [vmem:[#allocation16 + $0x3ac] ss:$16 sps:$4 sm:$0xff]  }
 0xa2a   :  { %3950 = vmatprep.mubr.bf16.mxu0 %v3125_v63  ;;  %4032 = vmatprep.mubr.bf16.mxu1 %v3125_v63  ;;  %v8812_v43 = vld [vmem:[#allocation16 + $0x3a0] ss:$16 sps:$4 sm:$0xff]   ;;  %v8815_v33 = vld [vmem:[#allocation16 + $0x3a8] ss:$16 sps:$4 sm:$0xff]   ;;  %v8820_v27 = vld [vmem:[#allocation16 + $0x3c4] ss:$16 sps:$4 sm:$0xff]  }
 0xa2b   :  { %3951 = vmatmul.mubr.bf16.vlgmr.msra.gmra.mrb[60].mxu0 %v3124_v23  ;;  %4033 = vmatmul.mubr.bf16.vlgmr.msra.gmra.mrb[60].mxu1 %v3124_v23  ;;  %v8823_v25 = vld [vmem:[#allocation16 + $0x3cc] ss:$16 sps:$4 sm:$0xff]   ;;  %v8818_v63 = vld [vmem:[#allocation16 + $0x3c0] ss:$16 sps:$4 sm:$0xff]  }
 0xa2c   :  { %3960 = vmatpush1.bf16.msra.mxu0 %v8734_v29  ;;  %4042 = vmatpush1.bf16.msra.mxu1 %v8737_v21  ;;  %v8821_v29 = vld [vmem:[#allocation16 + $0x3c8] ss:$16 sps:$4 sm:$0xff]   ;;  %v8826_v21 = vld [vmem:[#allocation16 + $0x3e4] ss:$16 sps:$4 sm:$0xff]   ;;  %v8829_v23 = vld [vmem:[#allocation16 + $0x3ec] ss:$16 sps:$4 sm:$0xff]  }
 0xa2d   :  { %3991 = vmatprep.mubr.bf16.mxu0 %v3127_v9  ;;  %4073 = vmatprep.mubr.bf16.mxu1 %v3127_v9  ;;  %v3122_v9 = vmax.f32 %v10736_v58, 0.0  ;;  %v8844_v58 = vld [vmem:[#allocation17 + $0x44] ss:$16 sps:$4 sm:$0xff]  }
 0xa2e   :  { %3961 = vmatprep.subr.bf16.mxu0 %v8742_v32  ;;  %4043 = vmatprep.subr.bf16.mxu1 %v8745_v7  ;;  %v8824_v32 = vld [vmem:[#allocation16 + $0x3e0] ss:$16 sps:$4 sm:$0xff]   ;;  %v8827_v7 = vld [vmem:[#allocation16 + $0x3e8] ss:$16 sps:$4 sm:$0xff]  }
 0xa30   :  { %3962 = vmatpush1.bf16.msra.mxu0 %v8740_v35  ;;  %4044 = vmatpush1.bf16.msra.mxu1 %v8743_v41  ;;  %v8832_v35 = vld [vmem:[#allocation17 + $0x4] ss:$16 sps:$4 sm:$0xff]   ;;  %v8835_v41 = vld [vmem:[#allocation17 + $0xc] ss:$16 sps:$4 sm:$0xff]  }
 0xa31   :  { %3963 = vmatprep.subr.bf16.mxu0 %v8748_v15  ;;  %4045 = vmatprep.subr.bf16.mxu1 %v8751_v17  ;;  %v8830_v15 = vld [vmem:[#allocation17] ss:$16 sps:$4 sm:$0xff]   ;;  %v8833_v17 = vld [vmem:[#allocation17 + $0x8] ss:$16 sps:$4 sm:$0xff]  }
 0xa34   :  { %3964 = vmatpush1.bf16.msra.mxu0 %v8746_v12  ;;  %4046 = vmatpush1.bf16.msra.mxu1 %v8749_v1  ;;  %v3126_v12 = vpack.c.bf16 %v3122_v9, %v3122_v9  ;;  %v8838_v1 = vld [vmem:[#allocation17 + $0x24] ss:$16 sps:$4 sm:$0xff]   ;;  %v8914_v9 = vld [vmem:[#allocation17 + $0x1c0] ss:$16 sps:$4 sm:$0xff]  }
 0xa35   :  { %3965 = vmatprep.subr.bf16.mxu0 %v8754_v36  ;;  %4047 = vmatprep.subr.bf16.mxu1 %v8757_v38  ;;  %v8841_v36 = vld [vmem:[#allocation17 + $0x2c] ss:$16 sps:$4 sm:$0xff]   ;;  %v8836_v38 = vld [vmem:[#allocation17 + $0x20] ss:$16 sps:$4 sm:$0xff]  }
 0xa38   :  { %3966 = vmatpush1.bf16.msra.mxu0 %v8752_v61  ;;  %4048 = vmatpush1.bf16.msra.mxu1 %v8755_v56  ;;  %v8839_v61 = vld [vmem:[#allocation17 + $0x28] ss:$16 sps:$4 sm:$0xff]   ;;  %v8847_v56 = vld [vmem:[#allocation17 + $0x4c] ss:$16 sps:$4 sm:$0xff]  }
 0xa39   :  { %3967 = vmatprep.subr.bf16.mxu0 %v8760_v2  ;;  %4049 = vmatprep.subr.bf16.mxu1 %v8763_v28  ;;  %v8842_v2 = vld [vmem:[#allocation17 + $0x40] ss:$16 sps:$4 sm:$0xff]   ;;  %v8845_v28 = vld [vmem:[#allocation17 + $0x48] ss:$16 sps:$4 sm:$0xff]  }
 0xa3c   :  { %3968 = vmatpush1.bf16.msra.mxu0 %v8758_v39  ;;  %4050 = vmatpush1.bf16.msra.mxu1 %v8761_v31  ;;  %v8850_v39 = vld [vmem:[#allocation17 + $0x64] ss:$16 sps:$4 sm:$0xff]   ;;  %v8853_v31 = vld [vmem:[#allocation17 + $0x6c] ss:$16 sps:$4 sm:$0xff]  }
 0xa3d   :  { %3969 = vmatprep.subr.bf16.mxu0 %v8766_v53  ;;  %4051 = vmatprep.subr.bf16.mxu1 %v8769_v42  ;;  %v8848_v53 = vld [vmem:[#allocation17 + $0x60] ss:$16 sps:$4 sm:$0xff]   ;;  %v8851_v42 = vld [vmem:[#allocation17 + $0x68] ss:$16 sps:$4 sm:$0xff]  }
 0xa40   :  { %3970 = vmatpush1.bf16.msra.mxu0 %v8764_v5  ;;  %4052 = vmatpush1.bf16.msra.mxu1 %v8767_v62  ;;  %v8856_v5 = vld [vmem:[#allocation17 + $0x84] ss:$16 sps:$4 sm:$0xff]   ;;  %v8859_v62 = vld [vmem:[#allocation17 + $0x8c] ss:$16 sps:$4 sm:$0xff]  }
 0xa41   :  { %3971 = vmatprep.subr.bf16.mxu0 %v8772_v55  ;;  %4053 = vmatprep.subr.bf16.mxu1 %v8775_v57  ;;  %v8854_v55 = vld [vmem:[#allocation17 + $0x80] ss:$16 sps:$4 sm:$0xff]   ;;  %v8857_v57 = vld [vmem:[#allocation17 + $0x88] ss:$16 sps:$4 sm:$0xff]  }
 0xa44   :  { %3972 = vmatpush1.bf16.msra.mxu0 %v8770_v0  ;;  %4054 = vmatpush1.bf16.msra.mxu1 %v8773_v3  ;;  %v8862_v0 = vld [vmem:[#allocation17 + $0xa4] ss:$16 sps:$4 sm:$0xff]   ;;  %v8865_v3 = vld [vmem:[#allocation17 + $0xac] ss:$16 sps:$4 sm:$0xff]  }
 0xa45   :  { %3973 = vmatprep.subr.bf16.mxu0 %v8778_v59  ;;  %4055 = vmatprep.subr.bf16.mxu1 %v8781_v19  ;;  %v8860_v59 = vld [vmem:[#allocation17 + $0xa0] ss:$16 sps:$4 sm:$0xff]   ;;  %v8863_v19 = vld [vmem:[#allocation17 + $0xa8] ss:$16 sps:$4 sm:$0xff]  }
 0xa48   :  { %3974 = vmatpush1.bf16.msra.mxu0 %v8776_v60  ;;  %4056 = vmatpush1.bf16.msra.mxu1 %v8779_v10  ;;  %v8868_v60 = vld [vmem:[#allocation17 + $0xc4] ss:$16 sps:$4 sm:$0xff]   ;;  %v8871_v10 = vld [vmem:[#allocation17 + $0xcc] ss:$16 sps:$4 sm:$0xff]  }
 0xa49   :  { %3975 = vmatprep.subr.bf16.mxu0 %v8784_v13  ;;  %4057 = vmatprep.subr.bf16.mxu1 %v8787_v14  ;;  %v8866_v13 = vld [vmem:[#allocation17 + $0xc0] ss:$16 sps:$4 sm:$0xff]   ;;  %v8869_v14 = vld [vmem:[#allocation17 + $0xc8] ss:$16 sps:$4 sm:$0xff]  }
 0xa4c   :  { %3976 = vmatpush1.bf16.msra.mxu0 %v8782_v16  ;;  %4058 = vmatpush1.bf16.msra.mxu1 %v8785_v18  ;;  %v8874_v16 = vld [vmem:[#allocation17 + $0xe4] ss:$16 sps:$4 sm:$0xff]   ;;  %v8877_v18 = vld [vmem:[#allocation17 + $0xec] ss:$16 sps:$4 sm:$0xff]  }
 0xa4d   :  { %3977 = vmatprep.subr.bf16.mxu0 %v8790_v11  ;;  %4059 = vmatprep.subr.bf16.mxu1 %v8793_v24  ;;  %v8872_v11 = vld [vmem:[#allocation17 + $0xe0] ss:$16 sps:$4 sm:$0xff]   ;;  %v8875_v24 = vld [vmem:[#allocation17 + $0xe8] ss:$16 sps:$4 sm:$0xff]  }
 0xa50   :  { %3978 = vmatpush1.bf16.msra.mxu0 %v8788_v26  ;;  %4060 = vmatpush1.bf16.msra.mxu1 %v8791_v30  ;;  %v8880_v26 = vld [vmem:[#allocation17 + $0x104] ss:$16 sps:$4 sm:$0xff]   ;;  %v8883_v30 = vld [vmem:[#allocation17 + $0x10c] ss:$16 sps:$4 sm:$0xff]  }
 0xa51   :  { %3979 = vmatprep.subr.bf16.mxu0 %v8796_v44  ;;  %4061 = vmatprep.subr.bf16.mxu1 %v8799_v49  ;;  %v8878_v44 = vld [vmem:[#allocation17 + $0x100] ss:$16 sps:$4 sm:$0xff]   ;;  %v8881_v49 = vld [vmem:[#allocation17 + $0x108] ss:$16 sps:$4 sm:$0xff]  }
 0xa54   :  { %3980 = vmatpush1.bf16.msra.mxu0 %v8794_v48  ;;  %4062 = vmatpush1.bf16.msra.mxu1 %v8797_v46  ;;  %v8886_v48 = vld [vmem:[#allocation17 + $0x124] ss:$16 sps:$4 sm:$0xff]   ;;  %v8889_v46 = vld [vmem:[#allocation17 + $0x12c] ss:$16 sps:$4 sm:$0xff]  }
 0xa55   :  { %3981 = vmatprep.subr.bf16.mxu0 %v8802_v50  ;;  %4063 = vmatprep.subr.bf16.mxu1 %v8805_v51  ;;  %v8884_v50 = vld [vmem:[#allocation17 + $0x120] ss:$16 sps:$4 sm:$0xff]   ;;  %v8887_v51 = vld [vmem:[#allocation17 + $0x128] ss:$16 sps:$4 sm:$0xff]  }
 0xa58   :  { %3982 = vmatpush1.bf16.msra.mxu0 %v8800_v52  ;;  %4064 = vmatpush1.bf16.msra.mxu1 %v8803_v34  ;;  %v8892_v52 = vld [vmem:[#allocation17 + $0x144] ss:$16 sps:$4 sm:$0xff]   ;;  %v8895_v34 = vld [vmem:[#allocation17 + $0x14c] ss:$16 sps:$4 sm:$0xff]  }
 0xa59   :  { %3983 = vmatprep.subr.bf16.mxu0 %v8808_v37  ;;  %4065 = vmatprep.subr.bf16.mxu1 %v8811_v40  ;;  %v8890_v37 = vld [vmem:[#allocation17 + $0x140] ss:$16 sps:$4 sm:$0xff]   ;;  %v8893_v40 = vld [vmem:[#allocation17 + $0x148] ss:$16 sps:$4 sm:$0xff]  }
 0xa5c   :  { %3984 = vmatpush1.bf16.msra.mxu0 %v8806_v54  ;;  %4066 = vmatpush1.bf16.msra.mxu1 %v8809_v4  ;;  %v8898_v54 = vld [vmem:[#allocation17 + $0x164] ss:$16 sps:$4 sm:$0xff]   ;;  %v8901_v4 = vld [vmem:[#allocation17 + $0x16c] ss:$16 sps:$4 sm:$0xff]  }
 0xa5d   :  { %3985 = vmatprep.subr.bf16.mxu0 %v8814_v6  ;;  %4067 = vmatprep.subr.bf16.mxu1 %v8817_v8  ;;  %v8896_v6 = vld [vmem:[#allocation17 + $0x160] ss:$16 sps:$4 sm:$0xff]   ;;  %v8899_v8 = vld [vmem:[#allocation17 + $0x168] ss:$16 sps:$4 sm:$0xff]  }
 0xa60   :  { %3986 = vmatpush1.bf16.msra.mxu0 %v8812_v43  ;;  %4068 = vmatpush1.bf16.msra.mxu1 %v8815_v33  ;;  %v8904_v43 = vld [vmem:[#allocation17 + $0x184] ss:$16 sps:$4 sm:$0xff]   ;;  %v8907_v33 = vld [vmem:[#allocation17 + $0x18c] ss:$16 sps:$4 sm:$0xff]  }
 0xa61   :  { %3987 = vmatprep.subr.bf16.mxu0 %v8820_v27  ;;  %4069 = vmatprep.subr.bf16.mxu1 %v8823_v25  ;;  %v8902_v27 = vld [vmem:[#allocation17 + $0x180] ss:$16 sps:$4 sm:$0xff]   ;;  %v8905_v25 = vld [vmem:[#allocation17 + $0x188] ss:$16 sps:$4 sm:$0xff]  }
 0xa64   :  { %3988 = vmatpush1.bf16.msra.mxu0 %v8818_v63  ;;  %4070 = vmatpush1.bf16.msra.mxu1 %v8821_v29  ;;  %v8910_v63 = vld [vmem:[#allocation17 + $0x1a4] ss:$16 sps:$4 sm:$0xff]   ;;  %v8913_v29 = vld [vmem:[#allocation17 + $0x1ac] ss:$16 sps:$4 sm:$0xff]  }
 0xa65   :  { %3989 = vmatprep.subr.bf16.mxu0 %v8826_v21  ;;  %4071 = vmatprep.subr.bf16.mxu1 %v8829_v23  ;;  %v8908_v21 = vld [vmem:[#allocation17 + $0x1a0] ss:$16 sps:$4 sm:$0xff]   ;;  %v8911_v23 = vld [vmem:[#allocation17 + $0x1a8] ss:$16 sps:$4 sm:$0xff]  }
 0xa68   :  { %3990 = vmatpush1.bf16.msra.mxu0 %v8824_v32  ;;  %4072 = vmatpush1.bf16.msra.mxu1 %v8827_v7  ;;  %v8916_v32 = vld [vmem:[#allocation17 + $0x1c4] ss:$16 sps:$4 sm:$0xff]   ;;  %v8919_v7 = vld [vmem:[#allocation17 + $0x1cc] ss:$16 sps:$4 sm:$0xff]  }
 0xa69   :  { %4880 = vmatprep.subr.bf16.mxu0 %v8832_v35  ;;  %4962 = vmatprep.subr.bf16.mxu1 %v8835_v41  ;;  %v8917_v35 = vld [vmem:[#allocation17 + $0x1c8] ss:$16 sps:$4 sm:$0xff]   ;;  %v8922_v41 = vld [vmem:[#allocation17 + $0x1e4] ss:$16 sps:$4 sm:$0xff]  }
 0xa6b   :  { %3992 = vmatmul.mubr.bf16.vlgmr.msra.gmra.mrb[60].mxu0 %v3126_v12  ;;  %4074 = vmatmul.mubr.bf16.vlgmr.msra.gmra.mrb[60].mxu1 %v3126_v12  ;;  %v8923_v12 = vld [vmem:[#allocation17 + $0x1e8] ss:$16 sps:$4 sm:$0xff]  }
 0xa6c   :  { %4881 = vmatpush1.bf16.msra.mxu0 %v8830_v15  ;;  %4963 = vmatpush1.bf16.msra.mxu1 %v8833_v17  ;;  %v8925_v15 = vld [vmem:[#allocation17 + $0x1ec] ss:$16 sps:$4 sm:$0xff]   ;;  %v8920_v17 = vld [vmem:[#allocation17 + $0x1e0] ss:$16 sps:$4 sm:$0xff]  }
 0xa6d   :  { %4882 = vmatprep.subr.bf16.mxu0 %v8838_v1  ;;  %4964 = vmatprep.subr.bf16.mxu1 %v8841_v36  ;;  %v8928_v1 = vld [vmem:[#allocation17 + $0x204] ss:$16 sps:$4 sm:$0xff]   ;;  %v8931_v36 = vld [vmem:[#allocation17 + $0x20c] ss:$16 sps:$4 sm:$0xff]  }
 0xa70   :  { %4883 = vmatpush1.bf16.msra.mxu0 %v8836_v38  ;;  %4965 = vmatpush1.bf16.msra.mxu1 %v8839_v61  ;;  %v10742_v38 = vld [vmem:[%s10818_s9] sm:$0xf] }
 0xa71   :  { %4884 = vmatprep.subr.bf16.mxu0 %v8844_v58  ;;  %4966 = vmatprep.subr.bf16.mxu1 %v8847_v56  ;;  %v3261_v61 = vrot.slane %v10742_v38, %v10885_v20  ;;  %v3265_v58 = vrot.slane %v10742_v38, %v10887_v45  ;;  %v3273_v56 = vrot.slane %v10742_v38, %v10888_v47 }
 0xa74   :  { %4885 = vmatpush1.bf16.msra.mxu0 %v8842_v2  ;;  %4967 = vmatpush1.bf16.msra.mxu1 %v8845_v28 }
 0xa75   :  { %4886 = vmatprep.subr.bf16.mxu0 %v8850_v39  ;;  %4968 = vmatprep.subr.bf16.mxu1 %v8853_v31 }
 0xa78   :  { %4887 = vmatpush1.bf16.msra.mxu0 %v8848_v53  ;;  %4969 = vmatpush1.bf16.msra.mxu1 %v8851_v42 }
 0xa79   :  { %4888 = vmatprep.subr.bf16.mxu0 %v8856_v5  ;;  %4970 = vmatprep.subr.bf16.mxu1 %v8859_v62 }
 0xa7c   :  { %4889 = vmatpush1.bf16.msra.mxu0 %v8854_v55  ;;  %4971 = vmatpush1.bf16.msra.mxu1 %v8857_v57 }
 0xa7d   :  { %4890 = vmatprep.subr.bf16.mxu0 %v8862_v0  ;;  %4972 = vmatprep.subr.bf16.mxu1 %v8865_v3 }
 0xa80   :  { %4891 = vmatpush1.bf16.msra.mxu0 %v8860_v59  ;;  %4973 = vmatpush1.bf16.msra.mxu1 %v8863_v19 }
 0xa81   :  { %4892 = vmatprep.subr.bf16.mxu0 %v8868_v60  ;;  %4974 = vmatprep.subr.bf16.mxu1 %v8871_v10  ;;  %v8926_v10 = vld [vmem:[#allocation17 + $0x200] ss:$16 sps:$4 sm:$0xff]  }
 0xa84   :  { %4893 = vmatpush1.bf16.msra.mxu0 %v8866_v13  ;;  %4975 = vmatpush1.bf16.msra.mxu1 %v8869_v14  ;;  %v8929_v13 = vld [vmem:[#allocation17 + $0x208] ss:$16 sps:$4 sm:$0xff]  }
 0xa85   :  { %4894 = vmatprep.subr.bf16.mxu0 %v8874_v16  ;;  %4976 = vmatprep.subr.bf16.mxu1 %v8877_v18  ;;  %v8934_v16 = vld [vmem:[#allocation17 + $0x224] ss:$16 sps:$4 sm:$0xff]   ;;  %v8937_v18 = vld [vmem:[#allocation17 + $0x22c] ss:$16 sps:$4 sm:$0xff]  }
 0xa88   :  { %4895 = vmatpush1.bf16.msra.mxu0 %v8872_v11  ;;  %4977 = vmatpush1.bf16.msra.mxu1 %v8875_v24  ;;  %v8932_v24 = vld [vmem:[#allocation17 + $0x220] ss:$16 sps:$4 sm:$0xff]  }
 0xa89   :  { %4896 = vmatprep.subr.bf16.mxu0 %v8880_v26  ;;  %4978 = vmatprep.subr.bf16.mxu1 %v8883_v30  ;;  %v8935_v26 = vld [vmem:[#allocation17 + $0x228] ss:$16 sps:$4 sm:$0xff]   ;;  %v8940_v30 = vld [vmem:[#allocation17 + $0x244] ss:$16 sps:$4 sm:$0xff]  }
 0xa8c   :  { %4897 = vmatpush1.bf16.msra.mxu0 %v8878_v44  ;;  %4979 = vmatpush1.bf16.msra.mxu1 %v8881_v49  ;;  %v8943_v44 = vld [vmem:[#allocation17 + $0x24c] ss:$16 sps:$4 sm:$0xff]   ;;  %v8938_v49 = vld [vmem:[#allocation17 + $0x240] ss:$16 sps:$4 sm:$0xff]  }
 0xa8d   :  { %4898 = vmatprep.subr.bf16.mxu0 %v8886_v48  ;;  %4980 = vmatprep.subr.bf16.mxu1 %v8889_v46  ;;  %v8941_v48 = vld [vmem:[#allocation17 + $0x248] ss:$16 sps:$4 sm:$0xff]   ;;  %v8946_v46 = vld [vmem:[#allocation17 + $0x264] ss:$16 sps:$4 sm:$0xff]  }
 0xa90   :  { %4899 = vmatpush1.bf16.msra.mxu0 %v8884_v50  ;;  %4981 = vmatpush1.bf16.msra.mxu1 %v8887_v51  ;;  %v8949_v50 = vld [vmem:[#allocation17 + $0x26c] ss:$16 sps:$4 sm:$0xff]   ;;  %v8944_v51 = vld [vmem:[#allocation17 + $0x260] ss:$16 sps:$4 sm:$0xff]  }
 0xa91   :  { %4900 = vmatprep.subr.bf16.mxu0 %v8892_v52  ;;  %4982 = vmatprep.subr.bf16.mxu1 %v8895_v34  ;;  %v8947_v52 = vld [vmem:[#allocation17 + $0x268] ss:$16 sps:$4 sm:$0xff]   ;;  %v8952_v34 = vld [vmem:[#allocation17 + $0x284] ss:$16 sps:$4 sm:$0xff]  }
 0xa94   :  { %4901 = vmatpush1.bf16.msra.mxu0 %v8890_v37  ;;  %4983 = vmatpush1.bf16.msra.mxu1 %v8893_v40  ;;  %v8955_v37 = vld [vmem:[#allocation17 + $0x28c] ss:$16 sps:$4 sm:$0xff]   ;;  %v8950_v40 = vld [vmem:[#allocation17 + $0x280] ss:$16 sps:$4 sm:$0xff]  }
 0xa95   :  { %4902 = vmatprep.subr.bf16.mxu0 %v8898_v54  ;;  %4984 = vmatprep.subr.bf16.mxu1 %v8901_v4  ;;  %v8953_v54 = vld [vmem:[#allocation17 + $0x288] ss:$16 sps:$4 sm:$0xff]   ;;  %v8958_v4 = vld [vmem:[#allocation17 + $0x2a4] ss:$16 sps:$4 sm:$0xff]  }
 0xa98   :  { %4903 = vmatpush1.bf16.msra.mxu0 %v8896_v6  ;;  %4985 = vmatpush1.bf16.msra.mxu1 %v8899_v8  ;;  %v8961_v6 = vld [vmem:[#allocation17 + $0x2ac] ss:$16 sps:$4 sm:$0xff]   ;;  %v8956_v8 = vld [vmem:[#allocation17 + $0x2a0] ss:$16 sps:$4 sm:$0xff]  }
 0xa99   :  { %4904 = vmatprep.subr.bf16.mxu0 %v8904_v43  ;;  %4986 = vmatprep.subr.bf16.mxu1 %v8907_v33  ;;  %v8959_v43 = vld [vmem:[#allocation17 + $0x2a8] ss:$16 sps:$4 sm:$0xff]   ;;  %v8964_v33 = vld [vmem:[#allocation17 + $0x2c4] ss:$16 sps:$4 sm:$0xff]  }
 0xa9c   :  { %4905 = vmatpush1.bf16.msra.mxu0 %v8902_v27  ;;  %4987 = vmatpush1.bf16.msra.mxu1 %v8905_v25  ;;  %v8967_v27 = vld [vmem:[#allocation17 + $0x2cc] ss:$16 sps:$4 sm:$0xff]   ;;  %v8962_v25 = vld [vmem:[#allocation17 + $0x2c0] ss:$16 sps:$4 sm:$0xff]  }
 0xa9d   :  { %4906 = vmatprep.subr.bf16.mxu0 %v8910_v63  ;;  %4988 = vmatprep.subr.bf16.mxu1 %v8913_v29  ;;  %v8965_v63 = vld [vmem:[#allocation17 + $0x2c8] ss:$16 sps:$4 sm:$0xff]   ;;  %v8970_v29 = vld [vmem:[#allocation17 + $0x2e4] ss:$16 sps:$4 sm:$0xff]  }
 0xaa0   :  { %4907 = vmatpush1.bf16.msra.mxu0 %v8908_v21  ;;  %4989 = vmatpush1.bf16.msra.mxu1 %v8911_v23  ;;  %v8973_v21 = vld [vmem:[#allocation17 + $0x2ec] ss:$16 sps:$4 sm:$0xff]   ;;  %v8968_v23 = vld [vmem:[#allocation17 + $0x2e0] ss:$16 sps:$4 sm:$0xff]  }
 0xaa1   :  { %4908 = vmatprep.subr.bf16.mxu0 %v8916_v32  ;;  %4990 = vmatprep.subr.bf16.mxu1 %v8919_v7  ;;  %v8971_v32 = vld [vmem:[#allocation17 + $0x2e8] ss:$16 sps:$4 sm:$0xff]   ;;  %v8976_v7 = vld [vmem:[#allocation17 + $0x304] ss:$16 sps:$4 sm:$0xff]  }
 0xaa4   :  { %4909 = vmatpush1.bf16.msra.mxu0 %v8914_v9  ;;  %4991 = vmatpush1.bf16.msra.mxu1 %v8917_v35  ;;  %v8979_v9 = vld [vmem:[#allocation17 + $0x30c] ss:$16 sps:$4 sm:$0xff]   ;;  %v8974_v35 = vld [vmem:[#allocation17 + $0x300] ss:$16 sps:$4 sm:$0xff]  }
 0xaa5   :  { %4910 = vmatprep.subr.bf16.mxu0 %v8922_v41  ;;  %4992 = vmatprep.subr.bf16.mxu1 %v8925_v15  ;;  %v8977_v41 = vld [vmem:[#allocation17 + $0x308] ss:$16 sps:$4 sm:$0xff]   ;;  %v8982_v15 = vld [vmem:[#allocation17 + $0x324] ss:$16 sps:$4 sm:$0xff]  }
 0xaa8   :  { %4911 = vmatpush1.bf16.msra.mxu0 %v8920_v17  ;;  %4993 = vmatpush1.bf16.msra.mxu1 %v8923_v12  ;;  %v8985_v17 = vld [vmem:[#allocation17 + $0x32c] ss:$16 sps:$4 sm:$0xff]   ;;  %v8980_v12 = vld [vmem:[#allocation17 + $0x320] ss:$16 sps:$4 sm:$0xff]  }
 0xaa9   :  { %4921 = vmatprep.subr.bf16.mxu0 %v8928_v1  ;;  %5003 = vmatprep.subr.bf16.mxu1 %v8931_v36  ;;  %v8983_v1 = vld [vmem:[#allocation17 + $0x328] ss:$16 sps:$4 sm:$0xff]   ;;  %v8988_v36 = vld [vmem:[#allocation17 + $0x344] ss:$16 sps:$4 sm:$0xff]  }
 0xb3e   :  { %v3993_v2 = vpop.f32.mrb[60].mxu0  ;;  %v10750_v28 = vpop.f32.mrb[60].mxu1 }
 0xb3f   :  { %v8207_v39 = vadd.f32 %v3993_v2, %v3261_v61  ;;  %v3995_v31 = vpop.f32.mrb[61].mxu0  ;;  %v4077_v53 = vpop.f32.mrb[61].mxu1  ;;  %v8991_v61 = vld [vmem:[#allocation17 + $0x34c] ss:$16 sps:$4 sm:$0xff]   ;;  %v8994_v2 = vld [vmem:[#allocation17 + $0x364] ss:$16 sps:$4 sm:$0xff]  }
 0xb40   :  { %v8208_v42 = vadd.f32 %v3995_v31, %v3265_v58  ;;  %v8210_v5 = vadd.f32 %v4077_v53, %v3273_v56  ;;  %v3997_v62 = vpop.f32.mrb[62].mxu0  ;;  %v4079_v55 = vpop.f32.mrb[62].mxu1  ;;  %v8986_v58 = vld [vmem:[#allocation17 + $0x340] ss:$16 sps:$4 sm:$0xff]   ;;  %v8989_v56 = vld [vmem:[#allocation17 + $0x348] ss:$16 sps:$4 sm:$0xff]  }
 0xb41   :  { %v4082_v57 = vmax.f32 %v8207_v39, 0.0  ;;  %v3998_v0 = vpop.f32.mrb[63].mxu0  ;;  %v4080_v3 = vpop.f32.mrb[63].mxu1  ;;  %v8997_v39 = vld [vmem:[#allocation17 + $0x36c] ss:$16 sps:$4 sm:$0xff]  }
 0xb42   :  { %v4083_v59 = vmax.f32 %v8208_v42, 0.0  ;;  %v4085_v19 = vmax.f32 %v8210_v5, 0.0  ;;  %v8992_v31 = vld [vmem:[#allocation17 + $0x360] ss:$16 sps:$4 sm:$0xff]   ;;  %v8995_v53 = vld [vmem:[#allocation17 + $0x368] ss:$16 sps:$4 sm:$0xff]  }
 0xb43   :  { %v4086_v14 = vpack.c.bf16 %v4082_v57, %v4082_v57  ;;  %v9000_v42 = vld [vmem:[#allocation17 + $0x384] ss:$16 sps:$4 sm:$0xff]   ;;  %v9003_v5 = vld [vmem:[#allocation17 + $0x38c] ss:$16 sps:$4 sm:$0xff]   ;;  %v8998_v62 = vld [vmem:[#allocation17 + $0x380] ss:$16 sps:$4 sm:$0xff]  }
 0xb44   :  { %v4087_v60 = vpack.c.bf16 %v4083_v59, %v4083_v59  ;;  %v4089_v11 = vpack.c.bf16 %v4085_v19, %v4085_v19  ;;  %v9001_v55 = vld [vmem:[#allocation17 + $0x388] ss:$16 sps:$4 sm:$0xff]   ;;  %v9006_v57 = vld [vmem:[#allocation17 + $0x3a4] ss:$16 sps:$4 sm:$0xff]   ;;  %v9009_v0 = vld [vmem:[#allocation17 + $0x3ac] ss:$16 sps:$4 sm:$0xff]   ;;  %v3269_v19 = vrot.slane %v10742_v38, %v10886_v22 }
 0xb45   :  { %v9004_v3 = vld [vmem:[#allocation17 + $0x3a0] ss:$16 sps:$4 sm:$0xff]   ;;  %v9007_v59 = vld [vmem:[#allocation17 + $0x3a8] ss:$16 sps:$4 sm:$0xff]   ;;  %v9024_v38 = vld [vmem:[#allocation19 + $0x4] ss:$16 sps:$4 sm:$0xff]  }
 0xb46   :  { %4912 = vmatprep.mubr.bf16.mxu0 %v4087_v60  ;;  %4994 = vmatprep.mubr.bf16.mxu1 %v4087_v60  ;;  %v9012_v60 = vld [vmem:[#allocation17 + $0x3c4] ss:$16 sps:$4 sm:$0xff]  }
 0xb47   :  { %4913 = vmatmul.mubr.bf16.vlgmr.msra.gmra.mrb[64].mxu0 %v4086_v14  ;;  %4995 = vmatmul.mubr.bf16.vlgmr.msra.gmra.mrb[64].mxu1 %v4086_v14  ;;  %v9013_v14 = vld [vmem:[#allocation17 + $0x3c8] ss:$16 sps:$4 sm:$0xff]  }
 0xb48   :  { %4922 = vmatpush1.bf16.msra.mxu0 %v8926_v10  ;;  %5004 = vmatpush1.bf16.msra.mxu1 %v8929_v13  ;;  %v9015_v10 = vld [vmem:[#allocation17 + $0x3cc] ss:$16 sps:$4 sm:$0xff]   ;;  %v9010_v13 = vld [vmem:[#allocation17 + $0x3c0] ss:$16 sps:$4 sm:$0xff]  }
 0xb49   :  { %4953 = vmatprep.mubr.bf16.mxu0 %v4089_v11  ;;  %5035 = vmatprep.mubr.bf16.mxu1 %v4089_v11  ;;  %v9021_v11 = vld [vmem:[#allocation17 + $0x3ec] ss:$16 sps:$4 sm:$0xff]  }
 0xb4a   :  { %4923 = vmatprep.subr.bf16.mxu0 %v8934_v16  ;;  %5005 = vmatprep.subr.bf16.mxu1 %v8937_v18  ;;  %v8209_v16 = vadd.f32 %v10750_v28, %v3269_v19  ;;  %v9018_v18 = vld [vmem:[#allocation17 + $0x3e4] ss:$16 sps:$4 sm:$0xff]  }
 0xb4b   :  { %v9030_v28 = vld [vmem:[#allocation19 + $0x24] ss:$16 sps:$4 sm:$0xff]  }
 0xb4c   :  { %4924 = vmatpush1.bf16.msra.mxu0 %v8932_v24  ;;  %5006 = vmatpush1.bf16.msra.mxu1 %v8935_v26  ;;  %v9016_v24 = vld [vmem:[#allocation17 + $0x3e0] ss:$16 sps:$4 sm:$0xff]   ;;  %v9019_v26 = vld [vmem:[#allocation17 + $0x3e8] ss:$16 sps:$4 sm:$0xff]   ;;  %v9096_v19 = vld [vmem:[#allocation19 + $0x184] ss:$16 sps:$4 sm:$0xff]  }
 0xb4d   :  { %4925 = vmatprep.subr.bf16.mxu0 %v8940_v30  ;;  %5007 = vmatprep.subr.bf16.mxu1 %v8943_v44  ;;  %v4084_v30 = vmax.f32 %v8209_v16, 0.0  ;;  %v9027_v44 = vld [vmem:[#allocation19 + $0xc] ss:$16 sps:$4 sm:$0xff]  }
 0xb4e   :  { %v9105_v16 = vld [vmem:[#allocation19 + $0x1ac] ss:$16 sps:$4 sm:$0xff]  }
 0xb50   :  { %4926 = vmatpush1.bf16.msra.mxu0 %v8938_v49  ;;  %5008 = vmatpush1.bf16.msra.mxu1 %v8941_v48  ;;  %v9022_v49 = vld [vmem:[#allocation19] ss:$16 sps:$4 sm:$0xff]   ;;  %v9025_v48 = vld [vmem:[#allocation19 + $0x8] ss:$16 sps:$4 sm:$0xff]  }
 0xb51   :  { %4927 = vmatprep.subr.bf16.mxu0 %v8946_v46  ;;  %5009 = vmatprep.subr.bf16.mxu1 %v8949_v50  ;;  %v4088_v46 = vpack.c.bf16 %v4084_v30, %v4084_v30  ;;  %v9033_v50 = vld [vmem:[#allocation19 + $0x2c] ss:$16 sps:$4 sm:$0xff]   ;;  %v9106_v30 = vld [vmem:[#allocation19 + $0x1c0] ss:$16 sps:$4 sm:$0xff]  }
 0xb54   :  { %4928 = vmatpush1.bf16.msra.mxu0 %v8944_v51  ;;  %5010 = vmatpush1.bf16.msra.mxu1 %v8947_v52  ;;  %v9028_v51 = vld [vmem:[#allocation19 + $0x20] ss:$16 sps:$4 sm:$0xff]   ;;  %v9031_v52 = vld [vmem:[#allocation19 + $0x28] ss:$16 sps:$4 sm:$0xff]  }
 0xb55   :  { %4929 = vmatprep.subr.bf16.mxu0 %v8952_v34  ;;  %5011 = vmatprep.subr.bf16.mxu1 %v8955_v37  ;;  %v9036_v34 = vld [vmem:[#allocation19 + $0x44] ss:$16 sps:$4 sm:$0xff]   ;;  %v9039_v37 = vld [vmem:[#allocation19 + $0x4c] ss:$16 sps:$4 sm:$0xff]  }
 0xb58   :  { %4930 = vmatpush1.bf16.msra.mxu0 %v8950_v40  ;;  %5012 = vmatpush1.bf16.msra.mxu1 %v8953_v54  ;;  %v9034_v40 = vld [vmem:[#allocation19 + $0x40] ss:$16 sps:$4 sm:$0xff]   ;;  %v9037_v54 = vld [vmem:[#allocation19 + $0x48] ss:$16 sps:$4 sm:$0xff]  }
 0xb59   :  { %4931 = vmatprep.subr.bf16.mxu0 %v8958_v4  ;;  %5013 = vmatprep.subr.bf16.mxu1 %v8961_v6  ;;  %v9042_v4 = vld [vmem:[#allocation19 + $0x64] ss:$16 sps:$4 sm:$0xff]   ;;  %v9045_v6 = vld [vmem:[#allocation19 + $0x6c] ss:$16 sps:$4 sm:$0xff]  }
 0xb5c   :  { %4932 = vmatpush1.bf16.msra.mxu0 %v8956_v8  ;;  %5014 = vmatpush1.bf16.msra.mxu1 %v8959_v43  ;;  %v9040_v8 = vld [vmem:[#allocation19 + $0x60] ss:$16 sps:$4 sm:$0xff]   ;;  %v9043_v43 = vld [vmem:[#allocation19 + $0x68] ss:$16 sps:$4 sm:$0xff]  }
 0xb5d   :  { %4933 = vmatprep.subr.bf16.mxu0 %v8964_v33  ;;  %5015 = vmatprep.subr.bf16.mxu1 %v8967_v27  ;;  %v9048_v33 = vld [vmem:[#allocation19 + $0x84] ss:$16 sps:$4 sm:$0xff]   ;;  %v9051_v27 = vld [vmem:[#allocation19 + $0x8c] ss:$16 sps:$4 sm:$0xff]  }
 0xb60   :  { %4934 = vmatpush1.bf16.msra.mxu0 %v8962_v25  ;;  %5016 = vmatpush1.bf16.msra.mxu1 %v8965_v63  ;;  %v9046_v25 = vld [vmem:[#allocation19 + $0x80] ss:$16 sps:$4 sm:$0xff]   ;;  %v9049_v63 = vld [vmem:[#allocation19 + $0x88] ss:$16 sps:$4 sm:$0xff]  }
 0xb61   :  { %4935 = vmatprep.subr.bf16.mxu0 %v8970_v29  ;;  %5017 = vmatprep.subr.bf16.mxu1 %v8973_v21  ;;  %v9054_v29 = vld [vmem:[#allocation19 + $0xa4] ss:$16 sps:$4 sm:$0xff]   ;;  %v9057_v21 = vld [vmem:[#allocation19 + $0xac] ss:$16 sps:$4 sm:$0xff]  }
 0xb64   :  { %4936 = vmatpush1.bf16.msra.mxu0 %v8968_v23  ;;  %5018 = vmatpush1.bf16.msra.mxu1 %v8971_v32  ;;  %v9052_v23 = vld [vmem:[#allocation19 + $0xa0] ss:$16 sps:$4 sm:$0xff]   ;;  %v9055_v32 = vld [vmem:[#allocation19 + $0xa8] ss:$16 sps:$4 sm:$0xff]  }
 0xb65   :  { %4937 = vmatprep.subr.bf16.mxu0 %v8976_v7  ;;  %5019 = vmatprep.subr.bf16.mxu1 %v8979_v9  ;;  %v9060_v7 = vld [vmem:[#allocation19 + $0xc4] ss:$16 sps:$4 sm:$0xff]   ;;  %v9063_v9 = vld [vmem:[#allocation19 + $0xcc] ss:$16 sps:$4 sm:$0xff]  }
 0xb68   :  { %4938 = vmatpush1.bf16.msra.mxu0 %v8974_v35  ;;  %5020 = vmatpush1.bf16.msra.mxu1 %v8977_v41  ;;  %v9058_v35 = vld [vmem:[#allocation19 + $0xc0] ss:$16 sps:$4 sm:$0xff]   ;;  %v9061_v41 = vld [vmem:[#allocation19 + $0xc8] ss:$16 sps:$4 sm:$0xff]  }
 0xb69   :  { %4939 = vmatprep.subr.bf16.mxu0 %v8982_v15  ;;  %5021 = vmatprep.subr.bf16.mxu1 %v8985_v17  ;;  %v9066_v15 = vld [vmem:[#allocation19 + $0xe4] ss:$16 sps:$4 sm:$0xff]   ;;  %v9069_v17 = vld [vmem:[#allocation19 + $0xec] ss:$16 sps:$4 sm:$0xff]  }
 0xb6c   :  { %4940 = vmatpush1.bf16.msra.mxu0 %v8980_v12  ;;  %5022 = vmatpush1.bf16.msra.mxu1 %v8983_v1  ;;  %v9064_v12 = vld [vmem:[#allocation19 + $0xe0] ss:$16 sps:$4 sm:$0xff]   ;;  %v9067_v1 = vld [vmem:[#allocation19 + $0xe8] ss:$16 sps:$4 sm:$0xff]  }
 0xb6d   :  { %4941 = vmatprep.subr.bf16.mxu0 %v8988_v36  ;;  %5023 = vmatprep.subr.bf16.mxu1 %v8991_v61  ;;  %v9072_v36 = vld [vmem:[#allocation19 + $0x104] ss:$16 sps:$4 sm:$0xff]   ;;  %v9075_v61 = vld [vmem:[#allocation19 + $0x10c] ss:$16 sps:$4 sm:$0xff]  }
 0xb70   :  { %4942 = vmatpush1.bf16.msra.mxu0 %v8986_v58  ;;  %5024 = vmatpush1.bf16.msra.mxu1 %v8989_v56  ;;  %v9070_v58 = vld [vmem:[#allocation19 + $0x100] ss:$16 sps:$4 sm:$0xff]   ;;  %v9073_v56 = vld [vmem:[#allocation19 + $0x108] ss:$16 sps:$4 sm:$0xff]  }
 0xb71   :  { %4943 = vmatprep.subr.bf16.mxu0 %v8994_v2  ;;  %5025 = vmatprep.subr.bf16.mxu1 %v8997_v39  ;;  %v9078_v2 = vld [vmem:[#allocation19 + $0x124] ss:$16 sps:$4 sm:$0xff]   ;;  %v9081_v39 = vld [vmem:[#allocation19 + $0x12c] ss:$16 sps:$4 sm:$0xff]  }
 0xb74   :  { %4944 = vmatpush1.bf16.msra.mxu0 %v8992_v31  ;;  %5026 = vmatpush1.bf16.msra.mxu1 %v8995_v53  ;;  %v9076_v31 = vld [vmem:[#allocation19 + $0x120] ss:$16 sps:$4 sm:$0xff]   ;;  %v9079_v53 = vld [vmem:[#allocation19 + $0x128] ss:$16 sps:$4 sm:$0xff]  }
 0xb75   :  { %4945 = vmatprep.subr.bf16.mxu0 %v9000_v42  ;;  %5027 = vmatprep.subr.bf16.mxu1 %v9003_v5  ;;  %v9084_v42 = vld [vmem:[#allocation19 + $0x144] ss:$16 sps:$4 sm:$0xff]   ;;  %v9087_v5 = vld [vmem:[#allocation19 + $0x14c] ss:$16 sps:$4 sm:$0xff]  }
 0xb78   :  { %4946 = vmatpush1.bf16.msra.mxu0 %v8998_v62  ;;  %5028 = vmatpush1.bf16.msra.mxu1 %v9001_v55  ;;  %v9082_v62 = vld [vmem:[#allocation19 + $0x140] ss:$16 sps:$4 sm:$0xff]   ;;  %v9085_v55 = vld [vmem:[#allocation19 + $0x148] ss:$16 sps:$4 sm:$0xff]  }
 0xb79   :  { %4947 = vmatprep.subr.bf16.mxu0 %v9006_v57  ;;  %5029 = vmatprep.subr.bf16.mxu1 %v9009_v0  ;;  %v9090_v57 = vld [vmem:[#allocation19 + $0x164] ss:$16 sps:$4 sm:$0xff]   ;;  %v9093_v0 = vld [vmem:[#allocation19 + $0x16c] ss:$16 sps:$4 sm:$0xff]  }
 0xb7c   :  { %4948 = vmatpush1.bf16.msra.mxu0 %v9004_v3  ;;  %5030 = vmatpush1.bf16.msra.mxu1 %v9007_v59  ;;  %v9088_v3 = vld [vmem:[#allocation19 + $0x160] ss:$16 sps:$4 sm:$0xff]   ;;  %v9091_v59 = vld [vmem:[#allocation19 + $0x168] ss:$16 sps:$4 sm:$0xff]  }
 0xb7d   :  { %4949 = vmatprep.subr.bf16.mxu0 %v9012_v60  ;;  %5031 = vmatprep.subr.bf16.mxu1 %v9015_v10  ;;  %v9099_v60 = vld [vmem:[#allocation19 + $0x18c] ss:$16 sps:$4 sm:$0xff]   ;;  %v9094_v10 = vld [vmem:[#allocation19 + $0x180] ss:$16 sps:$4 sm:$0xff]  }
 0xb80   :  { %4950 = vmatpush1.bf16.msra.mxu0 %v9010_v13  ;;  %5032 = vmatpush1.bf16.msra.mxu1 %v9013_v14  ;;  %v9097_v13 = vld [vmem:[#allocation19 + $0x188] ss:$16 sps:$4 sm:$0xff]   ;;  %v9102_v14 = vld [vmem:[#allocation19 + $0x1a4] ss:$16 sps:$4 sm:$0xff]  }
 0xb81   :  { %4951 = vmatprep.subr.bf16.mxu0 %v9018_v18  ;;  %5033 = vmatprep.subr.bf16.mxu1 %v9021_v11  ;;  %v9100_v18 = vld [vmem:[#allocation19 + $0x1a0] ss:$16 sps:$4 sm:$0xff]   ;;  %v9103_v11 = vld [vmem:[#allocation19 + $0x1a8] ss:$16 sps:$4 sm:$0xff]  }
 0xb84   :  { %4952 = vmatpush1.bf16.msra.mxu0 %v9016_v24  ;;  %5034 = vmatpush1.bf16.msra.mxu1 %v9019_v26  ;;  %v9108_v24 = vld [vmem:[#allocation19 + $0x1c4] ss:$16 sps:$4 sm:$0xff]   ;;  %v9111_v26 = vld [vmem:[#allocation19 + $0x1cc] ss:$16 sps:$4 sm:$0xff]  }
 0xb85   :  { %5842 = vmatprep.subr.bf16.mxu0 %v9024_v38  ;;  %5924 = vmatprep.subr.bf16.mxu1 %v9027_v44  ;;  %v9109_v38 = vld [vmem:[#allocation19 + $0x1c8] ss:$16 sps:$4 sm:$0xff]   ;;  %v9114_v44 = vld [vmem:[#allocation19 + $0x1e4] ss:$16 sps:$4 sm:$0xff]  }
 0xb87   :  { %4954 = vmatmul.mubr.bf16.vlgmr.msra.gmra.mrb[64].mxu0 %v4088_v46  ;;  %5036 = vmatmul.mubr.bf16.vlgmr.msra.gmra.mrb[64].mxu1 %v4088_v46  ;;  %v9115_v46 = vld [vmem:[#allocation19 + $0x1e8] ss:$16 sps:$4 sm:$0xff]  }
 0xb88   :  { %5843 = vmatpush1.bf16.msra.mxu0 %v9022_v49  ;;  %5925 = vmatpush1.bf16.msra.mxu1 %v9025_v48  ;;  %v9117_v49 = vld [vmem:[#allocation19 + $0x1ec] ss:$16 sps:$4 sm:$0xff]   ;;  %v9112_v48 = vld [vmem:[#allocation19 + $0x1e0] ss:$16 sps:$4 sm:$0xff]  }
 0xb89   :  { %5844 = vmatprep.subr.bf16.mxu0 %v9030_v28  ;;  %5926 = vmatprep.subr.bf16.mxu1 %v9033_v50  ;;  %v9120_v28 = vld [vmem:[#allocation19 + $0x204] ss:$16 sps:$4 sm:$0xff]   ;;  %v9123_v50 = vld [vmem:[#allocation19 + $0x20c] ss:$16 sps:$4 sm:$0xff]  }
 0xb8c   :  { %5845 = vmatpush1.bf16.msra.mxu0 %v9028_v51  ;;  %5927 = vmatpush1.bf16.msra.mxu1 %v9031_v52  ;;  %v10758_v51 = vld [vmem:[%s10820_s11] sm:$0xf] }
 0xb8d   :  { %5846 = vmatprep.subr.bf16.mxu0 %v9036_v34  ;;  %5928 = vmatprep.subr.bf16.mxu1 %v9039_v37  ;;  %v4223_v52 = vrot.slane %v10758_v51, %v10885_v20  ;;  %v4227_v34 = vrot.slane %v10758_v51, %v10887_v45  ;;  %v4235_v37 = vrot.slane %v10758_v51, %v10888_v47 }
 0xb90   :  { %5847 = vmatpush1.bf16.msra.mxu0 %v9034_v40  ;;  %5929 = vmatpush1.bf16.msra.mxu1 %v9037_v54 }
 0xb91   :  { %5848 = vmatprep.subr.bf16.mxu0 %v9042_v4  ;;  %5930 = vmatprep.subr.bf16.mxu1 %v9045_v6 }
 0xb94   :  { %5849 = vmatpush1.bf16.msra.mxu0 %v9040_v8  ;;  %5931 = vmatpush1.bf16.msra.mxu1 %v9043_v43 }
 0xb95   :  { %5850 = vmatprep.subr.bf16.mxu0 %v9048_v33  ;;  %5932 = vmatprep.subr.bf16.mxu1 %v9051_v27 }
 0xb98   :  { %5851 = vmatpush1.bf16.msra.mxu0 %v9046_v25  ;;  %5933 = vmatpush1.bf16.msra.mxu1 %v9049_v63 }
 0xb99   :  { %5852 = vmatprep.subr.bf16.mxu0 %v9054_v29  ;;  %5934 = vmatprep.subr.bf16.mxu1 %v9057_v21 }
 0xb9c   :  { %5853 = vmatpush1.bf16.msra.mxu0 %v9052_v23  ;;  %5935 = vmatpush1.bf16.msra.mxu1 %v9055_v32 }
 0xb9d   :  { %5854 = vmatprep.subr.bf16.mxu0 %v9060_v7  ;;  %5936 = vmatprep.subr.bf16.mxu1 %v9063_v9  ;;  %v9118_v9 = vld [vmem:[#allocation19 + $0x200] ss:$16 sps:$4 sm:$0xff]  }
 0xba0   :  { %5855 = vmatpush1.bf16.msra.mxu0 %v9058_v35  ;;  %5937 = vmatpush1.bf16.msra.mxu1 %v9061_v41  ;;  %v9121_v35 = vld [vmem:[#allocation19 + $0x208] ss:$16 sps:$4 sm:$0xff]  }
 0xba1   :  { %5856 = vmatprep.subr.bf16.mxu0 %v9066_v15  ;;  %5938 = vmatprep.subr.bf16.mxu1 %v9069_v17  ;;  %v9126_v15 = vld [vmem:[#allocation19 + $0x224] ss:$16 sps:$4 sm:$0xff]   ;;  %v9129_v17 = vld [vmem:[#allocation19 + $0x22c] ss:$16 sps:$4 sm:$0xff]  }
 0xba4   :  { %5857 = vmatpush1.bf16.msra.mxu0 %v9064_v12  ;;  %5939 = vmatpush1.bf16.msra.mxu1 %v9067_v1  ;;  %v9124_v1 = vld [vmem:[#allocation19 + $0x220] ss:$16 sps:$4 sm:$0xff]  }
 0xba5   :  { %5858 = vmatprep.subr.bf16.mxu0 %v9072_v36  ;;  %5940 = vmatprep.subr.bf16.mxu1 %v9075_v61  ;;  %v9127_v36 = vld [vmem:[#allocation19 + $0x228] ss:$16 sps:$4 sm:$0xff]   ;;  %v9132_v61 = vld [vmem:[#allocation19 + $0x244] ss:$16 sps:$4 sm:$0xff]  }
 0xba8   :  { %5859 = vmatpush1.bf16.msra.mxu0 %v9070_v58  ;;  %5941 = vmatpush1.bf16.msra.mxu1 %v9073_v56  ;;  %v9135_v58 = vld [vmem:[#allocation19 + $0x24c] ss:$16 sps:$4 sm:$0xff]   ;;  %v9130_v56 = vld [vmem:[#allocation19 + $0x240] ss:$16 sps:$4 sm:$0xff]  }
 0xba9   :  { %5860 = vmatprep.subr.bf16.mxu0 %v9078_v2  ;;  %5942 = vmatprep.subr.bf16.mxu1 %v9081_v39  ;;  %v9133_v2 = vld [vmem:[#allocation19 + $0x248] ss:$16 sps:$4 sm:$0xff]   ;;  %v9138_v39 = vld [vmem:[#allocation19 + $0x264] ss:$16 sps:$4 sm:$0xff]  }
 0xbac   :  { %5861 = vmatpush1.bf16.msra.mxu0 %v9076_v31  ;;  %5943 = vmatpush1.bf16.msra.mxu1 %v9079_v53  ;;  %v9141_v31 = vld [vmem:[#allocation19 + $0x26c] ss:$16 sps:$4 sm:$0xff]   ;;  %v9136_v53 = vld [vmem:[#allocation19 + $0x260] ss:$16 sps:$4 sm:$0xff]  }
 0xbad   :  { %5862 = vmatprep.subr.bf16.mxu0 %v9084_v42  ;;  %5944 = vmatprep.subr.bf16.mxu1 %v9087_v5  ;;  %v9139_v42 = vld [vmem:[#allocation19 + $0x268] ss:$16 sps:$4 sm:$0xff]   ;;  %v9144_v5 = vld [vmem:[#allocation19 + $0x284] ss:$16 sps:$4 sm:$0xff]  }
 0xbb0   :  { %5863 = vmatpush1.bf16.msra.mxu0 %v9082_v62  ;;  %5945 = vmatpush1.bf16.msra.mxu1 %v9085_v55  ;;  %v9147_v62 = vld [vmem:[#allocation19 + $0x28c] ss:$16 sps:$4 sm:$0xff]   ;;  %v9142_v55 = vld [vmem:[#allocation19 + $0x280] ss:$16 sps:$4 sm:$0xff]  }
 0xbb1   :  { %5864 = vmatprep.subr.bf16.mxu0 %v9090_v57  ;;  %5946 = vmatprep.subr.bf16.mxu1 %v9093_v0  ;;  %v9145_v57 = vld [vmem:[#allocation19 + $0x288] ss:$16 sps:$4 sm:$0xff]   ;;  %v9150_v0 = vld [vmem:[#allocation19 + $0x2a4] ss:$16 sps:$4 sm:$0xff]  }
 0xbb4   :  { %5865 = vmatpush1.bf16.msra.mxu0 %v9088_v3  ;;  %5947 = vmatpush1.bf16.msra.mxu1 %v9091_v59  ;;  %v9153_v3 = vld [vmem:[#allocation19 + $0x2ac] ss:$16 sps:$4 sm:$0xff]   ;;  %v9148_v59 = vld [vmem:[#allocation19 + $0x2a0] ss:$16 sps:$4 sm:$0xff]  }
 0xbb5   :  { %5866 = vmatprep.subr.bf16.mxu0 %v9096_v19  ;;  %5948 = vmatprep.subr.bf16.mxu1 %v9099_v60  ;;  %v9151_v19 = vld [vmem:[#allocation19 + $0x2a8] ss:$16 sps:$4 sm:$0xff]   ;;  %v9156_v60 = vld [vmem:[#allocation19 + $0x2c4] ss:$16 sps:$4 sm:$0xff]  }
 0xbb8   :  { %5867 = vmatpush1.bf16.msra.mxu0 %v9094_v10  ;;  %5949 = vmatpush1.bf16.msra.mxu1 %v9097_v13  ;;  %v9159_v10 = vld [vmem:[#allocation19 + $0x2cc] ss:$16 sps:$4 sm:$0xff]   ;;  %v9154_v13 = vld [vmem:[#allocation19 + $0x2c0] ss:$16 sps:$4 sm:$0xff]  }
 0xbb9   :  { %5868 = vmatprep.subr.bf16.mxu0 %v9102_v14  ;;  %5950 = vmatprep.subr.bf16.mxu1 %v9105_v16  ;;  %v9157_v14 = vld [vmem:[#allocation19 + $0x2c8] ss:$16 sps:$4 sm:$0xff]   ;;  %v9162_v16 = vld [vmem:[#allocation19 + $0x2e4] ss:$16 sps:$4 sm:$0xff]  }
 0xbbc   :  { %5869 = vmatpush1.bf16.msra.mxu0 %v9100_v18  ;;  %5951 = vmatpush1.bf16.msra.mxu1 %v9103_v11  ;;  %v9165_v18 = vld [vmem:[#allocation19 + $0x2ec] ss:$16 sps:$4 sm:$0xff]   ;;  %v9160_v11 = vld [vmem:[#allocation19 + $0x2e0] ss:$16 sps:$4 sm:$0xff]  }
 0xbbd   :  { %5870 = vmatprep.subr.bf16.mxu0 %v9108_v24  ;;  %5952 = vmatprep.subr.bf16.mxu1 %v9111_v26  ;;  %v9163_v24 = vld [vmem:[#allocation19 + $0x2e8] ss:$16 sps:$4 sm:$0xff]   ;;  %v9168_v26 = vld [vmem:[#allocation19 + $0x304] ss:$16 sps:$4 sm:$0xff]  }
 0xbc0   :  { %5871 = vmatpush1.bf16.msra.mxu0 %v9106_v30  ;;  %5953 = vmatpush1.bf16.msra.mxu1 %v9109_v38  ;;  %v9171_v30 = vld [vmem:[#allocation19 + $0x30c] ss:$16 sps:$4 sm:$0xff]   ;;  %v9166_v38 = vld [vmem:[#allocation19 + $0x300] ss:$16 sps:$4 sm:$0xff]  }
 0xbc1   :  { %5872 = vmatprep.subr.bf16.mxu0 %v9114_v44  ;;  %5954 = vmatprep.subr.bf16.mxu1 %v9117_v49  ;;  %v9169_v44 = vld [vmem:[#allocation19 + $0x308] ss:$16 sps:$4 sm:$0xff]   ;;  %v9174_v49 = vld [vmem:[#allocation19 + $0x324] ss:$16 sps:$4 sm:$0xff]  }
 0xbc4   :  { %5873 = vmatpush1.bf16.msra.mxu0 %v9112_v48  ;;  %5955 = vmatpush1.bf16.msra.mxu1 %v9115_v46  ;;  %v9177_v48 = vld [vmem:[#allocation19 + $0x32c] ss:$16 sps:$4 sm:$0xff]   ;;  %v9172_v46 = vld [vmem:[#allocation19 + $0x320] ss:$16 sps:$4 sm:$0xff]  }
 0xbc5   :  { %5883 = vmatprep.subr.bf16.mxu0 %v9120_v28  ;;  %5965 = vmatprep.subr.bf16.mxu1 %v9123_v50  ;;  %v9175_v28 = vld [vmem:[#allocation19 + $0x328] ss:$16 sps:$4 sm:$0xff]   ;;  %v9180_v50 = vld [vmem:[#allocation19 + $0x344] ss:$16 sps:$4 sm:$0xff]  }
 0xc5a   :  { %v4955_v40 = vpop.f32.mrb[64].mxu0  ;;  %v10766_v54 = vpop.f32.mrb[64].mxu1 }
 0xc5b   :  { %v8211_v4 = vadd.f32 %v4955_v40, %v4223_v52  ;;  %v4957_v6 = vpop.f32.mrb[65].mxu0  ;;  %v5039_v8 = vpop.f32.mrb[65].mxu1  ;;  %v9183_v52 = vld [vmem:[#allocation19 + $0x34c] ss:$16 sps:$4 sm:$0xff]   ;;  %v9186_v40 = vld [vmem:[#allocation19 + $0x364] ss:$16 sps:$4 sm:$0xff]  }
 0xc5c   :  { %v8212_v43 = vadd.f32 %v4957_v6, %v4227_v34  ;;  %v8214_v33 = vadd.f32 %v5039_v8, %v4235_v37  ;;  %v4959_v27 = vpop.f32.mrb[66].mxu0  ;;  %v5041_v25 = vpop.f32.mrb[66].mxu1  ;;  %v9178_v34 = vld [vmem:[#allocation19 + $0x340] ss:$16 sps:$4 sm:$0xff]   ;;  %v9181_v37 = vld [vmem:[#allocation19 + $0x348] ss:$16 sps:$4 sm:$0xff]  }
 0xc5d   :  { %v5044_v63 = vmax.f32 %v8211_v4, 0.0  ;;  %v4960_v29 = vpop.f32.mrb[67].mxu0  ;;  %v5042_v21 = vpop.f32.mrb[67].mxu1  ;;  %v9189_v4 = vld [vmem:[#allocation19 + $0x36c] ss:$16 sps:$4 sm:$0xff]  }
 0xc5e   :  { %v5045_v23 = vmax.f32 %v8212_v43, 0.0  ;;  %v5047_v32 = vmax.f32 %v8214_v33, 0.0  ;;  %v9184_v6 = vld [vmem:[#allocation19 + $0x360] ss:$16 sps:$4 sm:$0xff]   ;;  %v9187_v8 = vld [vmem:[#allocation19 + $0x368] ss:$16 sps:$4 sm:$0xff]  }
 0xc5f   :  { %v5048_v41 = vpack.c.bf16 %v5044_v63, %v5044_v63  ;;  %v9192_v43 = vld [vmem:[#allocation19 + $0x384] ss:$16 sps:$4 sm:$0xff]   ;;  %v9195_v33 = vld [vmem:[#allocation19 + $0x38c] ss:$16 sps:$4 sm:$0xff]   ;;  %v9190_v27 = vld [vmem:[#allocation19 + $0x380] ss:$16 sps:$4 sm:$0xff]  }
 0xc60   :  { %v5049_v7 = vpack.c.bf16 %v5045_v23, %v5045_v23  ;;  %v5051_v12 = vpack.c.bf16 %v5047_v32, %v5047_v32  ;;  %v9193_v25 = vld [vmem:[#allocation19 + $0x388] ss:$16 sps:$4 sm:$0xff]   ;;  %v9198_v63 = vld [vmem:[#allocation19 + $0x3a4] ss:$16 sps:$4 sm:$0xff]   ;;  %v9201_v29 = vld [vmem:[#allocation19 + $0x3ac] ss:$16 sps:$4 sm:$0xff]   ;;  %v4231_v32 = vrot.slane %v10758_v51, %v10886_v22 }
 0xc61   :  { %v9196_v21 = vld [vmem:[#allocation19 + $0x3a0] ss:$16 sps:$4 sm:$0xff]   ;;  %v9199_v23 = vld [vmem:[#allocation19 + $0x3a8] ss:$16 sps:$4 sm:$0xff]   ;;  %v9216_v51 = vld [vmem:[#allocation20 + $0x4] ss:$16 sps:$4 sm:$0xff]  }
 0xc62   :  { %5874 = vmatprep.mubr.bf16.mxu0 %v5049_v7  ;;  %5956 = vmatprep.mubr.bf16.mxu1 %v5049_v7  ;;  %v9204_v7 = vld [vmem:[#allocation19 + $0x3c4] ss:$16 sps:$4 sm:$0xff]  }
 0xc63   :  { %5875 = vmatmul.mubr.bf16.vlgmr.msra.gmra.mrb[68].mxu0 %v5048_v41  ;;  %5957 = vmatmul.mubr.bf16.vlgmr.msra.gmra.mrb[68].mxu1 %v5048_v41  ;;  %v9205_v41 = vld [vmem:[#allocation19 + $0x3c8] ss:$16 sps:$4 sm:$0xff]  }
 0xc64   :  { %5884 = vmatpush1.bf16.msra.mxu0 %v9118_v9  ;;  %5966 = vmatpush1.bf16.msra.mxu1 %v9121_v35  ;;  %v9207_v9 = vld [vmem:[#allocation19 + $0x3cc] ss:$16 sps:$4 sm:$0xff]   ;;  %v9202_v35 = vld [vmem:[#allocation19 + $0x3c0] ss:$16 sps:$4 sm:$0xff]  }
 0xc65   :  { %5915 = vmatprep.mubr.bf16.mxu0 %v5051_v12  ;;  %5997 = vmatprep.mubr.bf16.mxu1 %v5051_v12  ;;  %v9213_v12 = vld [vmem:[#allocation19 + $0x3ec] ss:$16 sps:$4 sm:$0xff]  }
 0xc66   :  { %5885 = vmatprep.subr.bf16.mxu0 %v9126_v15  ;;  %5967 = vmatprep.subr.bf16.mxu1 %v9129_v17  ;;  %v8213_v15 = vadd.f32 %v10766_v54, %v4231_v32  ;;  %v9210_v17 = vld [vmem:[#allocation19 + $0x3e4] ss:$16 sps:$4 sm:$0xff]  }
 0xc67   :  { %v9222_v54 = vld [vmem:[#allocation20 + $0x24] ss:$16 sps:$4 sm:$0xff]  }
 0xc68   :  { %5886 = vmatpush1.bf16.msra.mxu0 %v9124_v1  ;;  %5968 = vmatpush1.bf16.msra.mxu1 %v9127_v36  ;;  %v9208_v1 = vld [vmem:[#allocation19 + $0x3e0] ss:$16 sps:$4 sm:$0xff]   ;;  %v9211_v36 = vld [vmem:[#allocation19 + $0x3e8] ss:$16 sps:$4 sm:$0xff]   ;;  %v9288_v32 = vld [vmem:[#allocation20 + $0x184] ss:$16 sps:$4 sm:$0xff]  }
 0xc69   :  { %5887 = vmatprep.subr.bf16.mxu0 %v9132_v61  ;;  %5969 = vmatprep.subr.bf16.mxu1 %v9135_v58  ;;  %v5046_v61 = vmax.f32 %v8213_v15, 0.0  ;;  %v9219_v58 = vld [vmem:[#allocation20 + $0xc] ss:$16 sps:$4 sm:$0xff]  }
 0xc6a   :  { %v9297_v15 = vld [vmem:[#allocation20 + $0x1ac] ss:$16 sps:$4 sm:$0xff]  }
 0xc6c   :  { %5888 = vmatpush1.bf16.msra.mxu0 %v9130_v56  ;;  %5970 = vmatpush1.bf16.msra.mxu1 %v9133_v2  ;;  %v9214_v56 = vld [vmem:[#allocation20] ss:$16 sps:$4 sm:$0xff]   ;;  %v9217_v2 = vld [vmem:[#allocation20 + $0x8] ss:$16 sps:$4 sm:$0xff]  }
 0xc6d   :  { %5889 = vmatprep.subr.bf16.mxu0 %v9138_v39  ;;  %5971 = vmatprep.subr.bf16.mxu1 %v9141_v31  ;;  %v5050_v39 = vpack.c.bf16 %v5046_v61, %v5046_v61  ;;  %v9225_v31 = vld [vmem:[#allocation20 + $0x2c] ss:$16 sps:$4 sm:$0xff]   ;;  %v9298_v61 = vld [vmem:[#allocation20 + $0x1c0] ss:$16 sps:$4 sm:$0xff]  }
 0xc70   :  { %5890 = vmatpush1.bf16.msra.mxu0 %v9136_v53  ;;  %5972 = vmatpush1.bf16.msra.mxu1 %v9139_v42  ;;  %v9220_v53 = vld [vmem:[#allocation20 + $0x20] ss:$16 sps:$4 sm:$0xff]   ;;  %v9223_v42 = vld [vmem:[#allocation20 + $0x28] ss:$16 sps:$4 sm:$0xff]  }
 0xc71   :  { %5891 = vmatprep.subr.bf16.mxu0 %v9144_v5  ;;  %5973 = vmatprep.subr.bf16.mxu1 %v9147_v62  ;;  %v9228_v5 = vld [vmem:[#allocation20 + $0x44] ss:$16 sps:$4 sm:$0xff]   ;;  %v9231_v62 = vld [vmem:[#allocation20 + $0x4c] ss:$16 sps:$4 sm:$0xff]  }
 0xc74   :  { %5892 = vmatpush1.bf16.msra.mxu0 %v9142_v55  ;;  %5974 = vmatpush1.bf16.msra.mxu1 %v9145_v57  ;;  %v9226_v55 = vld [vmem:[#allocation20 + $0x40] ss:$16 sps:$4 sm:$0xff]   ;;  %v9229_v57 = vld [vmem:[#allocation20 + $0x48] ss:$16 sps:$4 sm:$0xff]  }
 0xc75   :  { %5893 = vmatprep.subr.bf16.mxu0 %v9150_v0  ;;  %5975 = vmatprep.subr.bf16.mxu1 %v9153_v3  ;;  %v9234_v0 = vld [vmem:[#allocation20 + $0x64] ss:$16 sps:$4 sm:$0xff]   ;;  %v9237_v3 = vld [vmem:[#allocation20 + $0x6c] ss:$16 sps:$4 sm:$0xff]  }
 0xc78   :  { %5894 = vmatpush1.bf16.msra.mxu0 %v9148_v59  ;;  %5976 = vmatpush1.bf16.msra.mxu1 %v9151_v19  ;;  %v9232_v59 = vld [vmem:[#allocation20 + $0x60] ss:$16 sps:$4 sm:$0xff]   ;;  %v9235_v19 = vld [vmem:[#allocation20 + $0x68] ss:$16 sps:$4 sm:$0xff]  }
 0xc79   :  { %5895 = vmatprep.subr.bf16.mxu0 %v9156_v60  ;;  %5977 = vmatprep.subr.bf16.mxu1 %v9159_v10  ;;  %v9240_v60 = vld [vmem:[#allocation20 + $0x84] ss:$16 sps:$4 sm:$0xff]   ;;  %v9243_v10 = vld [vmem:[#allocation20 + $0x8c] ss:$16 sps:$4 sm:$0xff]  }
 0xc7c   :  { %5896 = vmatpush1.bf16.msra.mxu0 %v9154_v13  ;;  %5978 = vmatpush1.bf16.msra.mxu1 %v9157_v14  ;;  %v9238_v13 = vld [vmem:[#allocation20 + $0x80] ss:$16 sps:$4 sm:$0xff]   ;;  %v9241_v14 = vld [vmem:[#allocation20 + $0x88] ss:$16 sps:$4 sm:$0xff]  }
 0xc7d   :  { %5897 = vmatprep.subr.bf16.mxu0 %v9162_v16  ;;  %5979 = vmatprep.subr.bf16.mxu1 %v9165_v18  ;;  %v9246_v16 = vld [vmem:[#allocation20 + $0xa4] ss:$16 sps:$4 sm:$0xff]   ;;  %v9249_v18 = vld [vmem:[#allocation20 + $0xac] ss:$16 sps:$4 sm:$0xff]  }
 0xc80   :  { %5898 = vmatpush1.bf16.msra.mxu0 %v9160_v11  ;;  %5980 = vmatpush1.bf16.msra.mxu1 %v9163_v24  ;;  %v9244_v11 = vld [vmem:[#allocation20 + $0xa0] ss:$16 sps:$4 sm:$0xff]   ;;  %v9247_v24 = vld [vmem:[#allocation20 + $0xa8] ss:$16 sps:$4 sm:$0xff]  }
 0xc81   :  { %5899 = vmatprep.subr.bf16.mxu0 %v9168_v26  ;;  %5981 = vmatprep.subr.bf16.mxu1 %v9171_v30  ;;  %v9252_v26 = vld [vmem:[#allocation20 + $0xc4] ss:$16 sps:$4 sm:$0xff]   ;;  %v9255_v30 = vld [vmem:[#allocation20 + $0xcc] ss:$16 sps:$4 sm:$0xff]  }
 0xc84   :  { %5900 = vmatpush1.bf16.msra.mxu0 %v9166_v38  ;;  %5982 = vmatpush1.bf16.msra.mxu1 %v9169_v44  ;;  %v9250_v38 = vld [vmem:[#allocation20 + $0xc0] ss:$16 sps:$4 sm:$0xff]   ;;  %v9253_v44 = vld [vmem:[#allocation20 + $0xc8] ss:$16 sps:$4 sm:$0xff]  }
 0xc85   :  { %5901 = vmatprep.subr.bf16.mxu0 %v9174_v49  ;;  %5983 = vmatprep.subr.bf16.mxu1 %v9177_v48  ;;  %v9258_v49 = vld [vmem:[#allocation20 + $0xe4] ss:$16 sps:$4 sm:$0xff]   ;;  %v9261_v48 = vld [vmem:[#allocation20 + $0xec] ss:$16 sps:$4 sm:$0xff]  }
 0xc88   :  { %5902 = vmatpush1.bf16.msra.mxu0 %v9172_v46  ;;  %5984 = vmatpush1.bf16.msra.mxu1 %v9175_v28  ;;  %v9256_v46 = vld [vmem:[#allocation20 + $0xe0] ss:$16 sps:$4 sm:$0xff]   ;;  %v9259_v28 = vld [vmem:[#allocation20 + $0xe8] ss:$16 sps:$4 sm:$0xff]  }
 0xc89   :  { %5903 = vmatprep.subr.bf16.mxu0 %v9180_v50  ;;  %5985 = vmatprep.subr.bf16.mxu1 %v9183_v52  ;;  %v9264_v50 = vld [vmem:[#allocation20 + $0x104] ss:$16 sps:$4 sm:$0xff]   ;;  %v9267_v52 = vld [vmem:[#allocation20 + $0x10c] ss:$16 sps:$4 sm:$0xff]  }
 0xc8c   :  { %5904 = vmatpush1.bf16.msra.mxu0 %v9178_v34  ;;  %5986 = vmatpush1.bf16.msra.mxu1 %v9181_v37  ;;  %v9262_v34 = vld [vmem:[#allocation20 + $0x100] ss:$16 sps:$4 sm:$0xff]   ;;  %v9265_v37 = vld [vmem:[#allocation20 + $0x108] ss:$16 sps:$4 sm:$0xff]  }
 0xc8d   :  { %5905 = vmatprep.subr.bf16.mxu0 %v9186_v40  ;;  %5987 = vmatprep.subr.bf16.mxu1 %v9189_v4  ;;  %v9270_v40 = vld [vmem:[#allocation20 + $0x124] ss:$16 sps:$4 sm:$0xff]   ;;  %v9273_v4 = vld [vmem:[#allocation20 + $0x12c] ss:$16 sps:$4 sm:$0xff]  }
 0xc90   :  { %5906 = vmatpush1.bf16.msra.mxu0 %v9184_v6  ;;  %5988 = vmatpush1.bf16.msra.mxu1 %v9187_v8  ;;  %v9268_v6 = vld [vmem:[#allocation20 + $0x120] ss:$16 sps:$4 sm:$0xff]   ;;  %v9271_v8 = vld [vmem:[#allocation20 + $0x128] ss:$16 sps:$4 sm:$0xff]  }
 0xc91   :  { %5907 = vmatprep.subr.bf16.mxu0 %v9192_v43  ;;  %5989 = vmatprep.subr.bf16.mxu1 %v9195_v33  ;;  %v9276_v43 = vld [vmem:[#allocation20 + $0x144] ss:$16 sps:$4 sm:$0xff]   ;;  %v9279_v33 = vld [vmem:[#allocation20 + $0x14c] ss:$16 sps:$4 sm:$0xff]  }
 0xc94   :  { %5908 = vmatpush1.bf16.msra.mxu0 %v9190_v27  ;;  %5990 = vmatpush1.bf16.msra.mxu1 %v9193_v25  ;;  %v9274_v27 = vld [vmem:[#allocation20 + $0x140] ss:$16 sps:$4 sm:$0xff]   ;;  %v9277_v25 = vld [vmem:[#allocation20 + $0x148] ss:$16 sps:$4 sm:$0xff]  }
 0xc95   :  { %5909 = vmatprep.subr.bf16.mxu0 %v9198_v63  ;;  %5991 = vmatprep.subr.bf16.mxu1 %v9201_v29  ;;  %v9282_v63 = vld [vmem:[#allocation20 + $0x164] ss:$16 sps:$4 sm:$0xff]   ;;  %v9285_v29 = vld [vmem:[#allocation20 + $0x16c] ss:$16 sps:$4 sm:$0xff]  }
 0xc98   :  { %5910 = vmatpush1.bf16.msra.mxu0 %v9196_v21  ;;  %5992 = vmatpush1.bf16.msra.mxu1 %v9199_v23  ;;  %v9280_v21 = vld [vmem:[#allocation20 + $0x160] ss:$16 sps:$4 sm:$0xff]   ;;  %v9283_v23 = vld [vmem:[#allocation20 + $0x168] ss:$16 sps:$4 sm:$0xff]  }
 0xc99   :  { %5911 = vmatprep.subr.bf16.mxu0 %v9204_v7  ;;  %5993 = vmatprep.subr.bf16.mxu1 %v9207_v9  ;;  %v9291_v7 = vld [vmem:[#allocation20 + $0x18c] ss:$16 sps:$4 sm:$0xff]   ;;  %v9286_v9 = vld [vmem:[#allocation20 + $0x180] ss:$16 sps:$4 sm:$0xff]  }
 0xc9c   :  { %5912 = vmatpush1.bf16.msra.mxu0 %v9202_v35  ;;  %5994 = vmatpush1.bf16.msra.mxu1 %v9205_v41  ;;  %v9289_v35 = vld [vmem:[#allocation20 + $0x188] ss:$16 sps:$4 sm:$0xff]   ;;  %v9294_v41 = vld [vmem:[#allocation20 + $0x1a4] ss:$16 sps:$4 sm:$0xff]  }
 0xc9d   :  { %5913 = vmatprep.subr.bf16.mxu0 %v9210_v17  ;;  %5995 = vmatprep.subr.bf16.mxu1 %v9213_v12  ;;  %v9292_v17 = vld [vmem:[#allocation20 + $0x1a0] ss:$16 sps:$4 sm:$0xff]   ;;  %v9295_v12 = vld [vmem:[#allocation20 + $0x1a8] ss:$16 sps:$4 sm:$0xff]  }
 0xca0   :  { %5914 = vmatpush1.bf16.msra.mxu0 %v9208_v1  ;;  %5996 = vmatpush1.bf16.msra.mxu1 %v9211_v36  ;;  %v9300_v1 = vld [vmem:[#allocation20 + $0x1c4] ss:$16 sps:$4 sm:$0xff]   ;;  %v9303_v36 = vld [vmem:[#allocation20 + $0x1cc] ss:$16 sps:$4 sm:$0xff]  }
 0xca1   :  { %6804 = vmatprep.subr.bf16.mxu0 %v9216_v51  ;;  %6886 = vmatprep.subr.bf16.mxu1 %v9219_v58  ;;  %v9301_v51 = vld [vmem:[#allocation20 + $0x1c8] ss:$16 sps:$4 sm:$0xff]   ;;  %v9306_v58 = vld [vmem:[#allocation20 + $0x1e4] ss:$16 sps:$4 sm:$0xff]  }
 0xca3   :  { %5916 = vmatmul.mubr.bf16.vlgmr.msra.gmra.mrb[68].mxu0 %v5050_v39  ;;  %5998 = vmatmul.mubr.bf16.vlgmr.msra.gmra.mrb[68].mxu1 %v5050_v39  ;;  %v9307_v39 = vld [vmem:[#allocation20 + $0x1e8] ss:$16 sps:$4 sm:$0xff]  }
 0xca4   :  { %6805 = vmatpush1.bf16.msra.mxu0 %v9214_v56  ;;  %6887 = vmatpush1.bf16.msra.mxu1 %v9217_v2  ;;  %v9309_v56 = vld [vmem:[#allocation20 + $0x1ec] ss:$16 sps:$4 sm:$0xff]   ;;  %v9304_v2 = vld [vmem:[#allocation20 + $0x1e0] ss:$16 sps:$4 sm:$0xff]  }
 0xca5   :  { %6806 = vmatprep.subr.bf16.mxu0 %v9222_v54  ;;  %6888 = vmatprep.subr.bf16.mxu1 %v9225_v31  ;;  %v9312_v54 = vld [vmem:[#allocation20 + $0x204] ss:$16 sps:$4 sm:$0xff]   ;;  %v9315_v31 = vld [vmem:[#allocation20 + $0x20c] ss:$16 sps:$4 sm:$0xff]  }
 0xca8   :  { %6807 = vmatpush1.bf16.msra.mxu0 %v9220_v53  ;;  %6889 = vmatpush1.bf16.msra.mxu1 %v9223_v42  ;;  %v10774_v53 = vld [vmem:[%s10822_s13] sm:$0xf] }
 0xca9   :  { %6808 = vmatprep.subr.bf16.mxu0 %v9228_v5  ;;  %6890 = vmatprep.subr.bf16.mxu1 %v9231_v62  ;;  %v5185_v42 = vrot.slane %v10774_v53, %v10885_v20  ;;  %v5189_v5 = vrot.slane %v10774_v53, %v10887_v45  ;;  %v5197_v62 = vrot.slane %v10774_v53, %v10888_v47 }
 0xcac   :  { %6809 = vmatpush1.bf16.msra.mxu0 %v9226_v55  ;;  %6891 = vmatpush1.bf16.msra.mxu1 %v9229_v57 }
 0xcad   :  { %6810 = vmatprep.subr.bf16.mxu0 %v9234_v0  ;;  %6892 = vmatprep.subr.bf16.mxu1 %v9237_v3 }
 0xcb0   :  { %6811 = vmatpush1.bf16.msra.mxu0 %v9232_v59  ;;  %6893 = vmatpush1.bf16.msra.mxu1 %v9235_v19 }
 0xcb1   :  { %6812 = vmatprep.subr.bf16.mxu0 %v9240_v60  ;;  %6894 = vmatprep.subr.bf16.mxu1 %v9243_v10 }
 0xcb4   :  { %6813 = vmatpush1.bf16.msra.mxu0 %v9238_v13  ;;  %6895 = vmatpush1.bf16.msra.mxu1 %v9241_v14 }
 0xcb5   :  { %6814 = vmatprep.subr.bf16.mxu0 %v9246_v16  ;;  %6896 = vmatprep.subr.bf16.mxu1 %v9249_v18 }
 0xcb8   :  { %6815 = vmatpush1.bf16.msra.mxu0 %v9244_v11  ;;  %6897 = vmatpush1.bf16.msra.mxu1 %v9247_v24 }
 0xcb9   :  { %6816 = vmatprep.subr.bf16.mxu0 %v9252_v26  ;;  %6898 = vmatprep.subr.bf16.mxu1 %v9255_v30  ;;  %v9310_v30 = vld [vmem:[#allocation20 + $0x200] ss:$16 sps:$4 sm:$0xff]  }
 0xcbc   :  { %6817 = vmatpush1.bf16.msra.mxu0 %v9250_v38  ;;  %6899 = vmatpush1.bf16.msra.mxu1 %v9253_v44  ;;  %v9313_v38 = vld [vmem:[#allocation20 + $0x208] ss:$16 sps:$4 sm:$0xff]  }
 0xcbd   :  { %6818 = vmatprep.subr.bf16.mxu0 %v9258_v49  ;;  %6900 = vmatprep.subr.bf16.mxu1 %v9261_v48  ;;  %v9318_v49 = vld [vmem:[#allocation20 + $0x224] ss:$16 sps:$4 sm:$0xff]   ;;  %v9321_v48 = vld [vmem:[#allocation20 + $0x22c] ss:$16 sps:$4 sm:$0xff]  }
 0xcc0   :  { %6819 = vmatpush1.bf16.msra.mxu0 %v9256_v46  ;;  %6901 = vmatpush1.bf16.msra.mxu1 %v9259_v28  ;;  %v9316_v28 = vld [vmem:[#allocation20 + $0x220] ss:$16 sps:$4 sm:$0xff]  }
 0xcc1   :  { %6820 = vmatprep.subr.bf16.mxu0 %v9264_v50  ;;  %6902 = vmatprep.subr.bf16.mxu1 %v9267_v52  ;;  %v9319_v50 = vld [vmem:[#allocation20 + $0x228] ss:$16 sps:$4 sm:$0xff]   ;;  %v9324_v52 = vld [vmem:[#allocation20 + $0x244] ss:$16 sps:$4 sm:$0xff]  }
 0xcc4   :  { %6821 = vmatpush1.bf16.msra.mxu0 %v9262_v34  ;;  %6903 = vmatpush1.bf16.msra.mxu1 %v9265_v37  ;;  %v9327_v34 = vld [vmem:[#allocation20 + $0x24c] ss:$16 sps:$4 sm:$0xff]   ;;  %v9322_v37 = vld [vmem:[#allocation20 + $0x240] ss:$16 sps:$4 sm:$0xff]  }
 0xcc5   :  { %6822 = vmatprep.subr.bf16.mxu0 %v9270_v40  ;;  %6904 = vmatprep.subr.bf16.mxu1 %v9273_v4  ;;  %v9325_v40 = vld [vmem:[#allocation20 + $0x248] ss:$16 sps:$4 sm:$0xff]   ;;  %v9330_v4 = vld [vmem:[#allocation20 + $0x264] ss:$16 sps:$4 sm:$0xff]  }
 0xcc8   :  { %6823 = vmatpush1.bf16.msra.mxu0 %v9268_v6  ;;  %6905 = vmatpush1.bf16.msra.mxu1 %v9271_v8  ;;  %v9333_v6 = vld [vmem:[#allocation20 + $0x26c] ss:$16 sps:$4 sm:$0xff]   ;;  %v9328_v8 = vld [vmem:[#allocation20 + $0x260] ss:$16 sps:$4 sm:$0xff]  }
 0xcc9   :  { %6824 = vmatprep.subr.bf16.mxu0 %v9276_v43  ;;  %6906 = vmatprep.subr.bf16.mxu1 %v9279_v33  ;;  %v9331_v43 = vld [vmem:[#allocation20 + $0x268] ss:$16 sps:$4 sm:$0xff]   ;;  %v9336_v33 = vld [vmem:[#allocation20 + $0x284] ss:$16 sps:$4 sm:$0xff]  }
 0xccc   :  { %6825 = vmatpush1.bf16.msra.mxu0 %v9274_v27  ;;  %6907 = vmatpush1.bf16.msra.mxu1 %v9277_v25  ;;  %v9339_v27 = vld [vmem:[#allocation20 + $0x28c] ss:$16 sps:$4 sm:$0xff]   ;;  %v9334_v25 = vld [vmem:[#allocation20 + $0x280] ss:$16 sps:$4 sm:$0xff]  }
 0xccd   :  { %6826 = vmatprep.subr.bf16.mxu0 %v9282_v63  ;;  %6908 = vmatprep.subr.bf16.mxu1 %v9285_v29  ;;  %v9337_v63 = vld [vmem:[#allocation20 + $0x288] ss:$16 sps:$4 sm:$0xff]   ;;  %v9342_v29 = vld [vmem:[#allocation20 + $0x2a4] ss:$16 sps:$4 sm:$0xff]  }
 0xcd0   :  { %6827 = vmatpush1.bf16.msra.mxu0 %v9280_v21  ;;  %6909 = vmatpush1.bf16.msra.mxu1 %v9283_v23  ;;  %v9345_v21 = vld [vmem:[#allocation20 + $0x2ac] ss:$16 sps:$4 sm:$0xff]   ;;  %v9340_v23 = vld [vmem:[#allocation20 + $0x2a0] ss:$16 sps:$4 sm:$0xff]  }
 0xcd1   :  { %6828 = vmatprep.subr.bf16.mxu0 %v9288_v32  ;;  %6910 = vmatprep.subr.bf16.mxu1 %v9291_v7  ;;  %v9343_v32 = vld [vmem:[#allocation20 + $0x2a8] ss:$16 sps:$4 sm:$0xff]   ;;  %v9348_v7 = vld [vmem:[#allocation20 + $0x2c4] ss:$16 sps:$4 sm:$0xff]  }
 0xcd4   :  { %6829 = vmatpush1.bf16.msra.mxu0 %v9286_v9  ;;  %6911 = vmatpush1.bf16.msra.mxu1 %v9289_v35  ;;  %v9351_v9 = vld [vmem:[#allocation20 + $0x2cc] ss:$16 sps:$4 sm:$0xff]   ;;  %v9346_v35 = vld [vmem:[#allocation20 + $0x2c0] ss:$16 sps:$4 sm:$0xff]  }
 0xcd5   :  { %6830 = vmatprep.subr.bf16.mxu0 %v9294_v41  ;;  %6912 = vmatprep.subr.bf16.mxu1 %v9297_v15  ;;  %v9349_v41 = vld [vmem:[#allocation20 + $0x2c8] ss:$16 sps:$4 sm:$0xff]   ;;  %v9354_v15 = vld [vmem:[#allocation20 + $0x2e4] ss:$16 sps:$4 sm:$0xff]  }
 0xcd8   :  { %6831 = vmatpush1.bf16.msra.mxu0 %v9292_v17  ;;  %6913 = vmatpush1.bf16.msra.mxu1 %v9295_v12  ;;  %v9357_v17 = vld [vmem:[#allocation20 + $0x2ec] ss:$16 sps:$4 sm:$0xff]   ;;  %v9352_v12 = vld [vmem:[#allocation20 + $0x2e0] ss:$16 sps:$4 sm:$0xff]  }
 0xcd9   :  { %6832 = vmatprep.subr.bf16.mxu0 %v9300_v1  ;;  %6914 = vmatprep.subr.bf16.mxu1 %v9303_v36  ;;  %v9355_v1 = vld [vmem:[#allocation20 + $0x2e8] ss:$16 sps:$4 sm:$0xff]   ;;  %v9360_v36 = vld [vmem:[#allocation20 + $0x304] ss:$16 sps:$4 sm:$0xff]  }
 0xcdc   :  { %6833 = vmatpush1.bf16.msra.mxu0 %v9298_v61  ;;  %6915 = vmatpush1.bf16.msra.mxu1 %v9301_v51  ;;  %v9363_v61 = vld [vmem:[#allocation20 + $0x30c] ss:$16 sps:$4 sm:$0xff]   ;;  %v9358_v51 = vld [vmem:[#allocation20 + $0x300] ss:$16 sps:$4 sm:$0xff]  }
 0xcdd   :  { %6834 = vmatprep.subr.bf16.mxu0 %v9306_v58  ;;  %6916 = vmatprep.subr.bf16.mxu1 %v9309_v56  ;;  %v9361_v58 = vld [vmem:[#allocation20 + $0x308] ss:$16 sps:$4 sm:$0xff]   ;;  %v9366_v56 = vld [vmem:[#allocation20 + $0x324] ss:$16 sps:$4 sm:$0xff]  }
 0xce0   :  { %6835 = vmatpush1.bf16.msra.mxu0 %v9304_v2  ;;  %6917 = vmatpush1.bf16.msra.mxu1 %v9307_v39  ;;  %v9369_v2 = vld [vmem:[#allocation20 + $0x32c] ss:$16 sps:$4 sm:$0xff]   ;;  %v9364_v39 = vld [vmem:[#allocation20 + $0x320] ss:$16 sps:$4 sm:$0xff]  }
 0xce1   :  { %6845 = vmatprep.subr.bf16.mxu0 %v9312_v54  ;;  %6927 = vmatprep.subr.bf16.mxu1 %v9315_v31  ;;  %v9367_v54 = vld [vmem:[#allocation20 + $0x328] ss:$16 sps:$4 sm:$0xff]   ;;  %v9372_v31 = vld [vmem:[#allocation20 + $0x344] ss:$16 sps:$4 sm:$0xff]  }
 0xd76   :  { %v5917_v55 = vpop.f32.mrb[68].mxu0  ;;  %v10782_v57 = vpop.f32.mrb[68].mxu1 }
 0xd77   :  { %v8215_v0 = vadd.f32 %v5917_v55, %v5185_v42  ;;  %v5919_v3 = vpop.f32.mrb[69].mxu0  ;;  %v6001_v59 = vpop.f32.mrb[69].mxu1  ;;  %v9375_v42 = vld [vmem:[#allocation20 + $0x34c] ss:$16 sps:$4 sm:$0xff]   ;;  %v9378_v55 = vld [vmem:[#allocation20 + $0x364] ss:$16 sps:$4 sm:$0xff]  }
 0xd78   :  { %v8216_v19 = vadd.f32 %v5919_v3, %v5189_v5  ;;  %v8218_v60 = vadd.f32 %v6001_v59, %v5197_v62  ;;  %v5921_v10 = vpop.f32.mrb[70].mxu0  ;;  %v6003_v13 = vpop.f32.mrb[70].mxu1  ;;  %v9370_v5 = vld [vmem:[#allocation20 + $0x340] ss:$16 sps:$4 sm:$0xff]   ;;  %v9373_v62 = vld [vmem:[#allocation20 + $0x348] ss:$16 sps:$4 sm:$0xff]  }
 0xd79   :  { %v6006_v14 = vmax.f32 %v8215_v0, 0.0  ;;  %v5922_v16 = vpop.f32.mrb[71].mxu0  ;;  %v6004_v18 = vpop.f32.mrb[71].mxu1  ;;  %v9381_v0 = vld [vmem:[#allocation20 + $0x36c] ss:$16 sps:$4 sm:$0xff]  }
 0xd7a   :  { %v6007_v11 = vmax.f32 %v8216_v19, 0.0  ;;  %v6009_v24 = vmax.f32 %v8218_v60, 0.0  ;;  %v9376_v3 = vld [vmem:[#allocation20 + $0x360] ss:$16 sps:$4 sm:$0xff]   ;;  %v9379_v59 = vld [vmem:[#allocation20 + $0x368] ss:$16 sps:$4 sm:$0xff]  }
 0xd7b   :  { %v6010_v44 = vpack.c.bf16 %v6006_v14, %v6006_v14  ;;  %v9384_v19 = vld [vmem:[#allocation20 + $0x384] ss:$16 sps:$4 sm:$0xff]   ;;  %v9387_v60 = vld [vmem:[#allocation20 + $0x38c] ss:$16 sps:$4 sm:$0xff]   ;;  %v9382_v10 = vld [vmem:[#allocation20 + $0x380] ss:$16 sps:$4 sm:$0xff]  }
 0xd7c   :  { %v6011_v26 = vpack.c.bf16 %v6007_v11, %v6007_v11  ;;  %v6013_v46 = vpack.c.bf16 %v6009_v24, %v6009_v24  ;;  %v9385_v13 = vld [vmem:[#allocation20 + $0x388] ss:$16 sps:$4 sm:$0xff]   ;;  %v9390_v14 = vld [vmem:[#allocation20 + $0x3a4] ss:$16 sps:$4 sm:$0xff]   ;;  %v9393_v16 = vld [vmem:[#allocation20 + $0x3ac] ss:$16 sps:$4 sm:$0xff]   ;;  %v5193_v24 = vrot.slane %v10774_v53, %v10886_v22 }
 0xd7d   :  { %v9388_v18 = vld [vmem:[#allocation20 + $0x3a0] ss:$16 sps:$4 sm:$0xff]   ;;  %v9391_v11 = vld [vmem:[#allocation20 + $0x3a8] ss:$16 sps:$4 sm:$0xff]  }
 0xd7e   :  { %6836 = vmatprep.mubr.bf16.mxu0 %v6011_v26  ;;  %6918 = vmatprep.mubr.bf16.mxu1 %v6011_v26  ;;  %v9396_v26 = vld [vmem:[#allocation20 + $0x3c4] ss:$16 sps:$4 sm:$0xff]  }
 0xd7f   :  { %6837 = vmatmul.mubr.bf16.vlgmr.msra.gmra.mrb[72].mxu0 %v6010_v44  ;;  %6919 = vmatmul.mubr.bf16.vlgmr.msra.gmra.mrb[72].mxu1 %v6010_v44  ;;  %v9397_v44 = vld [vmem:[#allocation20 + $0x3c8] ss:$16 sps:$4 sm:$0xff]   ;;  %v9406_v53 = vld [vmem:[#allocation22 + $0x40] sm:$0xff]  }
 0xd80   :  { %6846 = vmatpush1.bf16.msra.mxu0 %v9310_v30  ;;  %6928 = vmatpush1.bf16.msra.mxu1 %v9313_v38  ;;  %v9399_v30 = vld [vmem:[#allocation20 + $0x3cc] ss:$16 sps:$4 sm:$0xff]   ;;  %v9394_v38 = vld [vmem:[#allocation20 + $0x3c0] ss:$16 sps:$4 sm:$0xff]  }
 0xd81   :  { %6877 = vmatprep.mubr.bf16.mxu0 %v6013_v46  ;;  %6959 = vmatprep.mubr.bf16.mxu1 %v6013_v46  ;;  %v9405_v46 = vld [vmem:[#allocation20 + $0x3ec] ss:$16 sps:$4 sm:$0xff]  }
 0xd82   :  { %6847 = vmatprep.subr.bf16.mxu0 %v9318_v49  ;;  %6929 = vmatprep.subr.bf16.mxu1 %v9321_v48  ;;  %v8217_v49 = vadd.f32 %v10782_v57, %v5193_v24  ;;  %v9402_v48 = vld [vmem:[#allocation20 + $0x3e4] ss:$16 sps:$4 sm:$0xff]   ;;  %v9410_v57 = vld [vmem:[#allocation22 + $0x48] sm:$0xff]  }
 0xd84   :  { %6848 = vmatpush1.bf16.msra.mxu0 %v9316_v28  ;;  %6930 = vmatpush1.bf16.msra.mxu1 %v9319_v50  ;;  %v9400_v28 = vld [vmem:[#allocation20 + $0x3e0] ss:$16 sps:$4 sm:$0xff]   ;;  %v9403_v50 = vld [vmem:[#allocation20 + $0x3e8] ss:$16 sps:$4 sm:$0xff]  }
 0xd85   :  { %6849 = vmatprep.subr.bf16.mxu0 %v9324_v52  ;;  %6931 = vmatprep.subr.bf16.mxu1 %v9327_v34  ;;  %v6008_v52 = vmax.f32 %v8217_v49, 0.0  ;;  %v9407_v34 = vld [vmem:[#allocation22 + $0xc0] sm:$0xff]  }
 0xd88   :  { %6850 = vmatpush1.bf16.msra.mxu0 %v9322_v37  ;;  %6932 = vmatpush1.bf16.msra.mxu1 %v9325_v40  ;;  %v9408_v37 = vld [vmem:[#allocation22] sm:$0xff]  }
 0xd89   :  { %6851 = vmatprep.subr.bf16.mxu0 %v9330_v4  ;;  %6933 = vmatprep.subr.bf16.mxu1 %v9333_v6  ;;  %v9409_v40 = vld [vmem:[#allocation22 + $0x80] sm:$0xff]   ;;  %v6012_v4 = vpack.c.bf16 %v6008_v52, %v6008_v52  ;;  %v9411_v6 = vld [vmem:[#allocation22 + $0xc8] sm:$0xff]  }
 0xd8c   :  { %6852 = vmatpush1.bf16.msra.mxu0 %v9328_v8  ;;  %6934 = vmatpush1.bf16.msra.mxu1 %v9331_v43  ;;  %v9412_v8 = vld [vmem:[#allocation22 + $0x8] sm:$0xff]  }
 0xd8d   :  { %6853 = vmatprep.subr.bf16.mxu0 %v9336_v33  ;;  %6935 = vmatprep.subr.bf16.mxu1 %v9339_v27  ;;  %v9413_v43 = vld [vmem:[#allocation22 + $0x88] sm:$0xff]   ;;  %v9414_v33 = vld [vmem:[#allocation22 + $0x50] sm:$0xff]  }
 0xd8e   :  { %v9415_v27 = vld [vmem:[#allocation22 + $0xd0] sm:$0xff]  }
 0xd90   :  { %6854 = vmatpush1.bf16.msra.mxu0 %v9334_v25  ;;  %6936 = vmatpush1.bf16.msra.mxu1 %v9337_v63  ;;  %v9416_v25 = vld [vmem:[#allocation22 + $0x10] sm:$0xff]  }
 0xd91   :  { %6855 = vmatprep.subr.bf16.mxu0 %v9342_v29  ;;  %6937 = vmatprep.subr.bf16.mxu1 %v9345_v21  ;;  %v9417_v63 = vld [vmem:[#allocation22 + $0x90] sm:$0xff]   ;;  %v9418_v29 = vld [vmem:[#allocation22 + $0x58] sm:$0xff]  }
 0xd92   :  { %v9419_v21 = vld [vmem:[#allocation22 + $0xd8] sm:$0xff]  }
 0xd94   :  { %6856 = vmatpush1.bf16.msra.mxu0 %v9340_v23  ;;  %6938 = vmatpush1.bf16.msra.mxu1 %v9343_v32  ;;  %v9420_v23 = vld [vmem:[#allocation22 + $0x18] sm:$0xff]  }
 0xd95   :  { %6857 = vmatprep.subr.bf16.mxu0 %v9348_v7  ;;  %6939 = vmatprep.subr.bf16.mxu1 %v9351_v9  ;;  %v9421_v32 = vld [vmem:[#allocation22 + $0x98] sm:$0xff]   ;;  %v9422_v7 = vld [vmem:[#allocation22 + $0x60] sm:$0xff]  }
 0xd96   :  { %v9423_v9 = vld [vmem:[#allocation22 + $0xe0] sm:$0xff]  }
 0xd98   :  { %6858 = vmatpush1.bf16.msra.mxu0 %v9346_v35  ;;  %6940 = vmatpush1.bf16.msra.mxu1 %v9349_v41  ;;  %v9424_v35 = vld [vmem:[#allocation22 + $0x20] sm:$0xff]  }
 0xd99   :  { %6859 = vmatprep.subr.bf16.mxu0 %v9354_v15  ;;  %6941 = vmatprep.subr.bf16.mxu1 %v9357_v17  ;;  %v9425_v41 = vld [vmem:[#allocation22 + $0xa0] sm:$0xff]   ;;  %v9426_v15 = vld [vmem:[#allocation22 + $0x68] sm:$0xff]  }
 0xd9a   :  { %v9427_v17 = vld [vmem:[#allocation22 + $0xe8] sm:$0xff]  }
 0xd9c   :  { %6860 = vmatpush1.bf16.msra.mxu0 %v9352_v12  ;;  %6942 = vmatpush1.bf16.msra.mxu1 %v9355_v1  ;;  %v9428_v12 = vld [vmem:[#allocation22 + $0x28] sm:$0xff]  }
 0xd9d   :  { %6861 = vmatprep.subr.bf16.mxu0 %v9360_v36  ;;  %6943 = vmatprep.subr.bf16.mxu1 %v9363_v61  ;;  %v9429_v1 = vld [vmem:[#allocation22 + $0xa8] sm:$0xff]   ;;  %v9430_v36 = vld [vmem:[#allocation22 + $0x70] sm:$0xff]  }
 0xd9e   :  { %v9431_v61 = vld [vmem:[#allocation22 + $0xf0] sm:$0xff]  }
 0xda0   :  { %6862 = vmatpush1.bf16.msra.mxu0 %v9358_v51  ;;  %6944 = vmatpush1.bf16.msra.mxu1 %v9361_v58  ;;  %v9432_v51 = vld [vmem:[#allocation22 + $0x30] sm:$0xff]  }
 0xda1   :  { %6863 = vmatprep.subr.bf16.mxu0 %v9366_v56  ;;  %6945 = vmatprep.subr.bf16.mxu1 %v9369_v2  ;;  %v9433_v58 = vld [vmem:[#allocation22 + $0xb0] sm:$0xff]   ;;  %v9434_v56 = vld [vmem:[#allocation22 + $0x78] sm:$0xff]  }
 0xda2   :  { %v9435_v2 = vld [vmem:[#allocation22 + $0xf8] sm:$0xff]  }
 0xda4   :  { %6864 = vmatpush1.bf16.msra.mxu0 %v9364_v39  ;;  %6946 = vmatpush1.bf16.msra.mxu1 %v9367_v54  ;;  %v9436_v39 = vld [vmem:[#allocation22 + $0x38] sm:$0xff]  }
 0xda5   :  { %6865 = vmatprep.subr.bf16.mxu0 %v9372_v31  ;;  %6947 = vmatprep.subr.bf16.mxu1 %v9375_v42  ;;  %v9437_v54 = vld [vmem:[#allocation22 + $0xb8] sm:$0xff]   ;;  %v6142_v31 = vld [vmem:[%s10824_s15] sm:$0xf] }
 0xda6   :  { %v6147_v42 = vrot.slane %v6142_v31, %v10885_v20 }
 0xda8   :  { %6866 = vmatpush1.bf16.msra.mxu0 %v9370_v5  ;;  %6948 = vmatpush1.bf16.msra.mxu1 %v9373_v62  ;;  %v6155_v5 = vrot.slane %v6142_v31, %v10886_v22  ;;  %v6151_v62 = vrot.slane %v6142_v31, %v10887_v45 }
 0xda9   :  { %6867 = vmatprep.subr.bf16.mxu0 %v9378_v55  ;;  %6949 = vmatprep.subr.bf16.mxu1 %v9381_v0  ;;  %v6159_v55 = vrot.slane %v6142_v31, %v10888_v47 }
 0xdac   :  { %6868 = vmatpush1.bf16.msra.mxu0 %v9376_v3  ;;  %6950 = vmatpush1.bf16.msra.mxu1 %v9379_v59 }
 0xdad   :  { %6869 = vmatprep.subr.bf16.mxu0 %v9384_v19  ;;  %6951 = vmatprep.subr.bf16.mxu1 %v9387_v60 }
 0xdb0   :  { %6870 = vmatpush1.bf16.msra.mxu0 %v9382_v10  ;;  %6952 = vmatpush1.bf16.msra.mxu1 %v9385_v13 }
 0xdb1   :  { %6871 = vmatprep.subr.bf16.mxu0 %v9390_v14  ;;  %6953 = vmatprep.subr.bf16.mxu1 %v9393_v16 }
 0xdb4   :  { %6872 = vmatpush1.bf16.msra.mxu0 %v9388_v18  ;;  %6954 = vmatpush1.bf16.msra.mxu1 %v9391_v11 }
 0xdb5   :  { %6873 = vmatprep.subr.bf16.mxu0 %v9396_v26  ;;  %6955 = vmatprep.subr.bf16.mxu1 %v9399_v30 }
 0xdb8   :  { %6874 = vmatpush1.bf16.msra.mxu0 %v9394_v38  ;;  %6956 = vmatpush1.bf16.msra.mxu1 %v9397_v44 }
 0xdb9   :  { %6875 = vmatprep.subr.bf16.mxu0 %v9402_v48  ;;  %6957 = vmatprep.subr.bf16.mxu1 %v9405_v46  ;;  %v8130_v46 = vld [vmem:[%s10826_s17] ss:$0 sm:$0xff] }
 0xdbc   :  { %6876 = vmatpush1.bf16.msra.mxu0 %v9400_v28  ;;  %6958 = vmatpush1.bf16.msra.mxu1 %v9403_v50 }
 0xdbd   :  { %8163 = vmatprep.subr.bf16.mxu0 %v9406_v53  ;;  %8185 = vmatprep.subr.bf16.mxu1 %v9407_v34 }
 0xdbf   :  { %6878 = vmatmul.mubr.bf16.vlgmr.msra.gmra.mrb[72].mxu0 %v6012_v4  ;;  %6960 = vmatmul.mubr.bf16.vlgmr.msra.gmra.mrb[72].mxu1 %v6012_v4 }
 0xdc0   :  { %8164 = vmatpush3.bf16.msra.mxu0 %v9408_v37  ;;  %8186 = vmatpush3.bf16.msra.mxu1 %v9409_v40 }
 0xdc1   :  { %8165 = vmatprep.subr.bf16.mxu0 %v9410_v57  ;;  %8187 = vmatprep.subr.bf16.mxu1 %v9411_v6 }
 0xdc4   :  { %8166 = vmatpush3.bf16.msra.mxu0 %v9412_v8  ;;  %8188 = vmatpush3.bf16.msra.mxu1 %v9413_v43 }
 0xdc5   :  { %8167 = vmatprep.subr.bf16.mxu0 %v9414_v33  ;;  %8189 = vmatprep.subr.bf16.mxu1 %v9415_v27 }
 0xdc8   :  { %8168 = vmatpush3.bf16.msra.mxu0 %v9416_v25  ;;  %8190 = vmatpush3.bf16.msra.mxu1 %v9417_v63 }
 0xdc9   :  { %8169 = vmatprep.subr.bf16.mxu0 %v9418_v29  ;;  %8191 = vmatprep.subr.bf16.mxu1 %v9419_v21 }
 0xdcc   :  { %8170 = vmatpush3.bf16.msra.mxu0 %v9420_v23  ;;  %8192 = vmatpush3.bf16.msra.mxu1 %v9421_v32 }
 0xdcd   :  { %8171 = vmatprep.subr.bf16.mxu0 %v9422_v7  ;;  %8193 = vmatprep.subr.bf16.mxu1 %v9423_v9 }
 0xdd0   :  { %8172 = vmatpush3.bf16.msra.mxu0 %v9424_v35  ;;  %8194 = vmatpush3.bf16.msra.mxu1 %v9425_v41 }
 0xdd1   :  { %8173 = vmatprep.subr.bf16.mxu0 %v9426_v15  ;;  %8195 = vmatprep.subr.bf16.mxu1 %v9427_v17 }
 0xdd4   :  { %8174 = vmatpush3.bf16.msra.mxu0 %v9428_v12  ;;  %8196 = vmatpush3.bf16.msra.mxu1 %v9429_v1 }
 0xdd5   :  { %8175 = vmatprep.subr.bf16.mxu0 %v9430_v36  ;;  %8197 = vmatprep.subr.bf16.mxu1 %v9431_v61 }
 0xdd8   :  { %8176 = vmatpush3.bf16.msra.mxu0 %v9432_v51  ;;  %8198 = vmatpush3.bf16.msra.mxu1 %v9433_v58 }
 0xdd9   :  { %8177 = vmatprep.subr.bf16.mxu0 %v9434_v56  ;;  %8199 = vmatprep.subr.bf16.mxu1 %v9435_v2 }
 0xddc   :  { %8178 = vmatpush3.bf16.msra.mxu0 %v9436_v39  ;;  %8200 = vmatpush3.bf16.msra.mxu1 %v9437_v54 }
 0xe92   :  { %v6879_v0 = vpop.f32.mrb[72].mxu0  ;;  %v6961_v3 = vpop.f32.mrb[72].mxu1 }
 0xe93   :  { %v8219_v59 = vadd.f32 %v6879_v0, %v6147_v42  ;;  %v8221_v19 = vadd.f32 %v6961_v3, %v6155_v5  ;;  %v6881_v60 = vpop.f32.mrb[73].mxu0  ;;  %v6963_v10 = vpop.f32.mrb[73].mxu1 }
 0xe94   :  { %v8220_v13 = vadd.f32 %v6881_v60, %v6151_v62  ;;  %v8222_v14 = vadd.f32 %v6963_v10, %v6159_v55  ;;  %v6883_v16 = vpop.f32.mrb[74].mxu0  ;;  %v6965_v18 = vpop.f32.mrb[74].mxu1 }
 0xe95   :  { %v6968_v11 = vmax.f32 %v8219_v59, 0.0  ;;  %v6970_v24 = vmax.f32 %v8221_v19, 0.0  ;;  %v6884_v26 = vpop.f32.mrb[75].mxu0  ;;  %v6966_v20 = vpop.f32.mrb[75].mxu1 }
 0xe96   :  { %v6969_v30 = vmax.f32 %v8220_v13, 0.0  ;;  %v6971_v22 = vmax.f32 %v8222_v14, 0.0 }
 0xe97   :  { %v6972_v44 = vpack.c.bf16 %v6968_v11, %v6968_v11  ;;  %v6974_v47 = vpack.c.bf16 %v6970_v24, %v6970_v24 }
 0xe98   :  { %v6973_v38 = vpack.c.bf16 %v6969_v30, %v6969_v30  ;;  %v6975_v45 = vpack.c.bf16 %v6971_v22, %v6971_v22 }
 0xe9a   :  { %7271 = vmatprep.mubr.bf16.mxu0 %v6973_v38  ;;  %7311 = vmatprep.mubr.bf16.mxu1 %v6975_v45 }
 0xe9b   :  { %7272 = vmatmul.mubr.bf16.vlgmr.msra.gmra.mrb[76].mxu0 %v6972_v44  ;;  %7312 = vmatmul.mubr.bf16.vlgmr.msra.gmra.mrb[76].mxu1 %v6974_v47 }
 0xf6e   :  { %v8179_v49 = vpop.f32.mrb[76].mxu0  ;;  %v8201_v48 = vpop.f32.mrb[76].mxu1 }
 0xf6f   :  { %v8180_v28 = vpop.f32.mrb[77].mxu0  ;;  %v8202_v50 = vpop.f32.mrb[77].mxu1 }
 0xf70   :  { %v8181_v52 = vadd.f32 %v8180_v28, %v8179_v49  ;;  %v8203_v53 = vadd.f32 %v8202_v50, %v8201_v48  ;;  %v8182_v34 = vpop.f32.mrb[78].mxu0  ;;  %v8204_v37 = vpop.f32.mrb[78].mxu1 }
 0xf71   :  { %v8183_v40 = vpop.f32.mrb[79].mxu0  ;;  %v8205_v4 = vpop.f32.mrb[79].mxu1 }
 0xf72   :  { %v7274_v57 = vadd.f32 %v8181_v52, %v8130_v46 }
 0xf74   :  { %v7314_v6 = vadd.f32 %v8203_v53, %v7274_v57 }
 0xf76   :  { %7319 = vst [vmem:[#allocation23] sm:$0xff] %v7314_v6 }
 0xf77   :  { %9851 = shalt.err (!%p9848_p8)
}
 0xf78   :  { %s9852_s10 = scalar_lea.hbm %s10827_s18, 128 }
 0xf79   :  { %p9853_p9 = scmp.ne.s32.totalorder %s10827_s18, %s9852_s10  ;;  %p9856_p10 = scmp.lt.u32.totalorder %s9852_s10, %s10827_s18 }
 0xf7b   :  { %p9858_p11 = pnand %p9856_p10, %p9853_p9 }
 0xf7d   :  { %9861 = shalt.err (!%p9858_p11)
}
 0xf7e   :  { %7329 = dma.vmem_to_hbm [thread:$0]  %s7327_s20, 128, %s10827_s18, [#allocation7]  }
 0xf7f   :  { %9874 = dma.done.wait [#allocation7], 128  }
 0xf80   :  { %9875 = vsyncadd [#allocation7], 4294967168 }
 0xf81   :  { %7333 = vsyncpa [#allocation6], 1 }
 0xf82   :  { %7334 = vsyncpa [#allocation9], 1 }
 0xf83   :  { %7335 = vsyncpa [#allocation12], 1 }
 0xf84   :  { %7336 = vsyncpa [#allocation15], 1 }
 0xf85   :  { %7337 = vsyncpa [#allocation18], 1 }
 0xf86   :  { %7338 = vsyncpa [#allocation21], 1 }
 0xf87   :  { %7339 = vsyncpa [#allocation7], 1 }

</bundles_post_ra>
